<compile_context>
chip_gen: v6e
topology: v6e:2x2x1
jax: 0.10.0
libtpu: 0.0.40
codegen_flags: <defaults>
</compile_context>

<pallas_src>
import functools
import math

import jax
import jax.numpy as jnp
from jax.experimental import pallas as pl
from jax.experimental.pallas import tpu as pltpu


# Exact softmax division (False) for bit-faithful validation against PyTorch;
# approx=True routes the reciprocal to the EUP slot (recommended in production).
USE_APPROX_RECIPROCAL = True


def _detect_vmem_capacity_bytes():
    try:
        info = pltpu.get_tpu_info()
        cap = getattr(info, "vmem_capacity_bytes", None)
        if cap:
            return int(cap)
    except Exception:
        pass
    return 64 * 1024 * 1024   # conservative fallback (v7x-sized VMEM)


_VMEM_CAP = _detect_vmem_capacity_bytes()
# ~48 MiB scoped limit on v7x (64 MiB physical), ~96 MiB on v5e/v6e (128 MiB).
VMEM_LIMIT_BYTES = min(int(_VMEM_CAP * 0.75), _VMEM_CAP - 8 * 1024 * 1024)
# Bigger FFN row tiles on 128 MiB chips (v5e/v6e), smaller on v7x.
ROW_TILE_TARGET = 512 if _VMEM_CAP >= 96 * 1024 * 1024 else 256


# ----------------------------------------------------------------------------
# In-kernel helpers
# ----------------------------------------------------------------------------
def _gelu_exact(x):
    # F.gelu default (erf-based, exact) to match PyTorch semantics.
    # TODO(synk): jax.nn.gelu(approximate=True) would route the transcendental
    # to the EUP slot (helps most on v5e) if the accuracy budget allows.
    return 0.5 * x * (1.0 + jax.lax.erf(x * (1.0 / math.sqrt(2.0))))


def _layernorm(x, gamma, beta, eps=1e-5):
    # var = E[x^2] - mu^2: one fewer full-tile VPU pass than E[(x-mu)^2].
    mu = jnp.mean(x, axis=-1, keepdims=True)
    var = jnp.mean(x * x, axis=-1, keepdims=True) - mu * mu
    return (x - mu) * jax.lax.rsqrt(var + eps) * gamma + beta


def _softmax_lastdim(s):
    s = s - jnp.max(s, axis=-1, keepdims=True)
    p = jnp.exp(s)
    denom = jnp.sum(p, axis=-1, keepdims=True)
    if USE_APPROX_RECIPROCAL:
        return p * pl.reciprocal(denom, approx=True)
    return p / denom


# ----------------------------------------------------------------------------
# Pallas kernels
# ----------------------------------------------------------------------------
def _attention_body(x_ref, amask_ref, tmask_ref,
                    wq_ref, bq_ref, wk_ref, bk_ref, wv_ref, bv_ref,
                    wo_ref, bo_ref,
                    so_w_ref, so_b_ref, so_g_ref, so_bt_ref,
                    o_ref):
    """One batch element: head-batched MHA + out-proj + SelfOutput (+ token mask)."""
    x = x_ref[0]                                   # (L, E) f32: residual / LN in f32
    num_heads = wq_ref.shape[0]

    # Heads on a leading (sublane-friendly) axis: one batched dot_general per
    # projection; no lane-axis slicing, no concat of per-head results.
    xb = jnp.broadcast_to(x.astype(jnp.bfloat16)[None], (num_heads,) + x.shape)

    q = jnp.einsum("hle,hed->hld", xb, wq_ref[...],
                   preferred_element_type=jnp.float32) + bq_ref[...]
    k = jnp.einsum("hle,hed->hld", xb, wk_ref[...],
                   preferred_element_type=jnp.float32) + bk_ref[...]
    v = jnp.einsum("hle,hed->hld", xb, wv_ref[...],
                   preferred_element_type=jnp.float32) + bv_ref[...]

    # Scores (1/sqrt(head_dim) already folded into the Q weight/bias).
    s = jnp.einsum("hqd,hkd->hqk", q.astype(jnp.bfloat16), k.astype(jnp.bfloat16),
                   preferred_element_type=jnp.float32)          # (H, L, L)
    s = s + amask_ref[...]                                      # (1, 1, L) additive
    p = _softmax_lastdim(s)

    ctx = jnp.einsum("hqk,hkd->hqd", p.astype(jnp.bfloat16), v.astype(jnp.bfloat16),
                     preferred_element_type=jnp.float32)        # (H, L, D)

    # Head merge on the MXU: batched per-head out-projection + cheap leading-axis
    # (VPU) reduction over heads.
    attn = jnp.einsum("hld,hde->hle", ctx.astype(jnp.bfloat16), wo_ref[...],
                      preferred_element_type=jnp.float32)
    attn = jnp.sum(attn, axis=0) + bo_ref[...]                  # (L, E)

    # SelfOutput: dense + residual + LayerNorm (dropout = identity in eval).
    y = (jnp.dot(attn.astype(jnp.bfloat16), so_w_ref[...],
                 preferred_element_type=jnp.float32)
         + so_b_ref[...] + x)
    y = _layernorm(y, so_g_ref[...], so_bt_ref[...])

    if tmask_ref is not None:                                   # ent path only
        y = y * tmask_ref[0]                                    # (L, 1) token mask
    o_ref[0] = y.astype(o_ref.dtype)


def attention_kernel_plain(x_ref, amask_ref, *rest):
    _attention_body(x_ref, amask_ref, None, *rest)


def attention_kernel_token_masked(x_ref, amask_ref, tmask_ref, *rest):
    _attention_body(x_ref, amask_ref, tmask_ref, *rest)


def fused_ffn_kernel(w_ref, e_ref, ww_ref, we_ref, b_ref,
                     fww_ref, fwb_ref, fwg_ref, fwbt_ref,
                     few_ref, feb_ref, feg_ref, febt_ref,
                     ow_ref, oe_ref):
    """Per row-tile: gelu(word@Ww + ent@We + b) + both final SelfOutputs.

    Two MXU dots accumulate into the same f32 result — no in-kernel concat /
    VMEM repack.  The (tm, I) hidden activation never leaves VMEM."""
    wa = w_ref[...]                                # (tm, H) bf16
    ea = e_ref[...]                                # (tm, E) bf16
    hidden = (jnp.dot(wa, ww_ref[...], preferred_element_type=jnp.float32)
              + jnp.dot(ea, we_ref[...], preferred_element_type=jnp.float32)
              + b_ref[...])
    hidden = _gelu_exact(hidden)                   # (tm, I) f32
    h16 = hidden.astype(jnp.bfloat16)

    yw = (jnp.dot(h16, fww_ref[...], preferred_element_type=jnp.float32)
          + fwb_ref[...] + wa.astype(jnp.float32))
    ow_ref[...] = _layernorm(yw, fwg_ref[...], fwbt_ref[...]).astype(ow_ref.dtype)

    ye = (jnp.dot(h16, few_ref[...], preferred_element_type=jnp.float32)
          + feb_ref[...] + ea.astype(jnp.float32))
    oe_ref[...] = _layernorm(ye, feg_ref[...], febt_ref[...]).astype(oe_ref.dtype)


# ----------------------------------------------------------------------------
# Wrappers (grids / BlockSpecs)
# ----------------------------------------------------------------------------
def _compiler_params(dims):
    return pltpu.CompilerParams(dimension_semantics=dims,
                                vmem_limit_bytes=VMEM_LIMIT_BYTES)


def _full_spec(shape):
    # Grid-invariant (weight / bias) block: full array, constant block index.
    # TODO(synk): pipeline_mode=pl.Buffered(1) here would drop the default
    # double-buffering of these constant blocks (~2x weight VMEM, matters on v7x).
    return pl.BlockSpec(shape, lambda *_: (0,) * len(shape))


def _round_up(n, m):
    return ((n + m - 1) // m) * m


def attention_block(x, att_params, so_params, num_heads, add_mask, token_mask=None):
    """Fused MHA self-attention + SelfOutput for one stream.

    x: (B, L, E) f32; add_mask: (B, 1, L) additive mask; token_mask: optional
    (B, L, 1) multiplicative mask (ent path only).
    Returns (B, L, E) bf16 (inter-kernel activation kept bf16 to halve HBM traffic)."""
    B, L, E = x.shape
    D = E // num_heads
    scale = 1.0 / math.sqrt(D)

    in_w = att_params["in_w"]                 # (E, 3E), columns = [q | k | v]
    in_b = att_params["in_b"]                 # (3E,)

    def head_w(w):                            # (E, E) -> (H, E, D)
        return w.reshape(E, num_heads, D).transpose(1, 0, 2)

    def head_b(b):                            # (E,) -> (H, 1, D)
        return b.reshape(num_heads, 1, D)

    # Fold 1/sqrt(head_dim) into the Q projection; bf16 weights for the MXU.
    wq = head_w(in_w[:, :E] * scale).astype(jnp.bfloat16)
    wk = head_w(in_w[:, E:2 * E]).astype(jnp.bfloat16)
    wv = head_w(in_w[:, 2 * E:]).astype(jnp.bfloat16)
    bq = head_b(in_b[:E] * scale)
    bk = head_b(in_b[E:2 * E])
    bv = head_b(in_b[2 * E:])
    wo = att_params["out_w"].reshape(num_heads, D, E).astype(jnp.bfloat16)
    bo = att_params["out_b"].reshape(1, E)
    so_w = so_params["w"].astype(jnp.bfloat16)

    def batch_spec(shape):
        return pl.BlockSpec(shape, lambda b: (b, 0, 0))

    in_specs = [batch_spec((1, L, E)), batch_spec((1, 1, L))]
    inputs = [x, add_mask]
    if token_mask is not None:
        in_specs.append(batch_spec((1, L, 1)))
        inputs.append(token_mask)
        kernel = attention_kernel_token_masked
    else:
        kernel = attention_kernel_plain

    in_specs += [
        _full_spec((num_heads, E, D)), _full_spec((num_heads, 1, D)),   # Wq, bq
        _full_spec((num_heads, E, D)), _full_spec((num_heads, 1, D)),   # Wk, bk
        _full_spec((num_heads, E, D)), _full_spec((num_heads, 1, D)),   # Wv, bv
        _full_spec((num_heads, D, E)), _full_spec((1, E)),              # Wo, bo
        _full_spec((E, E)), _full_spec((1, E)),                         # SelfOutput dense
        _full_spec((1, E)), _full_spec((1, E)),                         # LayerNorm gamma/beta
    ]
    inputs += [wq, bq, wk, bk, wv, bv, wo, bo,
               so_w, so_params["b"].reshape(1, E),
               so_params["gamma"].reshape(1, E), so_params["beta"].reshape(1, E)]

    # TODO(synk): for large B, block several batch elements per grid step to
    # amortize the ~600-cycle per-step overhead (keep >= 2 steps for megacore).
    return pl.pallas_call(
        kernel,
        out_shape=jax.ShapeDtypeStruct((B, L, E), jnp.bfloat16),
        grid=(B,),
        in_specs=in_specs,
        out_specs=batch_spec((1, L, E)),
        compiler_params=_compiler_params(("parallel",)),
    )(*inputs)


def _pick_row_tile(m, h, e, inter):
    """Sublane-aligned FFN row tile sized to the chip's VMEM budget."""
    mult = 8
    # Rough resident bytes per row: double-buffered bf16 inputs, double-buffered
    # f32 outputs, plus the live f32 (tm, inter) hidden activation.
    per_row = 2 * 2 * (h + e) + 2 * 4 * (h + e) + 4 * inter
    weight_bytes = 2 * 2 * ((h + e) * inter + inter * (h + e))  # double-buffered bf16
    budget = VMEM_LIMIT_BYTES - weight_bytes - (4 << 20)
    target = ROW_TILE_TARGET
    if budget > 0:
        target = min(target, max(mult, (budget // per_row) // mult * mult))
    return min(target, _round_up(m, mult))


def ffn_block(word_attn, ent_attn, inter_word, inter_ent, final_word, final_ent):
    """Fused FFN half of an adaption layer, gridded over B*L row tiles."""
    B, L, H = word_attn.shape
    E = ent_attn.shape[-1]
    inter_dim = inter_word["w"].shape[1]
    M = B * L
    tm = _pick_row_tile(M, H, E, inter_dim)
    Mp = _round_up(M, tm)                     # pad rows: no tm = M fallback

    wa = word_attn.reshape(M, H)
    ea = ent_attn.reshape(M, E)
    if Mp != M:
        wa = jnp.pad(wa, ((0, Mp - M), (0, 0)))
        ea = jnp.pad(ea, ((0, Mp - M), (0, 0)))

    bsum = (inter_word["b"] + inter_ent["b"]).reshape(1, inter_dim)

    # TODO(synk): outputs are lane-dense whenever H/E are multiples of 128 (the
    # realistic config); folding rows into lanes for narrower widths needs a
    # Mosaic lane-repacking reshape inside the kernel and is left out here.
    out_w, out_e = pl.pallas_call(
        fused_ffn_kernel,
        out_shape=(jax.ShapeDtypeStruct((Mp, H), jnp.float32),
                   jax.ShapeDtypeStruct((Mp, E), jnp.float32)),
        grid=(Mp // tm,),
        in_specs=[
            pl.BlockSpec((tm, H), lambda i: (i, 0)),              # word rows (bf16)
            pl.BlockSpec((tm, E), lambda i: (i, 0)),              # ent rows (bf16)
            _full_spec((H, inter_dim)), _full_spec((E, inter_dim)),
            _full_spec((1, inter_dim)),                           # summed biases
            _full_spec((inter_dim, H)), _full_spec((1, H)),       # final_word dense
            _full_spec((1, H)), _full_spec((1, H)),               # final_word LN
            _full_spec((inter_dim, E)), _full_spec((1, E)),       # final_ent dense
            _full_spec((1, E)), _full_spec((1, E)),               # final_ent LN
        ],
        out_specs=(pl.BlockSpec((tm, H), lambda i: (i, 0)),
                   pl.BlockSpec((tm, E), lambda i: (i, 0))),
        compiler_params=_compiler_params(("parallel",)),
    )(wa, ea,
      inter_word["w"].astype(jnp.bfloat16), inter_ent["w"].astype(jnp.bfloat16), bsum,
      final_word["w"].astype(jnp.bfloat16), final_word["b"].reshape(1, H),
      final_word["gamma"].reshape(1, H), final_word["beta"].reshape(1, H),
      final_ent["w"].astype(jnp.bfloat16), final_ent["b"].reshape(1, E),
      final_ent["gamma"].reshape(1, E), final_ent["beta"].reshape(1, E))
    return out_w[:M].reshape(B, L, H), out_e[:M].reshape(B, L, E)


# ----------------------------------------------------------------------------
# Module forward passes
# ----------------------------------------------------------------------------
def _additive_mask(attention_mask):
    # Equivalent of `~mask * -10000.0` (valid token -> 0, pad -> -10000).
    # Fully-masked rows yield a uniform softmax (PyTorch additive-mask semantics).
    return jnp.where(attention_mask, 0.0, -10000.0).astype(jnp.float32)[:, None, :]


def adaption_layer_forward(params, doc, ent, attn_mask, attn_mask_ent, num_heads):
    add_mask_word = _additive_mask(attn_mask)                     # (B, 1, L)
    add_mask_ent = _additive_mask(attn_mask_ent)                  # (B, 1, L)
    ent_tok_mask = attn_mask_ent.astype(jnp.float32)[..., None]   # (B, L, 1)

    # Word path: no token-mask input / multiply at all.
    word_attn = attention_block(doc, params["word_att"], params["word_self_out"],
                                num_heads, add_mask_word)
    # Ent path: SelfOutput then multiply by attention_mask_ent (fused in-kernel).
    ent_attn = attention_block(ent, params["ent_att"], params["ent_self_out"],
                               num_heads, add_mask_ent, token_mask=ent_tok_mask)

    # TODO(synk): fusing attention+FFN into one pallas_call per layer would
    # remove the (B,L,H)+(B,L,E) HBM round trip entirely; the bf16 intermediate
    # activations already halve it.
    return ffn_block(word_attn, ent_attn,
                     params["inter_word"], params["inter_ent"],
                     params["final_word"], params["final_ent"])


def aggregation_forward(params, doc, ent, attn_mask, attn_mask_ent, num_heads):
    for layer_params in params["layers"]:
        doc, ent = adaption_layer_forward(
            layer_params, doc, ent, attn_mask, attn_mask_ent, num_heads)
    return doc
    # Note: predict_dense / LayerNorm / CrossEntropyLoss of Aggregation are only
    # used by get_kg_loss, not by forward(), so they are not exercised here.


# ----------------------------------------------------------------------------
# Deterministic parameter initialization (weights stored pre-transposed (in,out))
# ----------------------------------------------------------------------------
def init_linear_params(key, in_dim, out_dim):
    kw, kb = jax.random.split(key)
    return {
        "w": jax.random.normal(kw, (in_dim, out_dim), jnp.float32) * 0.02,
        "b": jax.random.normal(kb, (out_dim,), jnp.float32) * 0.02,
    }


def init_self_output_params(key, in_dim, out_dim):
    p = init_linear_params(key, in_dim, out_dim)
    p["gamma"] = jnp.ones((out_dim,), jnp.float32)   # nn.LayerNorm default
    p["beta"] = jnp.zeros((out_dim,), jnp.float32)
    return p


def init_mha_params(key, embed_dim):
    k1, k2, k3, k4 = jax.random.split(key, 4)
    return {
        "in_w": jax.random.normal(k1, (embed_dim, 3 * embed_dim), jnp.float32) * 0.02,
        "in_b": jax.random.normal(k2, (3 * embed_dim,), jnp.float32) * 0.02,
        "out_w": jax.random.normal(k3, (embed_dim, embed_dim), jnp.float32) * 0.02,
        "out_b": jax.random.normal(k4, (embed_dim,), jnp.float32) * 0.02,
    }


def init_adaption_layer(key, hidden_dim, ent_hidden_dim, kg_intermediate_dim):
    keys = jax.random.split(key, 8)
    return {
        "word_att": init_mha_params(keys[0], hidden_dim),
        "word_self_out": init_self_output_params(keys[1], hidden_dim, hidden_dim),
        "ent_att": init_mha_params(keys[2], ent_hidden_dim),
        "ent_self_out": init_self_output_params(keys[3], ent_hidden_dim, ent_hidden_dim),
        "inter_word": init_linear_params(keys[4], hidden_dim, kg_intermediate_dim),
        "inter_ent": init_linear_params(keys[5], ent_hidden_dim, kg_intermediate_dim),
        "final_word": init_self_output_params(keys[6], kg_intermediate_dim, hidden_dim),
        "final_ent": init_self_output_params(keys[7], kg_intermediate_dim, ent_hidden_dim),
    }


def init_aggregation(key, num_layers, hidden_dim, ent_hidden_dim, kg_intermediate_dim):
    keys = jax.random.split(key, num_layers)
    return {
        "layers": [
            init_adaption_layer(k, hidden_dim, ent_hidden_dim, kg_intermediate_dim)
            for k in keys
        ]
    }


# ----------------------------------------------------------------------------
if __name__ == "__main__":
    B, L = 2, 8
    hidden_dim = 32
    ent_hidden_dim = 16
    kg_intermediate_dim = 64
    kg_num_attention_heads = 4
    kg_num_hidden_layers = 2

    key = jax.random.PRNGKey(0)
    k_params, k_doc, k_ent = jax.random.split(key, 3)

    params = init_aggregation(
        k_params, kg_num_hidden_layers, hidden_dim, ent_hidden_dim, kg_intermediate_dim
    )

    doc_hidden_states = jax.random.normal(k_doc, (B, L, hidden_dim), jnp.float32)
    ent_hidden_states = jax.random.normal(k_ent, (B, L, ent_hidden_dim), jnp.float32)

    # boolean masks (True = valid token), per-batch lengths
    attention_mask = jnp.arange(L)[None, :] < jnp.array([8, 5])[:, None]
    attention_mask_ent = jnp.arange(L)[None, :] < jnp.array([3, 6])[:, None]

    @functools.partial(jax.jit, static_argnames=("num_heads",))
    def run(params, doc, ent, m_word, m_ent, num_heads):
        return aggregation_forward(params, doc, ent, m_word, m_ent, num_heads)

    out = run(params, doc_hidden_states, ent_hidden_states,
              attention_mask, attention_mask_ent, kg_num_attention_heads)
    out = jax.block_until_ready(out)
    assert out.shape == (B, L, hidden_dim)
    assert jnp.all(jnp.isfinite(out))
    print("KERNEL_OK")
</pallas_src>

<mosaic_0001>
module attributes {stable_mosaic.version = 11 : i64} {
  func.func @attention_kernel_token_masked(%arg0: i32, %arg1: memref<1x8x16xf32, #tpu.memory_space<vmem>>, %arg2: memref<1x1x8xf32, #tpu.memory_space<vmem>>, %arg3: memref<1x8x1xf32, #tpu.memory_space<vmem>>, %arg4: memref<4x16x4xbf16, #tpu.memory_space<vmem>>, %arg5: memref<4x1x4xf32, #tpu.memory_space<vmem>>, %arg6: memref<4x16x4xbf16, #tpu.memory_space<vmem>>, %arg7: memref<4x1x4xf32, #tpu.memory_space<vmem>>, %arg8: memref<4x16x4xbf16, #tpu.memory_space<vmem>>, %arg9: memref<4x1x4xf32, #tpu.memory_space<vmem>>, %arg10: memref<4x4x16xbf16, #tpu.memory_space<vmem>>, %arg11: memref<1x16xf32, #tpu.memory_space<vmem>>, %arg12: memref<16x16xbf16, #tpu.memory_space<vmem>>, %arg13: memref<1x16xf32, #tpu.memory_space<vmem>>, %arg14: memref<1x16xf32, #tpu.memory_space<vmem>>, %arg15: memref<1x16xf32, #tpu.memory_space<vmem>>, %arg16: memref<1x8x16xbf16, #tpu.memory_space<vmem>>) attributes {dimension_semantics = [#tpu.dimension_semantics<parallel>], iteration_bounds = array<i64: 2>, scalar_prefetch = 0 : i64, scratch_operands = 0 : i64, tpu.core_type = #tpu.core_type<tc>, window_params = [{transform_indices = @transform_0, window_bounds = array<i64: 1, 8, 16>}, {transform_indices = @transform_1, window_bounds = array<i64: 1, 1, 8>}, {transform_indices = @transform_2, window_bounds = array<i64: 1, 8, 1>}, {pipeline_mode = #tpu.pipeline_mode<synchronous>, transform_indices = @transform_3, window_bounds = array<i64: 4, 16, 4>}, {pipeline_mode = #tpu.pipeline_mode<synchronous>, transform_indices = @transform_4, window_bounds = array<i64: 4, 1, 4>}, {pipeline_mode = #tpu.pipeline_mode<synchronous>, transform_indices = @transform_5, window_bounds = array<i64: 4, 16, 4>}, {pipeline_mode = #tpu.pipeline_mode<synchronous>, transform_indices = @transform_6, window_bounds = array<i64: 4, 1, 4>}, {pipeline_mode = #tpu.pipeline_mode<synchronous>, transform_indices = @transform_7, window_bounds = array<i64: 4, 16, 4>}, {pipeline_mode = #tpu.pipeline_mode<synchronous>, transform_indices = @transform_8, window_bounds = array<i64: 4, 1, 4>}, {pipeline_mode = #tpu.pipeline_mode<synchronous>, transform_indices = @transform_9, window_bounds = array<i64: 4, 4, 16>}, {pipeline_mode = #tpu.pipeline_mode<synchronous>, transform_indices = @transform_10, window_bounds = array<i64: 1, 16>}, {pipeline_mode = #tpu.pipeline_mode<synchronous>, transform_indices = @transform_11, window_bounds = array<i64: 16, 16>}, {pipeline_mode = #tpu.pipeline_mode<synchronous>, transform_indices = @transform_12, window_bounds = array<i64: 1, 16>}, {pipeline_mode = #tpu.pipeline_mode<synchronous>, transform_indices = @transform_13, window_bounds = array<i64: 1, 16>}, {pipeline_mode = #tpu.pipeline_mode<synchronous>, transform_indices = @transform_14, window_bounds = array<i64: 1, 16>}, {transform_indices = @transform_15, window_bounds = array<i64: 1, 8, 16>}]} {
    %c0 = arith.constant 0 : index
    %c0_0 = arith.constant 0 : index
    %c0_1 = arith.constant 0 : index
    %0 = vector.load %arg1[%c0, %c0_0, %c0_1] : memref<1x8x16xf32, #tpu.memory_space<vmem>>, vector<1x8x16xf32>
    %1 = vector.shape_cast %0 : vector<1x8x16xf32> to vector<8x16xf32>
    %2 = arith.truncf %1 : vector<8x16xf32> to vector<8x16xbf16>
    %3 = vector.shape_cast %2 : vector<8x16xbf16> to vector<1x8x16xbf16>
    %4 = vector.shape_cast %3 : vector<1x8x16xbf16> to vector<1x8x16xbf16>
    %5 = vector.broadcast %4 : vector<1x8x16xbf16> to vector<4x8x16xbf16>
    %c0_2 = arith.constant 0 : index
    %c0_3 = arith.constant 0 : index
    %c0_4 = arith.constant 0 : index
    %6 = vector.load %arg4[%c0_2, %c0_3, %c0_4] : memref<4x16x4xbf16, #tpu.memory_space<vmem>>, vector<4x16x4xbf16>
    "tpu.trace_start"() <{level = 10 : i32, message = "hle,hed->hld"}> : () -> ()
    %cst = arith.constant dense<0.000000e+00> : vector<4x8x4xf32>
    %7 = tpu.matmul %5, %6, %cst {dimension_numbers = #tpu.dot_dimension_numbers<[2], [1], [1], [2], [0, 0, 0, 1, 1, 2], [0], [0]>} : vector<4x8x16xbf16>, vector<4x16x4xbf16>, vector<4x8x4xf32> -> vector<4x8x4xf32>
    "tpu.trace_stop"() : () -> ()
    %c0_5 = arith.constant 0 : index
    %c0_6 = arith.constant 0 : index
    %c0_7 = arith.constant 0 : index
    %8 = vector.load %arg5[%c0_5, %c0_6, %c0_7] : memref<4x1x4xf32, #tpu.memory_space<vmem>>, vector<4x1x4xf32>
    %9 = vector.broadcast %8 : vector<4x1x4xf32> to vector<4x8x4xf32>
    %10 = arith.addf %7, %9 : vector<4x8x4xf32>
    %c0_8 = arith.constant 0 : index
    %c0_9 = arith.constant 0 : index
    %c0_10 = arith.constant 0 : index
    %11 = vector.load %arg6[%c0_8, %c0_9, %c0_10] : memref<4x16x4xbf16, #tpu.memory_space<vmem>>, vector<4x16x4xbf16>
    "tpu.trace_start"() <{level = 10 : i32, message = "hle,hed->hld"}> : () -> ()
    %cst_11 = arith.constant dense<0.000000e+00> : vector<4x8x4xf32>
    %12 = tpu.matmul %5, %11, %cst_11 {dimension_numbers = #tpu.dot_dimension_numbers<[2], [1], [1], [2], [0, 0, 0, 1, 1, 2], [0], [0]>} : vector<4x8x16xbf16>, vector<4x16x4xbf16>, vector<4x8x4xf32> -> vector<4x8x4xf32>
    "tpu.trace_stop"() : () -> ()
    %c0_12 = arith.constant 0 : index
    %c0_13 = arith.constant 0 : index
    %c0_14 = arith.constant 0 : index
    %13 = vector.load %arg7[%c0_12, %c0_13, %c0_14] : memref<4x1x4xf32, #tpu.memory_space<vmem>>, vector<4x1x4xf32>
    %14 = vector.broadcast %13 : vector<4x1x4xf32> to vector<4x8x4xf32>
    %15 = arith.addf %12, %14 : vector<4x8x4xf32>
    %c0_15 = arith.constant 0 : index
    %c0_16 = arith.constant 0 : index
    %c0_17 = arith.constant 0 : index
    %16 = vector.load %arg8[%c0_15, %c0_16, %c0_17] : memref<4x16x4xbf16, #tpu.memory_space<vmem>>, vector<4x16x4xbf16>
    "tpu.trace_start"() <{level = 10 : i32, message = "hle,hed->hld"}> : () -> ()
    %cst_18 = arith.constant dense<0.000000e+00> : vector<4x8x4xf32>
    %17 = tpu.matmul %5, %16, %cst_18 {dimension_numbers = #tpu.dot_dimension_numbers<[2], [1], [1], [2], [0, 0, 0, 1, 1, 2], [0], [0]>} : vector<4x8x16xbf16>, vector<4x16x4xbf16>, vector<4x8x4xf32> -> vector<4x8x4xf32>
    "tpu.trace_stop"() : () -> ()
    %c0_19 = arith.constant 0 : index
    %c0_20 = arith.constant 0 : index
    %c0_21 = arith.constant 0 : index
    %18 = vector.load %arg9[%c0_19, %c0_20, %c0_21] : memref<4x1x4xf32, #tpu.memory_space<vmem>>, vector<4x1x4xf32>
    %19 = vector.broadcast %18 : vector<4x1x4xf32> to vector<4x8x4xf32>
    %20 = arith.addf %17, %19 : vector<4x8x4xf32>
    %21 = arith.truncf %10 : vector<4x8x4xf32> to vector<4x8x4xbf16>
    %22 = arith.truncf %15 : vector<4x8x4xf32> to vector<4x8x4xbf16>
    "tpu.trace_start"() <{level = 10 : i32, message = "hqd,hkd->hqk"}> : () -> ()
    %cst_22 = arith.constant dense<0.000000e+00> : vector<4x8x8xf32>
    %23 = tpu.matmul %21, %22, %cst_22 {dimension_numbers = #tpu.dot_dimension_numbers<[2], [2], [1], [1], [0, 0, 0, 1, 1, 1], [0], [0]>} : vector<4x8x4xbf16>, vector<4x8x4xbf16>, vector<4x8x8xf32> -> vector<4x8x8xf32>
    "tpu.trace_stop"() : () -> ()
    %c0_23 = arith.constant 0 : index
    %c0_24 = arith.constant 0 : index
    %c0_25 = arith.constant 0 : index
    %24 = vector.load %arg2[%c0_23, %c0_24, %c0_25] : memref<1x1x8xf32, #tpu.memory_space<vmem>>, vector<1x1x8xf32>
    %25 = vector.broadcast %24 : vector<1x1x8xf32> to vector<4x8x8xf32>
    %26 = arith.addf %23, %25 : vector<4x8x8xf32>
    %cst_26 = arith.constant dense<0xFF800000> : vector<4x8xf32>
    %27 = vector.multi_reduction <maximumf>, %26, %cst_26 [2] : vector<4x8x8xf32> to vector<4x8xf32>
    %28 = vector.shape_cast %27 : vector<4x8xf32> to vector<4x8x1xf32>
    %29 = vector.broadcast %28 : vector<4x8x1xf32> to vector<4x8x8xf32>
    %30 = arith.subf %26, %29 : vector<4x8x8xf32>
    %31 = math.exp %30 : vector<4x8x8xf32>
    %cst_27 = arith.constant dense<0.000000e+00> : vector<4x8xf32>
    %32 = vector.multi_reduction <add>, %31, %cst_27 [2] : vector<4x8x8xf32> to vector<4x8xf32>
    %33 = vector.shape_cast %32 : vector<4x8xf32> to vector<4x8x1xf32>
    %34 = tpu.reciprocal %33 {approx = true} : vector<4x8x1xf32> -> vector<4x8x1xf32>
    %35 = vector.broadcast %34 : vector<4x8x1xf32> to vector<4x8x8xf32>
    %36 = arith.mulf %31, %35 : vector<4x8x8xf32>
    %37 = arith.truncf %36 : vector<4x8x8xf32> to vector<4x8x8xbf16>
    %38 = arith.truncf %20 : vector<4x8x4xf32> to vector<4x8x4xbf16>
    "tpu.trace_start"() <{level = 10 : i32, message = "hqk,hkd->hqd"}> : () -> ()
    %cst_28 = arith.constant dense<0.000000e+00> : vector<4x8x4xf32>
    %39 = tpu.matmul %37, %38, %cst_28 {dimension_numbers = #tpu.dot_dimension_numbers<[2], [1], [1], [2], [0, 0, 0, 1, 1, 2], [0], [0]>} : vector<4x8x8xbf16>, vector<4x8x4xbf16>, vector<4x8x4xf32> -> vector<4x8x4xf32>
    "tpu.trace_stop"() : () -> ()
    %40 = arith.truncf %39 : vector<4x8x4xf32> to vector<4x8x4xbf16>
    %c0_29 = arith.constant 0 : index
    %c0_30 = arith.constant 0 : index
    %c0_31 = arith.constant 0 : index
    %41 = vector.load %arg10[%c0_29, %c0_30, %c0_31] : memref<4x4x16xbf16, #tpu.memory_space<vmem>>, vector<4x4x16xbf16>
    "tpu.trace_start"() <{level = 10 : i32, message = "hld,hde->hle"}> : () -> ()
    %cst_32 = arith.constant dense<0.000000e+00> : vector<4x8x16xf32>
    %42 = tpu.matmul %40, %41, %cst_32 {dimension_numbers = #tpu.dot_dimension_numbers<[2], [1], [1], [2], [0, 0, 0, 1, 1, 2], [0], [0]>} : vector<4x8x4xbf16>, vector<4x4x16xbf16>, vector<4x8x16xf32> -> vector<4x8x16xf32>
    "tpu.trace_stop"() : () -> ()
    %cst_33 = arith.constant dense<0.000000e+00> : vector<8x16xf32>
    %43 = vector.multi_reduction <add>, %42, %cst_33 [0] : vector<4x8x16xf32> to vector<8x16xf32>
    %c0_34 = arith.constant 0 : index
    %c0_35 = arith.constant 0 : index
    %44 = vector.load %arg11[%c0_34, %c0_35] : memref<1x16xf32, #tpu.memory_space<vmem>>, vector<1x16xf32>
    %45 = vector.broadcast %44 : vector<1x16xf32> to vector<8x16xf32>
    %46 = arith.addf %43, %45 : vector<8x16xf32>
    %47 = arith.truncf %46 : vector<8x16xf32> to vector<8x16xbf16>
    %c0_36 = arith.constant 0 : index
    %c0_37 = arith.constant 0 : index
    %48 = vector.load %arg12[%c0_36, %c0_37] : memref<16x16xbf16, #tpu.memory_space<vmem>>, vector<16x16xbf16>
    %cst_38 = arith.constant dense<0.000000e+00> : vector<8x16xf32>
    %49 = tpu.matmul %47, %48, %cst_38 {dimension_numbers = #tpu.dot_dimension_numbers<[1], [0], [0], [1], [0, 0, 1, 1], [], []>} : vector<8x16xbf16>, vector<16x16xbf16>, vector<8x16xf32> -> vector<8x16xf32>
    %c0_39 = arith.constant 0 : index
    %c0_40 = arith.constant 0 : index
    %50 = vector.load %arg13[%c0_39, %c0_40] : memref<1x16xf32, #tpu.memory_space<vmem>>, vector<1x16xf32>
    %51 = vector.broadcast %50 : vector<1x16xf32> to vector<8x16xf32>
    %52 = arith.addf %49, %51 : vector<8x16xf32>
    %53 = arith.addf %52, %1 : vector<8x16xf32>
    %c0_41 = arith.constant 0 : index
    %c0_42 = arith.constant 0 : index
    %54 = vector.load %arg14[%c0_41, %c0_42] : memref<1x16xf32, #tpu.memory_space<vmem>>, vector<1x16xf32>
    %c0_43 = arith.constant 0 : index
    %c0_44 = arith.constant 0 : index
    %55 = vector.load %arg15[%c0_43, %c0_44] : memref<1x16xf32, #tpu.memory_space<vmem>>, vector<1x16xf32>
    %cst_45 = arith.constant dense<0.000000e+00> : vector<8xf32>
    %56 = vector.multi_reduction <add>, %53, %cst_45 [1] : vector<8x16xf32> to vector<8xf32>
    %57 = vector.shape_cast %56 : vector<8xf32> to vector<8x1xf32>
    %cst_46 = arith.constant 1.600000e+01 : f32
    %58 = vector.broadcast %cst_46 : f32 to vector<8x1xf32>
    %59 = arith.divf %57, %58 : vector<8x1xf32>
    %60 = arith.mulf %53, %53 : vector<8x16xf32>
    %cst_47 = arith.constant dense<0.000000e+00> : vector<8xf32>
    %61 = vector.multi_reduction <add>, %60, %cst_47 [1] : vector<8x16xf32> to vector<8xf32>
    %62 = vector.shape_cast %61 : vector<8xf32> to vector<8x1xf32>
    %cst_48 = arith.constant 1.600000e+01 : f32
    %63 = vector.broadcast %cst_48 : f32 to vector<8x1xf32>
    %64 = arith.divf %62, %63 : vector<8x1xf32>
    %65 = arith.mulf %59, %59 : vector<8x1xf32>
    %66 = arith.subf %64, %65 : vector<8x1xf32>
    %67 = vector.broadcast %59 : vector<8x1xf32> to vector<8x16xf32>
    %68 = arith.subf %53, %67 : vector<8x16xf32>
    %cst_49 = arith.constant 9.99999974E-6 : f32
    %69 = vector.broadcast %cst_49 : f32 to vector<8x1xf32>
    %70 = arith.addf %66, %69 : vector<8x1xf32>
    %71 = math.rsqrt %70 : vector<8x1xf32>
    %72 = vector.broadcast %71 : vector<8x1xf32> to vector<8x16xf32>
    %73 = arith.mulf %68, %72 : vector<8x16xf32>
    %74 = vector.broadcast %54 : vector<1x16xf32> to vector<8x16xf32>
    %75 = arith.mulf %73, %74 : vector<8x16xf32>
    %76 = vector.broadcast %55 : vector<1x16xf32> to vector<8x16xf32>
    %77 = arith.addf %75, %76 : vector<8x16xf32>
    %c0_50 = arith.constant 0 : index
    %c0_51 = arith.constant 0 : index
    %c0_52 = arith.constant 0 : index
    %78 = vector.load %arg3[%c0_50, %c0_51, %c0_52] : memref<1x8x1xf32, #tpu.memory_space<vmem>>, vector<1x8x1xf32>
    %79 = vector.shape_cast %78 : vector<1x8x1xf32> to vector<8x1xf32>
    %80 = vector.broadcast %79 : vector<8x1xf32> to vector<8x16xf32>
    %81 = arith.mulf %77, %80 : vector<8x16xf32>
    %82 = arith.truncf %81 : vector<8x16xf32> to vector<8x16xbf16>
    %c0_53 = arith.constant 0 : index
    %c0_54 = arith.constant 0 : index
    %c0_55 = arith.constant 0 : index
    %83 = vector.load %arg16[%c0_53, %c0_54, %c0_55] : memref<1x8x16xbf16, #tpu.memory_space<vmem>>, vector<1x8x16xbf16>
    %84 = vector.shape_cast %83 : vector<1x8x16xbf16> to vector<8x16xbf16>
    %85 = vector.shape_cast %82 : vector<8x16xbf16> to vector<1x8x16xbf16>
    tpu.vector_store %arg16[%c0_53, %c0_54, %c0_55], %85 {strides = array<i32>} : memref<1x8x16xbf16, #tpu.memory_space<vmem>>, vector<1x8x16xbf16>,
    return
  }
  func.func @transform_0(%arg0: i32) -> (i32, i32, i32) {
    %c0_i32 = arith.constant 0 : i32
    %c0_i32_0 = arith.constant 0 : i32
    %c0_i32_1 = arith.constant 0 : i32
    return %arg0, %c0_i32, %c0_i32_0 : i32, i32, i32
  }
  func.func @transform_1(%arg0: i32) -> (i32, i32, i32) {
    %c0_i32 = arith.constant 0 : i32
    %c0_i32_0 = arith.constant 0 : i32
    %c0_i32_1 = arith.constant 0 : i32
    return %arg0, %c0_i32, %c0_i32_0 : i32, i32, i32
  }
  func.func @transform_2(%arg0: i32) -> (i32, i32, i32) {
    %c0_i32 = arith.constant 0 : i32
    %c0_i32_0 = arith.constant 0 : i32
    %c0_i32_1 = arith.constant 0 : i32
    return %arg0, %c0_i32, %c0_i32_0 : i32, i32, i32
  }
  func.func @transform_3(%arg0: i32) -> (i32, i32, i32) {
    %c0_i32 = arith.constant 0 : i32
    %c0_i32_0 = arith.constant 0 : i32
    %c0_i32_1 = arith.constant 0 : i32
    %c0_i32_2 = arith.constant 0 : i32
    return %c0_i32, %c0_i32_0, %c0_i32_1 : i32, i32, i32
  }
  func.func @transform_4(%arg0: i32) -> (i32, i32, i32) {
    %c0_i32 = arith.constant 0 : i32
    %c0_i32_0 = arith.constant 0 : i32
    %c0_i32_1 = arith.constant 0 : i32
    %c0_i32_2 = arith.constant 0 : i32
    return %c0_i32, %c0_i32_0, %c0_i32_1 : i32, i32, i32
  }
  func.func @transform_5(%arg0: i32) -> (i32, i32, i32) {
    %c0_i32 = arith.constant 0 : i32
    %c0_i32_0 = arith.constant 0 : i32
    %c0_i32_1 = arith.constant 0 : i32
    %c0_i32_2 = arith.constant 0 : i32
    return %c0_i32, %c0_i32_0, %c0_i32_1 : i32, i32, i32
  }
  func.func @transform_6(%arg0: i32) -> (i32, i32, i32) {
    %c0_i32 = arith.constant 0 : i32
    %c0_i32_0 = arith.constant 0 : i32
    %c0_i32_1 = arith.constant 0 : i32
    %c0_i32_2 = arith.constant 0 : i32
    return %c0_i32, %c0_i32_0, %c0_i32_1 : i32, i32, i32
  }
  func.func @transform_7(%arg0: i32) -> (i32, i32, i32) {
    %c0_i32 = arith.constant 0 : i32
    %c0_i32_0 = arith.constant 0 : i32
    %c0_i32_1 = arith.constant 0 : i32
    %c0_i32_2 = arith.constant 0 : i32
    return %c0_i32, %c0_i32_0, %c0_i32_1 : i32, i32, i32
  }
  func.func @transform_8(%arg0: i32) -> (i32, i32, i32) {
    %c0_i32 = arith.constant 0 : i32
    %c0_i32_0 = arith.constant 0 : i32
    %c0_i32_1 = arith.constant 0 : i32
    %c0_i32_2 = arith.constant 0 : i32
    return %c0_i32, %c0_i32_0, %c0_i32_1 : i32, i32, i32
  }
  func.func @transform_9(%arg0: i32) -> (i32, i32, i32) {
    %c0_i32 = arith.constant 0 : i32
    %c0_i32_0 = arith.constant 0 : i32
    %c0_i32_1 = arith.constant 0 : i32
    %c0_i32_2 = arith.constant 0 : i32
    return %c0_i32, %c0_i32_0, %c0_i32_1 : i32, i32, i32
  }
  func.func @transform_10(%arg0: i32) -> (i32, i32) {
    %c0_i32 = arith.constant 0 : i32
    %c0_i32_0 = arith.constant 0 : i32
    %c0_i32_1 = arith.constant 0 : i32
    return %c0_i32, %c0_i32_0 : i32, i32
  }
  func.func @transform_11(%arg0: i32) -> (i32, i32) {
    %c0_i32 = arith.constant 0 : i32
    %c0_i32_0 = arith.constant 0 : i32
    %c0_i32_1 = arith.constant 0 : i32
    return %c0_i32, %c0_i32_0 : i32, i32
  }
  func.func @transform_12(%arg0: i32) -> (i32, i32) {
    %c0_i32 = arith.constant 0 : i32
    %c0_i32_0 = arith.constant 0 : i32
    %c0_i32_1 = arith.constant 0 : i32
    return %c0_i32, %c0_i32_0 : i32, i32
  }
  func.func @transform_13(%arg0: i32) -> (i32, i32) {
    %c0_i32 = arith.constant 0 : i32
    %c0_i32_0 = arith.constant 0 : i32
    %c0_i32_1 = arith.constant 0 : i32
    return %c0_i32, %c0_i32_0 : i32, i32
  }
  func.func @transform_14(%arg0: i32) -> (i32, i32) {
    %c0_i32 = arith.constant 0 : i32
    %c0_i32_0 = arith.constant 0 : i32
    %c0_i32_1 = arith.constant 0 : i32
    return %c0_i32, %c0_i32_0 : i32, i32
  }
  func.func @transform_15(%arg0: i32) -> (i32, i32, i32) {
    %c0_i32 = arith.constant 0 : i32
    %c0_i32_0 = arith.constant 0 : i32
    %c0_i32_1 = arith.constant 0 : i32
    return %arg0, %c0_i32, %c0_i32_0 : i32, i32, i32
  }
}

module attributes {stable_mosaic.version = 11 : i64} {
  func.func @attention_kernel_plain(%arg0: i32, %arg1: memref<1x8x32xf32, #tpu.memory_space<vmem>>, %arg2: memref<1x1x8xf32, #tpu.memory_space<vmem>>, %arg3: memref<4x32x8xbf16, #tpu.memory_space<vmem>>, %arg4: memref<4x1x8xf32, #tpu.memory_space<vmem>>, %arg5: memref<4x32x8xbf16, #tpu.memory_space<vmem>>, %arg6: memref<4x1x8xf32, #tpu.memory_space<vmem>>, %arg7: memref<4x32x8xbf16, #tpu.memory_space<vmem>>, %arg8: memref<4x1x8xf32, #tpu.memory_space<vmem>>, %arg9: memref<4x8x32xbf16, #tpu.memory_space<vmem>>, %arg10: memref<1x32xf32, #tpu.memory_space<vmem>>, %arg11: memref<32x32xbf16, #tpu.memory_space<vmem>>, %arg12: memref<1x32xf32, #tpu.memory_space<vmem>>, %arg13: memref<1x32xf32, #tpu.memory_space<vmem>>, %arg14: memref<1x32xf32, #tpu.memory_space<vmem>>, %arg15: memref<1x8x32xbf16, #tpu.memory_space<vmem>>) attributes {dimension_semantics = [#tpu.dimension_semantics<parallel>], iteration_bounds = array<i64: 2>, scalar_prefetch = 0 : i64, scratch_operands = 0 : i64, tpu.core_type = #tpu.core_type<tc>, window_params = [{transform_indices = @transform_0, window_bounds = array<i64: 1, 8, 32>}, {transform_indices = @transform_1, window_bounds = array<i64: 1, 1, 8>}, {pipeline_mode = #tpu.pipeline_mode<synchronous>, transform_indices = @transform_2, window_bounds = array<i64: 4, 32, 8>}, {pipeline_mode = #tpu.pipeline_mode<synchronous>, transform_indices = @transform_3, window_bounds = array<i64: 4, 1, 8>}, {pipeline_mode = #tpu.pipeline_mode<synchronous>, transform_indices = @transform_4, window_bounds = array<i64: 4, 32, 8>}, {pipeline_mode = #tpu.pipeline_mode<synchronous>, transform_indices = @transform_5, window_bounds = array<i64: 4, 1, 8>}, {pipeline_mode = #tpu.pipeline_mode<synchronous>, transform_indices = @transform_6, window_bounds = array<i64: 4, 32, 8>}, {pipeline_mode = #tpu.pipeline_mode<synchronous>, transform_indices = @transform_7, window_bounds = array<i64: 4, 1, 8>}, {pipeline_mode = #tpu.pipeline_mode<synchronous>, transform_indices = @transform_8, window_bounds = array<i64: 4, 8, 32>}, {pipeline_mode = #tpu.pipeline_mode<synchronous>, transform_indices = @transform_9, window_bounds = array<i64: 1, 32>}, {pipeline_mode = #tpu.pipeline_mode<synchronous>, transform_indices = @transform_10, window_bounds = array<i64: 32, 32>}, {pipeline_mode = #tpu.pipeline_mode<synchronous>, transform_indices = @transform_11, window_bounds = array<i64: 1, 32>}, {pipeline_mode = #tpu.pipeline_mode<synchronous>, transform_indices = @transform_12, window_bounds = array<i64: 1, 32>}, {pipeline_mode = #tpu.pipeline_mode<synchronous>, transform_indices = @transform_13, window_bounds = array<i64: 1, 32>}, {transform_indices = @transform_14, window_bounds = array<i64: 1, 8, 32>}]} {
    %c0 = arith.constant 0 : index
    %c0_0 = arith.constant 0 : index
    %c0_1 = arith.constant 0 : index
    %0 = vector.load %arg1[%c0, %c0_0, %c0_1] : memref<1x8x32xf32, #tpu.memory_space<vmem>>, vector<1x8x32xf32>
    %1 = vector.shape_cast %0 : vector<1x8x32xf32> to vector<8x32xf32>
    %2 = arith.truncf %1 : vector<8x32xf32> to vector<8x32xbf16>
    %3 = vector.shape_cast %2 : vector<8x32xbf16> to vector<1x8x32xbf16>
    %4 = vector.shape_cast %3 : vector<1x8x32xbf16> to vector<1x8x32xbf16>
    %5 = vector.broadcast %4 : vector<1x8x32xbf16> to vector<4x8x32xbf16>
    %c0_2 = arith.constant 0 : index
    %c0_3 = arith.constant 0 : index
    %c0_4 = arith.constant 0 : index
    %6 = vector.load %arg3[%c0_2, %c0_3, %c0_4] : memref<4x32x8xbf16, #tpu.memory_space<vmem>>, vector<4x32x8xbf16>
    "tpu.trace_start"() <{level = 10 : i32, message = "hle,hed->hld"}> : () -> ()
    %cst = arith.constant dense<0.000000e+00> : vector<4x8x8xf32>
    %7 = tpu.matmul %5, %6, %cst {dimension_numbers = #tpu.dot_dimension_numbers<[2], [1], [1], [2], [0, 0, 0, 1, 1, 2], [0], [0]>} : vector<4x8x32xbf16>, vector<4x32x8xbf16>, vector<4x8x8xf32> -> vector<4x8x8xf32>
    "tpu.trace_stop"() : () -> ()
    %c0_5 = arith.constant 0 : index
    %c0_6 = arith.constant 0 : index
    %c0_7 = arith.constant 0 : index
    %8 = vector.load %arg4[%c0_5, %c0_6, %c0_7] : memref<4x1x8xf32, #tpu.memory_space<vmem>>, vector<4x1x8xf32>
    %9 = vector.broadcast %8 : vector<4x1x8xf32> to vector<4x8x8xf32>
    %10 = arith.addf %7, %9 : vector<4x8x8xf32>
    %c0_8 = arith.constant 0 : index
    %c0_9 = arith.constant 0 : index
    %c0_10 = arith.constant 0 : index
    %11 = vector.load %arg5[%c0_8, %c0_9, %c0_10] : memref<4x32x8xbf16, #tpu.memory_space<vmem>>, vector<4x32x8xbf16>
    "tpu.trace_start"() <{level = 10 : i32, message = "hle,hed->hld"}> : () -> ()
    %cst_11 = arith.constant dense<0.000000e+00> : vector<4x8x8xf32>
    %12 = tpu.matmul %5, %11, %cst_11 {dimension_numbers = #tpu.dot_dimension_numbers<[2], [1], [1], [2], [0, 0, 0, 1, 1, 2], [0], [0]>} : vector<4x8x32xbf16>, vector<4x32x8xbf16>, vector<4x8x8xf32> -> vector<4x8x8xf32>
    "tpu.trace_stop"() : () -> ()
    %c0_12 = arith.constant 0 : index
    %c0_13 = arith.constant 0 : index
    %c0_14 = arith.constant 0 : index
    %13 = vector.load %arg6[%c0_12, %c0_13, %c0_14] : memref<4x1x8xf32, #tpu.memory_space<vmem>>, vector<4x1x8xf32>
    %14 = vector.broadcast %13 : vector<4x1x8xf32> to vector<4x8x8xf32>
    %15 = arith.addf %12, %14 : vector<4x8x8xf32>
    %c0_15 = arith.constant 0 : index
    %c0_16 = arith.constant 0 : index
    %c0_17 = arith.constant 0 : index
    %16 = vector.load %arg7[%c0_15, %c0_16, %c0_17] : memref<4x32x8xbf16, #tpu.memory_space<vmem>>, vector<4x32x8xbf16>
    "tpu.trace_start"() <{level = 10 : i32, message = "hle,hed->hld"}> : () -> ()
    %cst_18 = arith.constant dense<0.000000e+00> : vector<4x8x8xf32>
    %17 = tpu.matmul %5, %16, %cst_18 {dimension_numbers = #tpu.dot_dimension_numbers<[2], [1], [1], [2], [0, 0, 0, 1, 1, 2], [0], [0]>} : vector<4x8x32xbf16>, vector<4x32x8xbf16>, vector<4x8x8xf32> -> vector<4x8x8xf32>
    "tpu.trace_stop"() : () -> ()
    %c0_19 = arith.constant 0 : index
    %c0_20 = arith.constant 0 : index
    %c0_21 = arith.constant 0 : index
    %18 = vector.load %arg8[%c0_19, %c0_20, %c0_21] : memref<4x1x8xf32, #tpu.memory_space<vmem>>, vector<4x1x8xf32>
    %19 = vector.broadcast %18 : vector<4x1x8xf32> to vector<4x8x8xf32>
    %20 = arith.addf %17, %19 : vector<4x8x8xf32>
    %21 = arith.truncf %10 : vector<4x8x8xf32> to vector<4x8x8xbf16>
    %22 = arith.truncf %15 : vector<4x8x8xf32> to vector<4x8x8xbf16>
    "tpu.trace_start"() <{level = 10 : i32, message = "hqd,hkd->hqk"}> : () -> ()
    %cst_22 = arith.constant dense<0.000000e+00> : vector<4x8x8xf32>
    %23 = tpu.matmul %21, %22, %cst_22 {dimension_numbers = #tpu.dot_dimension_numbers<[2], [2], [1], [1], [0, 0, 0, 1, 1, 1], [0], [0]>} : vector<4x8x8xbf16>, vector<4x8x8xbf16>, vector<4x8x8xf32> -> vector<4x8x8xf32>
    "tpu.trace_stop"() : () -> ()
    %c0_23 = arith.constant 0 : index
    %c0_24 = arith.constant 0 : index
    %c0_25 = arith.constant 0 : index
    %24 = vector.load %arg2[%c0_23, %c0_24, %c0_25] : memref<1x1x8xf32, #tpu.memory_space<vmem>>, vector<1x1x8xf32>
    %25 = vector.broadcast %24 : vector<1x1x8xf32> to vector<4x8x8xf32>
    %26 = arith.addf %23, %25 : vector<4x8x8xf32>
    %cst_26 = arith.constant dense<0xFF800000> : vector<4x8xf32>
    %27 = vector.multi_reduction <maximumf>, %26, %cst_26 [2] : vector<4x8x8xf32> to vector<4x8xf32>
    %28 = vector.shape_cast %27 : vector<4x8xf32> to vector<4x8x1xf32>
    %29 = vector.broadcast %28 : vector<4x8x1xf32> to vector<4x8x8xf32>
    %30 = arith.subf %26, %29 : vector<4x8x8xf32>
    %31 = math.exp %30 : vector<4x8x8xf32>
    %cst_27 = arith.constant dense<0.000000e+00> : vector<4x8xf32>
    %32 = vector.multi_reduction <add>, %31, %cst_27 [2] : vector<4x8x8xf32> to vector<4x8xf32>
    %33 = vector.shape_cast %32 : vector<4x8xf32> to vector<4x8x1xf32>
    %34 = tpu.reciprocal %33 {approx = true} : vector<4x8x1xf32> -> vector<4x8x1xf32>
    %35 = vector.broadcast %34 : vector<4x8x1xf32> to vector<4x8x8xf32>
    %36 = arith.mulf %31, %35 : vector<4x8x8xf32>
    %37 = arith.truncf %36 : vector<4x8x8xf32> to vector<4x8x8xbf16>
    %38 = arith.truncf %20 : vector<4x8x8xf32> to vector<4x8x8xbf16>
    "tpu.trace_start"() <{level = 10 : i32, message = "hqk,hkd->hqd"}> : () -> ()
    %cst_28 = arith.constant dense<0.000000e+00> : vector<4x8x8xf32>
    %39 = tpu.matmul %37, %38, %cst_28 {dimension_numbers = #tpu.dot_dimension_numbers<[2], [1], [1], [2], [0, 0, 0, 1, 1, 2], [0], [0]>} : vector<4x8x8xbf16>, vector<4x8x8xbf16>, vector<4x8x8xf32> -> vector<4x8x8xf32>
    "tpu.trace_stop"() : () -> ()
    %40 = arith.truncf %39 : vector<4x8x8xf32> to vector<4x8x8xbf16>
    %c0_29 = arith.constant 0 : index
    %c0_30 = arith.constant 0 : index
    %c0_31 = arith.constant 0 : index
    %41 = vector.load %arg9[%c0_29, %c0_30, %c0_31] : memref<4x8x32xbf16, #tpu.memory_space<vmem>>, vector<4x8x32xbf16>
    "tpu.trace_start"() <{level = 10 : i32, message = "hld,hde->hle"}> : () -> ()
    %cst_32 = arith.constant dense<0.000000e+00> : vector<4x8x32xf32>
    %42 = tpu.matmul %40, %41, %cst_32 {dimension_numbers = #tpu.dot_dimension_numbers<[2], [1], [1], [2], [0, 0, 0, 1, 1, 2], [0], [0]>} : vector<4x8x8xbf16>, vector<4x8x32xbf16>, vector<4x8x32xf32> -> vector<4x8x32xf32>
    "tpu.trace_stop"() : () -> ()
    %cst_33 = arith.constant dense<0.000000e+00> : vector<8x32xf32>
    %43 = vector.multi_reduction <add>, %42, %cst_33 [0] : vector<4x8x32xf32> to vector<8x32xf32>
    %c0_34 = arith.constant 0 : index
    %c0_35 = arith.constant 0 : index
    %44 = vector.load %arg10[%c0_34, %c0_35] : memref<1x32xf32, #tpu.memory_space<vmem>>, vector<1x32xf32>
    %45 = vector.broadcast %44 : vector<1x32xf32> to vector<8x32xf32>
    %46 = arith.addf %43, %45 : vector<8x32xf32>
    %47 = arith.truncf %46 : vector<8x32xf32> to vector<8x32xbf16>
    %c0_36 = arith.constant 0 : index
    %c0_37 = arith.constant 0 : index
    %48 = vector.load %arg11[%c0_36, %c0_37] : memref<32x32xbf16, #tpu.memory_space<vmem>>, vector<32x32xbf16>
    %cst_38 = arith.constant dense<0.000000e+00> : vector<8x32xf32>
    %49 = tpu.matmul %47, %48, %cst_38 {dimension_numbers = #tpu.dot_dimension_numbers<[1], [0], [0], [1], [0, 0, 1, 1], [], []>} : vector<8x32xbf16>, vector<32x32xbf16>, vector<8x32xf32> -> vector<8x32xf32>
    %c0_39 = arith.constant 0 : index
    %c0_40 = arith.constant 0 : index
    %50 = vector.load %arg12[%c0_39, %c0_40] : memref<1x32xf32, #tpu.memory_space<vmem>>, vector<1x32xf32>
    %51 = vector.broadcast %50 : vector<1x32xf32> to vector<8x32xf32>
    %52 = arith.addf %49, %51 : vector<8x32xf32>
    %53 = arith.addf %52, %1 : vector<8x32xf32>
    %c0_41 = arith.constant 0 : index
    %c0_42 = arith.constant 0 : index
    %54 = vector.load %arg13[%c0_41, %c0_42] : memref<1x32xf32, #tpu.memory_space<vmem>>, vector<1x32xf32>
    %c0_43 = arith.constant 0 : index
    %c0_44 = arith.constant 0 : index
    %55 = vector.load %arg14[%c0_43, %c0_44] : memref<1x32xf32, #tpu.memory_space<vmem>>, vector<1x32xf32>
    %cst_45 = arith.constant dense<0.000000e+00> : vector<8xf32>
    %56 = vector.multi_reduction <add>, %53, %cst_45 [1] : vector<8x32xf32> to vector<8xf32>
    %57 = vector.shape_cast %56 : vector<8xf32> to vector<8x1xf32>
    %cst_46 = arith.constant 3.200000e+01 : f32
    %58 = vector.broadcast %cst_46 : f32 to vector<8x1xf32>
    %59 = arith.divf %57, %58 : vector<8x1xf32>
    %60 = arith.mulf %53, %53 : vector<8x32xf32>
    %cst_47 = arith.constant dense<0.000000e+00> : vector<8xf32>
    %61 = vector.multi_reduction <add>, %60, %cst_47 [1] : vector<8x32xf32> to vector<8xf32>
    %62 = vector.shape_cast %61 : vector<8xf32> to vector<8x1xf32>
    %cst_48 = arith.constant 3.200000e+01 : f32
    %63 = vector.broadcast %cst_48 : f32 to vector<8x1xf32>
    %64 = arith.divf %62, %63 : vector<8x1xf32>
    %65 = arith.mulf %59, %59 : vector<8x1xf32>
    %66 = arith.subf %64, %65 : vector<8x1xf32>
    %67 = vector.broadcast %59 : vector<8x1xf32> to vector<8x32xf32>
    %68 = arith.subf %53, %67 : vector<8x32xf32>
    %cst_49 = arith.constant 9.99999974E-6 : f32
    %69 = vector.broadcast %cst_49 : f32 to vector<8x1xf32>
    %70 = arith.addf %66, %69 : vector<8x1xf32>
    %71 = math.rsqrt %70 : vector<8x1xf32>
    %72 = vector.broadcast %71 : vector<8x1xf32> to vector<8x32xf32>
    %73 = arith.mulf %68, %72 : vector<8x32xf32>
    %74 = vector.broadcast %54 : vector<1x32xf32> to vector<8x32xf32>
    %75 = arith.mulf %73, %74 : vector<8x32xf32>
    %76 = vector.broadcast %55 : vector<1x32xf32> to vector<8x32xf32>
    %77 = arith.addf %75, %76 : vector<8x32xf32>
    %78 = arith.truncf %77 : vector<8x32xf32> to vector<8x32xbf16>
    %c0_50 = arith.constant 0 : index
    %c0_51 = arith.constant 0 : index
    %c0_52 = arith.constant 0 : index
    %79 = vector.load %arg15[%c0_50, %c0_51, %c0_52] : memref<1x8x32xbf16, #tpu.memory_space<vmem>>, vector<1x8x32xbf16>
    %80 = vector.shape_cast %79 : vector<1x8x32xbf16> to vector<8x32xbf16>
    %81 = vector.shape_cast %78 : vector<8x32xbf16> to vector<1x8x32xbf16>
    tpu.vector_store %arg15[%c0_50, %c0_51, %c0_52], %81 {strides = array<i32>} : memref<1x8x32xbf16, #tpu.memory_space<vmem>>, vector<1x8x32xbf16>,
    return
  }
  func.func @transform_0(%arg0: i32) -> (i32, i32, i32) {
    %c0_i32 = arith.constant 0 : i32
    %c0_i32_0 = arith.constant 0 : i32
    %c0_i32_1 = arith.constant 0 : i32
    return %arg0, %c0_i32, %c0_i32_0 : i32, i32, i32
  }
  func.func @transform_1(%arg0: i32) -> (i32, i32, i32) {
    %c0_i32 = arith.constant 0 : i32
    %c0_i32_0 = arith.constant 0 : i32
    %c0_i32_1 = arith.constant 0 : i32
    return %arg0, %c0_i32, %c0_i32_0 : i32, i32, i32
  }
  func.func @transform_2(%arg0: i32) -> (i32, i32, i32) {
    %c0_i32 = arith.constant 0 : i32
    %c0_i32_0 = arith.constant 0 : i32
    %c0_i32_1 = arith.constant 0 : i32
    %c0_i32_2 = arith.constant 0 : i32
    return %c0_i32, %c0_i32_0, %c0_i32_1 : i32, i32, i32
  }
  func.func @transform_3(%arg0: i32) -> (i32, i32, i32) {
    %c0_i32 = arith.constant 0 : i32
    %c0_i32_0 = arith.constant 0 : i32
    %c0_i32_1 = arith.constant 0 : i32
    %c0_i32_2 = arith.constant 0 : i32
    return %c0_i32, %c0_i32_0, %c0_i32_1 : i32, i32, i32
  }
  func.func @transform_4(%arg0: i32) -> (i32, i32, i32) {
    %c0_i32 = arith.constant 0 : i32
    %c0_i32_0 = arith.constant 0 : i32
    %c0_i32_1 = arith.constant 0 : i32
    %c0_i32_2 = arith.constant 0 : i32
    return %c0_i32, %c0_i32_0, %c0_i32_1 : i32, i32, i32
  }
  func.func @transform_5(%arg0: i32) -> (i32, i32, i32) {
    %c0_i32 = arith.constant 0 : i32
    %c0_i32_0 = arith.constant 0 : i32
    %c0_i32_1 = arith.constant 0 : i32
    %c0_i32_2 = arith.constant 0 : i32
    return %c0_i32, %c0_i32_0, %c0_i32_1 : i32, i32, i32
  }
  func.func @transform_6(%arg0: i32) -> (i32, i32, i32) {
    %c0_i32 = arith.constant 0 : i32
    %c0_i32_0 = arith.constant 0 : i32
    %c0_i32_1 = arith.constant 0 : i32
    %c0_i32_2 = arith.constant 0 : i32
    return %c0_i32, %c0_i32_0, %c0_i32_1 : i32, i32, i32
  }
  func.func @transform_7(%arg0: i32) -> (i32, i32, i32) {
    %c0_i32 = arith.constant 0 : i32
    %c0_i32_0 = arith.constant 0 : i32
    %c0_i32_1 = arith.constant 0 : i32
    %c0_i32_2 = arith.constant 0 : i32
    return %c0_i32, %c0_i32_0, %c0_i32_1 : i32, i32, i32
  }
  func.func @transform_8(%arg0: i32) -> (i32, i32, i32) {
    %c0_i32 = arith.constant 0 : i32
    %c0_i32_0 = arith.constant 0 : i32
    %c0_i32_1 = arith.constant 0 : i32
    %c0_i32_2 = arith.constant 0 : i32
    return %c0_i32, %c0_i32_0, %c0_i32_1 : i32, i32, i32
  }
  func.func @transform_9(%arg0: i32) -> (i32, i32) {
    %c0_i32 = arith.constant 0 : i32
    %c0_i32_0 = arith.constant 0 : i32
    %c0_i32_1 = arith.constant 0 : i32
    return %c0_i32, %c0_i32_0 : i32, i32
  }
  func.func @transform_10(%arg0: i32) -> (i32, i32) {
    %c0_i32 = arith.constant 0 : i32
    %c0_i32_0 = arith.constant 0 : i32
    %c0_i32_1 = arith.constant 0 : i32
    return %c0_i32, %c0_i32_0 : i32, i32
  }
  func.func @transform_11(%arg0: i32) -> (i32, i32) {
    %c0_i32 = arith.constant 0 : i32
    %c0_i32_0 = arith.constant 0 : i32
    %c0_i32_1 = arith.constant 0 : i32
    return %c0_i32, %c0_i32_0 : i32, i32
  }
  func.func @transform_12(%arg0: i32) -> (i32, i32) {
    %c0_i32 = arith.constant 0 : i32
    %c0_i32_0 = arith.constant 0 : i32
    %c0_i32_1 = arith.constant 0 : i32
    return %c0_i32, %c0_i32_0 : i32, i32
  }
  func.func @transform_13(%arg0: i32) -> (i32, i32) {
    %c0_i32 = arith.constant 0 : i32
    %c0_i32_0 = arith.constant 0 : i32
    %c0_i32_1 = arith.constant 0 : i32
    return %c0_i32, %c0_i32_0 : i32, i32
  }
  func.func @transform_14(%arg0: i32) -> (i32, i32, i32) {
    %c0_i32 = arith.constant 0 : i32
    %c0_i32_0 = arith.constant 0 : i32
    %c0_i32_1 = arith.constant 0 : i32
    return %arg0, %c0_i32, %c0_i32_0 : i32, i32, i32
  }
}

module attributes {stable_mosaic.version = 11 : i64} {
  func.func @fused_ffn_kernel(%arg0: i32, %arg1: memref<16x32xbf16, #tpu.memory_space<vmem>>, %arg2: memref<16x16xbf16, #tpu.memory_space<vmem>>, %arg3: memref<32x64xbf16, #tpu.memory_space<vmem>>, %arg4: memref<16x64xbf16, #tpu.memory_space<vmem>>, %arg5: memref<1x64xf32, #tpu.memory_space<vmem>>, %arg6: memref<64x32xbf16, #tpu.memory_space<vmem>>, %arg7: memref<1x32xf32, #tpu.memory_space<vmem>>, %arg8: memref<1x32xf32, #tpu.memory_space<vmem>>, %arg9: memref<1x32xf32, #tpu.memory_space<vmem>>, %arg10: memref<64x16xbf16, #tpu.memory_space<vmem>>, %arg11: memref<1x16xf32, #tpu.memory_space<vmem>>, %arg12: memref<1x16xf32, #tpu.memory_space<vmem>>, %arg13: memref<1x16xf32, #tpu.memory_space<vmem>>, %arg14: memref<16x32xf32, #tpu.memory_space<vmem>>, %arg15: memref<16x16xf32, #tpu.memory_space<vmem>>) attributes {dimension_semantics = [#tpu.dimension_semantics<parallel>], iteration_bounds = array<i64: 1>, scalar_prefetch = 0 : i64, scratch_operands = 0 : i64, tpu.core_type = #tpu.core_type<tc>, window_params = [{transform_indices = @transform_0, window_bounds = array<i64: 16, 32>}, {transform_indices = @transform_1, window_bounds = array<i64: 16, 16>}, {pipeline_mode = #tpu.pipeline_mode<synchronous>, transform_indices = @transform_2, window_bounds = array<i64: 32, 64>}, {pipeline_mode = #tpu.pipeline_mode<synchronous>, transform_indices = @transform_3, window_bounds = array<i64: 16, 64>}, {pipeline_mode = #tpu.pipeline_mode<synchronous>, transform_indices = @transform_4, window_bounds = array<i64: 1, 64>}, {pipeline_mode = #tpu.pipeline_mode<synchronous>, transform_indices = @transform_5, window_bounds = array<i64: 64, 32>}, {pipeline_mode = #tpu.pipeline_mode<synchronous>, transform_indices = @transform_6, window_bounds = array<i64: 1, 32>}, {pipeline_mode = #tpu.pipeline_mode<synchronous>, transform_indices = @transform_7, window_bounds = array<i64: 1, 32>}, {pipeline_mode = #tpu.pipeline_mode<synchronous>, transform_indices = @transform_8, window_bounds = array<i64: 1, 32>}, {pipeline_mode = #tpu.pipeline_mode<synchronous>, transform_indices = @transform_9, window_bounds = array<i64: 64, 16>}, {pipeline_mode = #tpu.pipeline_mode<synchronous>, transform_indices = @transform_10, window_bounds = array<i64: 1, 16>}, {pipeline_mode = #tpu.pipeline_mode<synchronous>, transform_indices = @transform_11, window_bounds = array<i64: 1, 16>}, {pipeline_mode = #tpu.pipeline_mode<synchronous>, transform_indices = @transform_12, window_bounds = array<i64: 1, 16>}, {transform_indices = @transform_13, window_bounds = array<i64: 16, 32>}, {transform_indices = @transform_14, window_bounds = array<i64: 16, 16>}]} {
    %c0 = arith.constant 0 : index
    %c0_0 = arith.constant 0 : index
    %0 = vector.load %arg1[%c0, %c0_0] : memref<16x32xbf16, #tpu.memory_space<vmem>>, vector<16x32xbf16>
    %c0_1 = arith.constant 0 : index
    %c0_2 = arith.constant 0 : index
    %1 = vector.load %arg2[%c0_1, %c0_2] : memref<16x16xbf16, #tpu.memory_space<vmem>>, vector<16x16xbf16>
    %c0_3 = arith.constant 0 : index
    %c0_4 = arith.constant 0 : index
    %2 = vector.load %arg3[%c0_3, %c0_4] : memref<32x64xbf16, #tpu.memory_space<vmem>>, vector<32x64xbf16>
    %cst = arith.constant dense<0.000000e+00> : vector<16x64xf32>
    %3 = tpu.matmul %0, %2, %cst {dimension_numbers = #tpu.dot_dimension_numbers<[1], [0], [0], [1], [0, 0, 1, 1], [], []>} : vector<16x32xbf16>, vector<32x64xbf16>, vector<16x64xf32> -> vector<16x64xf32>
    %c0_5 = arith.constant 0 : index
    %c0_6 = arith.constant 0 : index
    %4 = vector.load %arg4[%c0_5, %c0_6] : memref<16x64xbf16, #tpu.memory_space<vmem>>, vector<16x64xbf16>
    %cst_7 = arith.constant dense<0.000000e+00> : vector<16x64xf32>
    %5 = tpu.matmul %1, %4, %cst_7 {dimension_numbers = #tpu.dot_dimension_numbers<[1], [0], [0], [1], [0, 0, 1, 1], [], []>} : vector<16x16xbf16>, vector<16x64xbf16>, vector<16x64xf32> -> vector<16x64xf32>
    %6 = arith.addf %3, %5 : vector<16x64xf32>
    %c0_8 = arith.constant 0 : index
    %c0_9 = arith.constant 0 : index
    %7 = vector.load %arg5[%c0_8, %c0_9] : memref<1x64xf32, #tpu.memory_space<vmem>>, vector<1x64xf32>
    %8 = vector.broadcast %7 : vector<1x64xf32> to vector<16x64xf32>
    %9 = arith.addf %6, %8 : vector<16x64xf32>
    %cst_10 = arith.constant 5.000000e-01 : f32
    %10 = vector.broadcast %cst_10 : f32 to vector<16x64xf32>
    %11 = arith.mulf %10, %9 : vector<16x64xf32>
    %cst_11 = arith.constant 0.707106769 : f32
    %12 = vector.broadcast %cst_11 : f32 to vector<16x64xf32>
    %13 = arith.mulf %9, %12 : vector<16x64xf32>
    %14 = math.erf %13 : vector<16x64xf32>
    %cst_12 = arith.constant 1.000000e+00 : f32
    %15 = vector.broadcast %cst_12 : f32 to vector<16x64xf32>
    %16 = arith.addf %15, %14 : vector<16x64xf32>
    %17 = arith.mulf %11, %16 : vector<16x64xf32>
    %18 = arith.truncf %17 : vector<16x64xf32> to vector<16x64xbf16>
    %c0_13 = arith.constant 0 : index
    %c0_14 = arith.constant 0 : index
    %19 = vector.load %arg6[%c0_13, %c0_14] : memref<64x32xbf16, #tpu.memory_space<vmem>>, vector<64x32xbf16>
    %cst_15 = arith.constant dense<0.000000e+00> : vector<16x32xf32>
    %20 = tpu.matmul %18, %19, %cst_15 {dimension_numbers = #tpu.dot_dimension_numbers<[1], [0], [0], [1], [0, 0, 1, 1], [], []>} : vector<16x64xbf16>, vector<64x32xbf16>, vector<16x32xf32> -> vector<16x32xf32>
    %c0_16 = arith.constant 0 : index
    %c0_17 = arith.constant 0 : index
    %21 = vector.load %arg7[%c0_16, %c0_17] : memref<1x32xf32, #tpu.memory_space<vmem>>, vector<1x32xf32>
    %22 = vector.broadcast %21 : vector<1x32xf32> to vector<16x32xf32>
    %23 = arith.addf %20, %22 : vector<16x32xf32>
    %24 = arith.extf %0 : vector<16x32xbf16> to vector<16x32xf32>
    %25 = arith.addf %23, %24 : vector<16x32xf32>
    %c0_18 = arith.constant 0 : index
    %c0_19 = arith.constant 0 : index
    %26 = vector.load %arg8[%c0_18, %c0_19] : memref<1x32xf32, #tpu.memory_space<vmem>>, vector<1x32xf32>
    %c0_20 = arith.constant 0 : index
    %c0_21 = arith.constant 0 : index
    %27 = vector.load %arg9[%c0_20, %c0_21] : memref<1x32xf32, #tpu.memory_space<vmem>>, vector<1x32xf32>
    %cst_22 = arith.constant dense<0.000000e+00> : vector<16xf32>
    %28 = vector.multi_reduction <add>, %25, %cst_22 [1] : vector<16x32xf32> to vector<16xf32>
    %29 = vector.shape_cast %28 : vector<16xf32> to vector<16x1xf32>
    %cst_23 = arith.constant 3.200000e+01 : f32
    %30 = vector.broadcast %cst_23 : f32 to vector<16x1xf32>
    %31 = arith.divf %29, %30 : vector<16x1xf32>
    %32 = arith.mulf %25, %25 : vector<16x32xf32>
    %cst_24 = arith.constant dense<0.000000e+00> : vector<16xf32>
    %33 = vector.multi_reduction <add>, %32, %cst_24 [1] : vector<16x32xf32> to vector<16xf32>
    %34 = vector.shape_cast %33 : vector<16xf32> to vector<16x1xf32>
    %cst_25 = arith.constant 3.200000e+01 : f32
    %35 = vector.broadcast %cst_25 : f32 to vector<16x1xf32>
    %36 = arith.divf %34, %35 : vector<16x1xf32>
    %37 = arith.mulf %31, %31 : vector<16x1xf32>
    %38 = arith.subf %36, %37 : vector<16x1xf32>
    %39 = vector.broadcast %31 : vector<16x1xf32> to vector<16x32xf32>
    %40 = arith.subf %25, %39 : vector<16x32xf32>
    %cst_26 = arith.constant 9.99999974E-6 : f32
    %41 = vector.broadcast %cst_26 : f32 to vector<16x1xf32>
    %42 = arith.addf %38, %41 : vector<16x1xf32>
    %43 = math.rsqrt %42 : vector<16x1xf32>
    %44 = vector.broadcast %43 : vector<16x1xf32> to vector<16x32xf32>
    %45 = arith.mulf %40, %44 : vector<16x32xf32>
    %46 = vector.broadcast %26 : vector<1x32xf32> to vector<16x32xf32>
    %47 = arith.mulf %45, %46 : vector<16x32xf32>
    %48 = vector.broadcast %27 : vector<1x32xf32> to vector<16x32xf32>
    %49 = arith.addf %47, %48 : vector<16x32xf32>
    %c0_27 = arith.constant 0 : index
    %c0_28 = arith.constant 0 : index
    %50 = vector.load %arg14[%c0_27, %c0_28] : memref<16x32xf32, #tpu.memory_space<vmem>>, vector<16x32xf32>
    tpu.vector_store %arg14[%c0_27, %c0_28], %49 {strides = array<i32>} : memref<16x32xf32, #tpu.memory_space<vmem>>, vector<16x32xf32>,
    %c0_29 = arith.constant 0 : index
    %c0_30 = arith.constant 0 : index
    %51 = vector.load %arg10[%c0_29, %c0_30] : memref<64x16xbf16, #tpu.memory_space<vmem>>, vector<64x16xbf16>
    %cst_31 = arith.constant dense<0.000000e+00> : vector<16x16xf32>
    %52 = tpu.matmul %18, %51, %cst_31 {dimension_numbers = #tpu.dot_dimension_numbers<[1], [0], [0], [1], [0, 0, 1, 1], [], []>} : vector<16x64xbf16>, vector<64x16xbf16>, vector<16x16xf32> -> vector<16x16xf32>
    %c0_32 = arith.constant 0 : index
    %c0_33 = arith.constant 0 : index
    %53 = vector.load %arg11[%c0_32, %c0_33] : memref<1x16xf32, #tpu.memory_space<vmem>>, vector<1x16xf32>
    %54 = vector.broadcast %53 : vector<1x16xf32> to vector<16x16xf32>
    %55 = arith.addf %52, %54 : vector<16x16xf32>
    %56 = arith.extf %1 : vector<16x16xbf16> to vector<16x16xf32>
    %57 = arith.addf %55, %56 : vector<16x16xf32>
    %c0_34 = arith.constant 0 : index
    %c0_35 = arith.constant 0 : index
    %58 = vector.load %arg12[%c0_34, %c0_35] : memref<1x16xf32, #tpu.memory_space<vmem>>, vector<1x16xf32>
    %c0_36 = arith.constant 0 : index
    %c0_37 = arith.constant 0 : index
    %59 = vector.load %arg13[%c0_36, %c0_37] : memref<1x16xf32, #tpu.memory_space<vmem>>, vector<1x16xf32>
    %cst_38 = arith.constant dense<0.000000e+00> : vector<16xf32>
    %60 = vector.multi_reduction <add>, %57, %cst_38 [1] : vector<16x16xf32> to vector<16xf32>
    %61 = vector.shape_cast %60 : vector<16xf32> to vector<16x1xf32>
    %cst_39 = arith.constant 1.600000e+01 : f32
    %62 = vector.broadcast %cst_39 : f32 to vector<16x1xf32>
    %63 = arith.divf %61, %62 : vector<16x1xf32>
    %64 = arith.mulf %57, %57 : vector<16x16xf32>
    %cst_40 = arith.constant dense<0.000000e+00> : vector<16xf32>
    %65 = vector.multi_reduction <add>, %64, %cst_40 [1] : vector<16x16xf32> to vector<16xf32>
    %66 = vector.shape_cast %65 : vector<16xf32> to vector<16x1xf32>
    %cst_41 = arith.constant 1.600000e+01 : f32
    %67 = vector.broadcast %cst_41 : f32 to vector<16x1xf32>
    %68 = arith.divf %66, %67 : vector<16x1xf32>
    %69 = arith.mulf %63, %63 : vector<16x1xf32>
    %70 = arith.subf %68, %69 : vector<16x1xf32>
    %71 = vector.broadcast %63 : vector<16x1xf32> to vector<16x16xf32>
    %72 = arith.subf %57, %71 : vector<16x16xf32>
    %cst_42 = arith.constant 9.99999974E-6 : f32
    %73 = vector.broadcast %cst_42 : f32 to vector<16x1xf32>
    %74 = arith.addf %70, %73 : vector<16x1xf32>
    %75 = math.rsqrt %74 : vector<16x1xf32>
    %76 = vector.broadcast %75 : vector<16x1xf32> to vector<16x16xf32>
    %77 = arith.mulf %72, %76 : vector<16x16xf32>
    %78 = vector.broadcast %58 : vector<1x16xf32> to vector<16x16xf32>
    %79 = arith.mulf %77, %78 : vector<16x16xf32>
    %80 = vector.broadcast %59 : vector<1x16xf32> to vector<16x16xf32>
    %81 = arith.addf %79, %80 : vector<16x16xf32>
    %c0_43 = arith.constant 0 : index
    %c0_44 = arith.constant 0 : index
    %82 = vector.load %arg15[%c0_43, %c0_44] : memref<16x16xf32, #tpu.memory_space<vmem>>, vector<16x16xf32>
    tpu.vector_store %arg15[%c0_43, %c0_44], %81 {strides = array<i32>} : memref<16x16xf32, #tpu.memory_space<vmem>>, vector<16x16xf32>,
    return
  }
  func.func @transform_0(%arg0: i32) -> (i32, i32) {
    %c0_i32 = arith.constant 0 : i32
    %c0_i32_0 = arith.constant 0 : i32
    return %arg0, %c0_i32 : i32, i32
  }
  func.func @transform_1(%arg0: i32) -> (i32, i32) {
    %c0_i32 = arith.constant 0 : i32
    %c0_i32_0 = arith.constant 0 : i32
    return %arg0, %c0_i32 : i32, i32
  }
  func.func @transform_2(%arg0: i32) -> (i32, i32) {
    %c0_i32 = arith.constant 0 : i32
    %c0_i32_0 = arith.constant 0 : i32
    %c0_i32_1 = arith.constant 0 : i32
    return %c0_i32, %c0_i32_0 : i32, i32
  }
  func.func @transform_3(%arg0: i32) -> (i32, i32) {
    %c0_i32 = arith.constant 0 : i32
    %c0_i32_0 = arith.constant 0 : i32
    %c0_i32_1 = arith.constant 0 : i32
    return %c0_i32, %c0_i32_0 : i32, i32
  }
  func.func @transform_4(%arg0: i32) -> (i32, i32) {
    %c0_i32 = arith.constant 0 : i32
    %c0_i32_0 = arith.constant 0 : i32
    %c0_i32_1 = arith.constant 0 : i32
    return %c0_i32, %c0_i32_0 : i32, i32
  }
  func.func @transform_5(%arg0: i32) -> (i32, i32) {
    %c0_i32 = arith.constant 0 : i32
    %c0_i32_0 = arith.constant 0 : i32
    %c0_i32_1 = arith.constant 0 : i32
    return %c0_i32, %c0_i32_0 : i32, i32
  }
  func.func @transform_6(%arg0: i32) -> (i32, i32) {
    %c0_i32 = arith.constant 0 : i32
    %c0_i32_0 = arith.constant 0 : i32
    %c0_i32_1 = arith.constant 0 : i32
    return %c0_i32, %c0_i32_0 : i32, i32
  }
  func.func @transform_7(%arg0: i32) -> (i32, i32) {
    %c0_i32 = arith.constant 0 : i32
    %c0_i32_0 = arith.constant 0 : i32
    %c0_i32_1 = arith.constant 0 : i32
    return %c0_i32, %c0_i32_0 : i32, i32
  }
  func.func @transform_8(%arg0: i32) -> (i32, i32) {
    %c0_i32 = arith.constant 0 : i32
    %c0_i32_0 = arith.constant 0 : i32
    %c0_i32_1 = arith.constant 0 : i32
    return %c0_i32, %c0_i32_0 : i32, i32
  }
  func.func @transform_9(%arg0: i32) -> (i32, i32) {
    %c0_i32 = arith.constant 0 : i32
    %c0_i32_0 = arith.constant 0 : i32
    %c0_i32_1 = arith.constant 0 : i32
    return %c0_i32, %c0_i32_0 : i32, i32
  }
  func.func @transform_10(%arg0: i32) -> (i32, i32) {
    %c0_i32 = arith.constant 0 : i32
    %c0_i32_0 = arith.constant 0 : i32
    %c0_i32_1 = arith.constant 0 : i32
    return %c0_i32, %c0_i32_0 : i32, i32
  }
  func.func @transform_11(%arg0: i32) -> (i32, i32) {
    %c0_i32 = arith.constant 0 : i32
    %c0_i32_0 = arith.constant 0 : i32
    %c0_i32_1 = arith.constant 0 : i32
    return %c0_i32, %c0_i32_0 : i32, i32
  }
  func.func @transform_12(%arg0: i32) -> (i32, i32) {
    %c0_i32 = arith.constant 0 : i32
    %c0_i32_0 = arith.constant 0 : i32
    %c0_i32_1 = arith.constant 0 : i32
    return %c0_i32, %c0_i32_0 : i32, i32
  }
  func.func @transform_13(%arg0: i32) -> (i32, i32) {
    %c0_i32 = arith.constant 0 : i32
    %c0_i32_0 = arith.constant 0 : i32
    return %arg0, %c0_i32 : i32, i32
  }
  func.func @transform_14(%arg0: i32) -> (i32, i32) {
    %c0_i32 = arith.constant 0 : i32
    %c0_i32_0 = arith.constant 0 : i32
    return %arg0, %c0_i32 : i32, i32
  }
}

module attributes {stable_mosaic.version = 11 : i64} {
  func.func @fused_ffn_kernel(%arg0: i32, %arg1: memref<16x32xbf16, #tpu.memory_space<vmem>>, %arg2: memref<16x16xbf16, #tpu.memory_space<vmem>>, %arg3: memref<32x64xbf16, #tpu.memory_space<vmem>>, %arg4: memref<16x64xbf16, #tpu.memory_space<vmem>>, %arg5: memref<1x64xf32, #tpu.memory_space<vmem>>, %arg6: memref<64x32xbf16, #tpu.memory_space<vmem>>, %arg7: memref<1x32xf32, #tpu.memory_space<vmem>>, %arg8: memref<1x32xf32, #tpu.memory_space<vmem>>, %arg9: memref<1x32xf32, #tpu.memory_space<vmem>>, %arg10: memref<64x16xbf16, #tpu.memory_space<vmem>>, %arg11: memref<1x16xf32, #tpu.memory_space<vmem>>, %arg12: memref<1x16xf32, #tpu.memory_space<vmem>>, %arg13: memref<1x16xf32, #tpu.memory_space<vmem>>, %arg14: memref<16x32xf32, #tpu.memory_space<vmem>>, %arg15: memref<16x16xf32, #tpu.memory_space<vmem>>) attributes {dimension_semantics = [#tpu.dimension_semantics<parallel>], iteration_bounds = array<i64: 1>, scalar_prefetch = 0 : i64, scratch_operands = 0 : i64, tpu.core_type = #tpu.core_type<tc>, window_params = [{transform_indices = @transform_0, window_bounds = array<i64: 16, 32>}, {transform_indices = @transform_1, window_bounds = array<i64: 16, 16>}, {pipeline_mode = #tpu.pipeline_mode<synchronous>, transform_indices = @transform_2, window_bounds = array<i64: 32, 64>}, {pipeline_mode = #tpu.pipeline_mode<synchronous>, transform_indices = @transform_3, window_bounds = array<i64: 16, 64>}, {pipeline_mode = #tpu.pipeline_mode<synchronous>, transform_indices = @transform_4, window_bounds = array<i64: 1, 64>}, {pipeline_mode = #tpu.pipeline_mode<synchronous>, transform_indices = @transform_5, window_bounds = array<i64: 64, 32>}, {pipeline_mode = #tpu.pipeline_mode<synchronous>, transform_indices = @transform_6, window_bounds = array<i64: 1, 32>}, {pipeline_mode = #tpu.pipeline_mode<synchronous>, transform_indices = @transform_7, window_bounds = array<i64: 1, 32>}, {pipeline_mode = #tpu.pipeline_mode<synchronous>, transform_indices = @transform_8, window_bounds = array<i64: 1, 32>}, {pipeline_mode = #tpu.pipeline_mode<synchronous>, transform_indices = @transform_9, window_bounds = array<i64: 64, 16>}, {pipeline_mode = #tpu.pipeline_mode<synchronous>, transform_indices = @transform_10, window_bounds = array<i64: 1, 16>}, {pipeline_mode = #tpu.pipeline_mode<synchronous>, transform_indices = @transform_11, window_bounds = array<i64: 1, 16>}, {pipeline_mode = #tpu.pipeline_mode<synchronous>, transform_indices = @transform_12, window_bounds = array<i64: 1, 16>}, {transform_indices = @transform_13, window_bounds = array<i64: 16, 32>}, {transform_indices = @transform_14, window_bounds = array<i64: 16, 16>}]} {
    %c0 = arith.constant 0 : index
    %c0_0 = arith.constant 0 : index
    %0 = vector.load %arg1[%c0, %c0_0] : memref<16x32xbf16, #tpu.memory_space<vmem>>, vector<16x32xbf16>
    %c0_1 = arith.constant 0 : index
    %c0_2 = arith.constant 0 : index
    %1 = vector.load %arg2[%c0_1, %c0_2] : memref<16x16xbf16, #tpu.memory_space<vmem>>, vector<16x16xbf16>
    %c0_3 = arith.constant 0 : index
    %c0_4 = arith.constant 0 : index
    %2 = vector.load %arg3[%c0_3, %c0_4] : memref<32x64xbf16, #tpu.memory_space<vmem>>, vector<32x64xbf16>
    %cst = arith.constant dense<0.000000e+00> : vector<16x64xf32>
    %3 = tpu.matmul %0, %2, %cst {dimension_numbers = #tpu.dot_dimension_numbers<[1], [0], [0], [1], [0, 0, 1, 1], [], []>} : vector<16x32xbf16>, vector<32x64xbf16>, vector<16x64xf32> -> vector<16x64xf32>
    %c0_5 = arith.constant 0 : index
    %c0_6 = arith.constant 0 : index
    %4 = vector.load %arg4[%c0_5, %c0_6] : memref<16x64xbf16, #tpu.memory_space<vmem>>, vector<16x64xbf16>
    %cst_7 = arith.constant dense<0.000000e+00> : vector<16x64xf32>
    %5 = tpu.matmul %1, %4, %cst_7 {dimension_numbers = #tpu.dot_dimension_numbers<[1], [0], [0], [1], [0, 0, 1, 1], [], []>} : vector<16x16xbf16>, vector<16x64xbf16>, vector<16x64xf32> -> vector<16x64xf32>
    %6 = arith.addf %3, %5 : vector<16x64xf32>
    %c0_8 = arith.constant 0 : index
    %c0_9 = arith.constant 0 : index
    %7 = vector.load %arg5[%c0_8, %c0_9] : memref<1x64xf32, #tpu.memory_space<vmem>>, vector<1x64xf32>
    %8 = vector.broadcast %7 : vector<1x64xf32> to vector<16x64xf32>
    %9 = arith.addf %6, %8 : vector<16x64xf32>
    %cst_10 = arith.constant 5.000000e-01 : f32
    %10 = vector.broadcast %cst_10 : f32 to vector<16x64xf32>
    %11 = arith.mulf %10, %9 : vector<16x64xf32>
    %cst_11 = arith.constant 0.707106769 : f32
    %12 = vector.broadcast %cst_11 : f32 to vector<16x64xf32>
    %13 = arith.mulf %9, %12 : vector<16x64xf32>
    %14 = math.erf %13 : vector<16x64xf32>
    %cst_12 = arith.constant 1.000000e+00 : f32
    %15 = vector.broadcast %cst_12 : f32 to vector<16x64xf32>
    %16 = arith.addf %15, %14 : vector<16x64xf32>
    %17 = arith.mulf %11, %16 : vector<16x64xf32>
    %18 = arith.truncf %17 : vector<16x64xf32> to vector<16x64xbf16>
    %c0_13 = arith.constant 0 : index
    %c0_14 = arith.constant 0 : index
    %19 = vector.load %arg6[%c0_13, %c0_14] : memref<64x32xbf16, #tpu.memory_space<vmem>>, vector<64x32xbf16>
    %cst_15 = arith.constant dense<0.000000e+00> : vector<16x32xf32>
    %20 = tpu.matmul %18, %19, %cst_15 {dimension_numbers = #tpu.dot_dimension_numbers<[1], [0], [0], [1], [0, 0, 1, 1], [], []>} : vector<16x64xbf16>, vector<64x32xbf16>, vector<16x32xf32> -> vector<16x32xf32>
    %c0_16 = arith.constant 0 : index
    %c0_17 = arith.constant 0 : index
    %21 = vector.load %arg7[%c0_16, %c0_17] : memref<1x32xf32, #tpu.memory_space<vmem>>, vector<1x32xf32>
    %22 = vector.broadcast %21 : vector<1x32xf32> to vector<16x32xf32>
    %23 = arith.addf %20, %22 : vector<16x32xf32>
    %24 = arith.extf %0 : vector<16x32xbf16> to vector<16x32xf32>
    %25 = arith.addf %23, %24 : vector<16x32xf32>
    %c0_18 = arith.constant 0 : index
    %c0_19 = arith.constant 0 : index
    %26 = vector.load %arg8[%c0_18, %c0_19] : memref<1x32xf32, #tpu.memory_space<vmem>>, vector<1x32xf32>
    %c0_20 = arith.constant 0 : index
    %c0_21 = arith.constant 0 : index
    %27 = vector.load %arg9[%c0_20, %c0_21] : memref<1x32xf32, #tpu.memory_space<vmem>>, vector<1x32xf32>
    %cst_22 = arith.constant dense<0.000000e+00> : vector<16xf32>
    %28 = vector.multi_reduction <add>, %25, %cst_22 [1] : vector<16x32xf32> to vector<16xf32>
    %29 = vector.shape_cast %28 : vector<16xf32> to vector<16x1xf32>
    %cst_23 = arith.constant 3.200000e+01 : f32
    %30 = vector.broadcast %cst_23 : f32 to vector<16x1xf32>
    %31 = arith.divf %29, %30 : vector<16x1xf32>
    %32 = arith.mulf %25, %25 : vector<16x32xf32>
    %cst_24 = arith.constant dense<0.000000e+00> : vector<16xf32>
    %33 = vector.multi_reduction <add>, %32, %cst_24 [1] : vector<16x32xf32> to vector<16xf32>
    %34 = vector.shape_cast %33 : vector<16xf32> to vector<16x1xf32>
    %cst_25 = arith.constant 3.200000e+01 : f32
    %35 = vector.broadcast %cst_25 : f32 to vector<16x1xf32>
    %36 = arith.divf %34, %35 : vector<16x1xf32>
    %37 = arith.mulf %31, %31 : vector<16x1xf32>
    %38 = arith.subf %36, %37 : vector<16x1xf32>
    %39 = vector.broadcast %31 : vector<16x1xf32> to vector<16x32xf32>
    %40 = arith.subf %25, %39 : vector<16x32xf32>
    %cst_26 = arith.constant 9.99999974E-6 : f32
    %41 = vector.broadcast %cst_26 : f32 to vector<16x1xf32>
    %42 = arith.addf %38, %41 : vector<16x1xf32>
    %43 = math.rsqrt %42 : vector<16x1xf32>
    %44 = vector.broadcast %43 : vector<16x1xf32> to vector<16x32xf32>
    %45 = arith.mulf %40, %44 : vector<16x32xf32>
    %46 = vector.broadcast %26 : vector<1x32xf32> to vector<16x32xf32>
    %47 = arith.mulf %45, %46 : vector<16x32xf32>
    %48 = vector.broadcast %27 : vector<1x32xf32> to vector<16x32xf32>
    %49 = arith.addf %47, %48 : vector<16x32xf32>
    %c0_27 = arith.constant 0 : index
    %c0_28 = arith.constant 0 : index
    %50 = vector.load %arg14[%c0_27, %c0_28] : memref<16x32xf32, #tpu.memory_space<vmem>>, vector<16x32xf32>
    tpu.vector_store %arg14[%c0_27, %c0_28], %49 {strides = array<i32>} : memref<16x32xf32, #tpu.memory_space<vmem>>, vector<16x32xf32>,
    %c0_29 = arith.constant 0 : index
    %c0_30 = arith.constant 0 : index
    %51 = vector.load %arg10[%c0_29, %c0_30] : memref<64x16xbf16, #tpu.memory_space<vmem>>, vector<64x16xbf16>
    %cst_31 = arith.constant dense<0.000000e+00> : vector<16x16xf32>
    %52 = tpu.matmul %18, %51, %cst_31 {dimension_numbers = #tpu.dot_dimension_numbers<[1], [0], [0], [1], [0, 0, 1, 1], [], []>} : vector<16x64xbf16>, vector<64x16xbf16>, vector<16x16xf32> -> vector<16x16xf32>
    %c0_32 = arith.constant 0 : index
    %c0_33 = arith.constant 0 : index
    %53 = vector.load %arg11[%c0_32, %c0_33] : memref<1x16xf32, #tpu.memory_space<vmem>>, vector<1x16xf32>
    %54 = vector.broadcast %53 : vector<1x16xf32> to vector<16x16xf32>
    %55 = arith.addf %52, %54 : vector<16x16xf32>
    %56 = arith.extf %1 : vector<16x16xbf16> to vector<16x16xf32>
    %57 = arith.addf %55, %56 : vector<16x16xf32>
    %c0_34 = arith.constant 0 : index
    %c0_35 = arith.constant 0 : index
    %58 = vector.load %arg12[%c0_34, %c0_35] : memref<1x16xf32, #tpu.memory_space<vmem>>, vector<1x16xf32>
    %c0_36 = arith.constant 0 : index
    %c0_37 = arith.constant 0 : index
    %59 = vector.load %arg13[%c0_36, %c0_37] : memref<1x16xf32, #tpu.memory_space<vmem>>, vector<1x16xf32>
    %cst_38 = arith.constant dense<0.000000e+00> : vector<16xf32>
    %60 = vector.multi_reduction <add>, %57, %cst_38 [1] : vector<16x16xf32> to vector<16xf32>
    %61 = vector.shape_cast %60 : vector<16xf32> to vector<16x1xf32>
    %cst_39 = arith.constant 1.600000e+01 : f32
    %62 = vector.broadcast %cst_39 : f32 to vector<16x1xf32>
    %63 = arith.divf %61, %62 : vector<16x1xf32>
    %64 = arith.mulf %57, %57 : vector<16x16xf32>
    %cst_40 = arith.constant dense<0.000000e+00> : vector<16xf32>
    %65 = vector.multi_reduction <add>, %64, %cst_40 [1] : vector<16x16xf32> to vector<16xf32>
    %66 = vector.shape_cast %65 : vector<16xf32> to vector<16x1xf32>
    %cst_41 = arith.constant 1.600000e+01 : f32
    %67 = vector.broadcast %cst_41 : f32 to vector<16x1xf32>
    %68 = arith.divf %66, %67 : vector<16x1xf32>
    %69 = arith.mulf %63, %63 : vector<16x1xf32>
    %70 = arith.subf %68, %69 : vector<16x1xf32>
    %71 = vector.broadcast %63 : vector<16x1xf32> to vector<16x16xf32>
    %72 = arith.subf %57, %71 : vector<16x16xf32>
    %cst_42 = arith.constant 9.99999974E-6 : f32
    %73 = vector.broadcast %cst_42 : f32 to vector<16x1xf32>
    %74 = arith.addf %70, %73 : vector<16x1xf32>
    %75 = math.rsqrt %74 : vector<16x1xf32>
    %76 = vector.broadcast %75 : vector<16x1xf32> to vector<16x16xf32>
    %77 = arith.mulf %72, %76 : vector<16x16xf32>
    %78 = vector.broadcast %58 : vector<1x16xf32> to vector<16x16xf32>
    %79 = arith.mulf %77, %78 : vector<16x16xf32>
    %80 = vector.broadcast %59 : vector<1x16xf32> to vector<16x16xf32>
    %81 = arith.addf %79, %80 : vector<16x16xf32>
    %c0_43 = arith.constant 0 : index
    %c0_44 = arith.constant 0 : index
    %82 = vector.load %arg15[%c0_43, %c0_44] : memref<16x16xf32, #tpu.memory_space<vmem>>, vector<16x16xf32>
    tpu.vector_store %arg15[%c0_43, %c0_44], %81 {strides = array<i32>} : memref<16x16xf32, #tpu.memory_space<vmem>>, vector<16x16xf32>,
    return
  }
  func.func @transform_0(%arg0: i32) -> (i32, i32) {
    %c0_i32 = arith.constant 0 : i32
    %c0_i32_0 = arith.constant 0 : i32
    return %arg0, %c0_i32 : i32, i32
  }
  func.func @transform_1(%arg0: i32) -> (i32, i32) {
    %c0_i32 = arith.constant 0 : i32
    %c0_i32_0 = arith.constant 0 : i32
    return %arg0, %c0_i32 : i32, i32
  }
  func.func @transform_2(%arg0: i32) -> (i32, i32) {
    %c0_i32 = arith.constant 0 : i32
    %c0_i32_0 = arith.constant 0 : i32
    %c0_i32_1 = arith.constant 0 : i32
    return %c0_i32, %c0_i32_0 : i32, i32
  }
  func.func @transform_3(%arg0: i32) -> (i32, i32) {
    %c0_i32 = arith.constant 0 : i32
    %c0_i32_0 = arith.constant 0 : i32
    %c0_i32_1 = arith.constant 0 : i32
    return %c0_i32, %c0_i32_0 : i32, i32
  }
  func.func @transform_4(%arg0: i32) -> (i32, i32) {
    %c0_i32 = arith.constant 0 : i32
    %c0_i32_0 = arith.constant 0 : i32
    %c0_i32_1 = arith.constant 0 : i32
    return %c0_i32, %c0_i32_0 : i32, i32
  }
  func.func @transform_5(%arg0: i32) -> (i32, i32) {
    %c0_i32 = arith.constant 0 : i32
    %c0_i32_0 = arith.constant 0 : i32
    %c0_i32_1 = arith.constant 0 : i32
    return %c0_i32, %c0_i32_0 : i32, i32
  }
  func.func @transform_6(%arg0: i32) -> (i32, i32) {
    %c0_i32 = arith.constant 0 : i32
    %c0_i32_0 = arith.constant 0 : i32
    %c0_i32_1 = arith.constant 0 : i32
    return %c0_i32, %c0_i32_0 : i32, i32
  }
  func.func @transform_7(%arg0: i32) -> (i32, i32) {
    %c0_i32 = arith.constant 0 : i32
    %c0_i32_0 = arith.constant 0 : i32
    %c0_i32_1 = arith.constant 0 : i32
    return %c0_i32, %c0_i32_0 : i32, i32
  }
  func.func @transform_8(%arg0: i32) -> (i32, i32) {
    %c0_i32 = arith.constant 0 : i32
    %c0_i32_0 = arith.constant 0 : i32
    %c0_i32_1 = arith.constant 0 : i32
    return %c0_i32, %c0_i32_0 : i32, i32
  }
  func.func @transform_9(%arg0: i32) -> (i32, i32) {
    %c0_i32 = arith.constant 0 : i32
    %c0_i32_0 = arith.constant 0 : i32
    %c0_i32_1 = arith.constant 0 : i32
    return %c0_i32, %c0_i32_0 : i32, i32
  }
  func.func @transform_10(%arg0: i32) -> (i32, i32) {
    %c0_i32 = arith.constant 0 : i32
    %c0_i32_0 = arith.constant 0 : i32
    %c0_i32_1 = arith.constant 0 : i32
    return %c0_i32, %c0_i32_0 : i32, i32
  }
  func.func @transform_11(%arg0: i32) -> (i32, i32) {
    %c0_i32 = arith.constant 0 : i32
    %c0_i32_0 = arith.constant 0 : i32
    %c0_i32_1 = arith.constant 0 : i32
    return %c0_i32, %c0_i32_0 : i32, i32
  }
  func.func @transform_12(%arg0: i32) -> (i32, i32) {
    %c0_i32 = arith.constant 0 : i32
    %c0_i32_0 = arith.constant 0 : i32
    %c0_i32_1 = arith.constant 0 : i32
    return %c0_i32, %c0_i32_0 : i32, i32
  }
  func.func @transform_13(%arg0: i32) -> (i32, i32) {
    %c0_i32 = arith.constant 0 : i32
    %c0_i32_0 = arith.constant 0 : i32
    return %arg0, %c0_i32 : i32, i32
  }
  func.func @transform_14(%arg0: i32) -> (i32, i32) {
    %c0_i32 = arith.constant 0 : i32
    %c0_i32_0 = arith.constant 0 : i32
    return %arg0, %c0_i32 : i32, i32
  }
}

</mosaic_0001>

<bundles_post_ra>
// kernel: run.8
= control target key start
LH: loop header
LB: loop body
LE: loop exit
PB: predicated region body
PF: predicated region fallthrough
CT: control target
= control target key end

     0   :  { %v583_v0 = vmov 0.0   ;;  %vm584_vm0 = vmmov 0   ;;  %vm68_vm1 = vcmask 130048   ;;  %vm130_vm2 = vcmask 261120   ;;  %s784_s3 = inlined_call_operand.vmem [shape: bf16[16,64], index: 3, kind: input, shape index: {}]   ;;  %s785_s2 = inlined_call_operand.vmem [shape: bf16[32,64], index: 2, kind: input, shape index: {}]   ;;  %s786_s1 = inlined_call_operand.vmem [shape: bf16[16,16], index: 1, kind: input, shape index: {}]   ;;  %s787_s0 = inlined_call_operand.vmem [shape: bf16[16,32], index: 0, kind: input, shape index: {}]   ;;  %s788_s5 = inlined_call_operand.vmem [shape: bf16[64,32], index: 5, kind: input, shape index: {}]   ;;  %s789_s9 = inlined_call_operand.vmem [shape: bf16[64,16], index: 9, kind: input, shape index: {}]   ;;  %s790_s4 = inlined_call_operand.vmem [shape: f32[1,64], index: 4, kind: input, shape index: {}]   ;;  %s791_s6 = inlined_call_operand.vmem [shape: f32[1,32], index: 6, kind: input, shape index: {}]   ;;  %s792_s10 = inlined_call_operand.vmem [shape: f32[1,16], index: 10, kind: input, shape index: {}]   ;;  %s793_s7 = inlined_call_operand.vmem [shape: f32[1,32], index: 7, kind: input, shape index: {}]   ;;  %s794_s8 = inlined_call_operand.vmem [shape: f32[1,32], index: 8, kind: input, shape index: {}]   ;;  %s795_s13 = inlined_call_operand.vmem [shape: f32[16,32], index: 13, kind: output, shape index: {0}]   ;;  %s796_s11 = inlined_call_operand.vmem [shape: f32[1,16], index: 11, kind: input, shape index: {}]   ;;  %s797_s12 = inlined_call_operand.vmem [shape: f32[1,16], index: 12, kind: input, shape index: {}]   ;;  %s798_s14 = inlined_call_operand.vmem [shape: f32[16,16], index: 14, kind: output, shape index: {1}]  }
   0x1   :  { %516 = vmatprep.subr.bf16.mxu0 %v583_v0  ;;  %522 = vmatprep.subr.bf16.mxu1 %v583_v0  ;;  %v556_v1 = vld [vmem:[%s784_s3] sm:$0xff]   ;;  %v557_v2 = vld [vmem:[%s785_s2 + $0x8] sm:$0xff]   ;;  %v561_v6 = vld [vmem:[%s788_s5 + $0x18] sm:$0xff]   ;;  %vm234_vm3 = vcmask 523264  }
   0x2   :  { %518 = vmatprep.mubr.msk.bf16.mxu0 %vm584_vm0, %v583_v0  ;;  %526 = vmatprep.mubr.msk.bf16.mxu1 %vm584_vm0, %v583_v0  ;;  %v671_v3 = vld [vmem:[%s786_s1] sm:$0xff]   ;;  %v562_v7 = vld [vmem:[%s789_s9 + $0x18] sm:$0xff]   ;;  %v563_v8 = vld [vmem:[%s788_s5 + $0x10] sm:$0xff]  }
   0x3   :  { %517 = vmatpush3.bf16.msra.mxu0 %v556_v1  ;;  %523 = vmatpush3.bf16.msra.mxu1 %v557_v2  ;;  %v559_v4 = vld [vmem:[%s785_s2] sm:$0xff]   ;;  %v564_v9 = vld [vmem:[%s789_s9 + $0x10] sm:$0xff]   ;;  %v565_v10 = vld [vmem:[%s788_s5 + $0x8] sm:$0xff]   ;;  %v414_v41 = vunpack.c.l.bf16 %v671_v3  ;;  %v415_v51 = vunpack.c.h.bf16 %v671_v3 }
   0x4   :  { %v679_v5 = vld [vmem:[%s787_s0] sm:$0xff]   ;;  %530 = vmatprep.subr.bf16.mxu0 %v583_v0  ;;  %524 = vmatprep.subr.bf16.mxu1 %v583_v0  ;;  %v566_v11 = vld [vmem:[%s789_s9 + $0x8] sm:$0xff]  }
   0x5   :  { %v567_v12 = vld [vmem:[%s788_s5] sm:$0xff]   ;;  %v279_v40 = vunpack.c.l.bf16 %v679_v5  ;;  %v280_v50 = vunpack.c.h.bf16 %v679_v5 }
   0x6   :  { %519 = vmatmul.mubr.msk.bf16.vlgmr.msra.gmra.mxu0 %vm68_vm1, %v671_v3  ;;  %v568_v13 = vld [vmem:[%s789_s9] sm:$0xff]  }
   0x7   :  { %538 = vmatprep.mubr.msk.bf16.mxu0 %vm584_vm0, %v583_v0  ;;  %525 = vmatpush3.bf16.msra.mxu1 %v559_v4  ;;  %v484_v18 = vld [vmem:[%s790_s4] ss:$0 sm:$0xff] }
   0x8   :  { %542 = vmatprep.subr.bf16.mxu1 %v583_v0  ;;  %531 = vmatpush3.bf16.msra.mxu0 %v561_v6  ;;  %v485_v38 = vld [vmem:[%s791_s6] ss:$0 sm:$0xff] }
   0x9   :  { %532 = vmatprep.subr.bf16.mxu0 %v583_v0  ;;  %v493_v39 = vld [vmem:[%s792_s10] ss:$0 sm:$0xff] }
   0xa   :  { %527 = vmatmul.mubr.msk.bf16.vlgmr.msra.gmra.mxu1 %vm130_vm2, %v679_v5 }
   0xb   :  { %550 = vmatprep.mubr.msk.bf16.mxu1 %vm584_vm0, %v583_v0  ;;  %543 = vmatpush3.bf16.msra.mxu1 %v562_v7 }
   0xc   :  { %544 = vmatprep.subr.bf16.mxu1 %v583_v0  ;;  %533 = vmatpush3.bf16.msra.mxu0 %v563_v8 }
   0xd   :  { %534 = vmatprep.subr.bf16.mxu0 %v583_v0 }
   0xf   :  { %545 = vmatpush3.bf16.msra.mxu1 %v564_v9 }
  0x10   :  { %546 = vmatprep.subr.bf16.mxu1 %v583_v0  ;;  %535 = vmatpush3.bf16.msra.mxu0 %v565_v10 }
  0x11   :  { %536 = vmatprep.subr.bf16.mxu0 %v583_v0 }
  0x13   :  { %547 = vmatpush3.bf16.msra.mxu1 %v566_v11 }
  0x14   :  { %548 = vmatprep.subr.bf16.mxu1 %v583_v0  ;;  %537 = vmatpush3.bf16.msra.mxu0 %v567_v12 }
  0x17   :  { %549 = vmatpush3.bf16.msra.mxu1 %v568_v13 }
  0xc6   :  { %v106_v14 = vpop.f32.mrf.mxu0 }
  0xc8   :  { %v520_v15 = vpop.f32.mrf.mxu0 }
  0xca   :  { %v109_v16 = vpop.f32.mrf.mxu0  ;;  %v168_v17 = vpop.f32.mrf.mxu1 }
  0xcb   :  { %v169_v19 = vadd.f32 %v168_v17, %v106_v14 }
  0xcc   :  { %v521_v20 = vpop.f32.mrf.mxu0  ;;  %v528_v21 = vpop.f32.mrf.mxu1 }
  0xcd   :  { %v182_v22 = vadd.f32 %v484_v18, %v169_v19 }
  0xce   :  { %v171_v23 = vpop.f32.mrf.mxu1 }
  0xcf   :  { %v186_v24 = vmul.f32 0.70710677, %v182_v22  ;;  %v172_v25 = vadd.f32 %v171_v23, %v109_v16  ;;  %v184_v32 = vmul.f32 0.5, %v182_v22 }
  0xd0   :  { %v529_v26 = vpop.f32.mrf.mxu1 }
  0xd1   :  { %571 = verf.f32 %v186_v24  ;;  %v183_v27 = vadd.f32 %v484_v18, %v172_v25 }
  0xd3   :  { %v187_v28 = vmul.f32 0.70710677, %v183_v27  ;;  %v185_v33 = vmul.f32 0.5, %v183_v27 }
  0xd5   :  { %573 = verf.f32 %v187_v28 }
  0xde   :  { %v572_v29 = vpop.eup %571 }
  0xdf   :  { %v190_v30 = vadd.f32 1.0, %v572_v29 }
  0xe1   :  { %v192_v35 = vmul.f32 %v190_v30, %v184_v32 }
  0xe2   :  { %v574_v31 = vpop.eup %573 }
  0xe3   :  { %v191_v34 = vadd.f32 1.0, %v574_v31 }
  0xe5   :  { %v193_v36 = vmul.f32 %v191_v34, %v185_v33 }
  0xe7   :  { %v194_v37 = vpack.c.bf16 %v193_v36, %v192_v35 }
  0xe9   :  { %539 = vmatmul.mubr.msk.bf16.vlgmr.msra.gmra.mxu0 %vm234_vm3, %v194_v37  ;;  %551 = vmatmul.mubr.msk.bf16.vlgmr.msra.gmra.mxu1 %vm234_vm3, %v194_v37 }
 0x1a9   :  { %v272_v42 = vpop.f32.mrf.mxu0  ;;  %v407_v43 = vpop.f32.mrf.mxu1 }
 0x1aa   :  { %v273_v44 = vadd.f32 %v485_v38, %v272_v42  ;;  %v408_v45 = vadd.f32 %v493_v39, %v407_v43 }
 0x1ab   :  { %v540_v46 = vpop.f32.mrf.mxu0  ;;  %v552_v47 = vpop.f32.mrf.mxu1 }
 0x1ac   :  { %v722_v48 = vadd.f32 %v279_v40, %v273_v44  ;;  %v724_v49 = vadd.f32 %v414_v41, %v408_v45  ;;  %v492_v40 = vld [vmem:[%s794_s8] ss:$0 sm:$0xff] }
 0x1ad   :  { %v275_v52 = vpop.f32.mrf.mxu0  ;;  %v410_v53 = vpop.f32.mrf.mxu1 }
 0x1ae   :  { %v276_v54 = vadd.f32 %v485_v38, %v275_v52  ;;  %v411_v55 = vadd.f32 %v493_v39, %v410_v53  ;;  %v285_v56 = vsel %vm130_vm2, %v722_v48, 0.0  ;;  %v420_v57 = vsel %vm68_vm1, %v724_v49, 0.0  ;;  %v491_v38 = vld [vmem:[%s793_s7] ss:$0 sm:$0xff] }
 0x1af   :  { %286 = vadd.xlane.f32.xlu0 %v285_v56  ;;  %v541_v58 = vpop.f32.mrf.mxu0  ;;  %421 = vadd.xlane.f32.xlu1 %v420_v57  ;;  %v553_v59 = vpop.f32.mrf.mxu1  ;;  %v294_v60 = vmul.f32 %v722_v48, %v722_v48  ;;  %v429_v4 = vmul.f32 %v724_v49, %v724_v49 }
 0x1b0   :  { %v734_v61 = vadd.f32 %v280_v50, %v276_v54  ;;  %v736_v62 = vadd.f32 %v415_v51, %v411_v55  ;;  %v499_v50 = vld [vmem:[%s796_s11] ss:$0 sm:$0xff] }
 0x1b1   :  { %v296_v63 = vsel %vm130_vm2, %v294_v60, 0.0  ;;  %v431_v6 = vsel %vm68_vm1, %v429_v4, 0.0 }
 0x1b2   :  { %v423_v0 = vsel %vm68_vm1, %v736_v62, 0.0  ;;  %v295_v1 = vmul.f32 %v734_v61, %v734_v61  ;;  %v288_v2 = vsel %vm130_vm2, %v734_v61, 0.0  ;;  %v430_v5 = vmul.f32 %v736_v62, %v736_v62 }
 0x1b3   :  { %297 = vadd.xlane.f32.xlu0 %v296_v63  ;;  %424 = vadd.xlane.f32.xlu1 %v423_v0 }
 0x1b4   :  { %v299_v3 = vsel %vm130_vm2, %v295_v1, 0.0  ;;  %v434_v7 = vsel %vm68_vm1, %v430_v5, 0.0 }
 0x1b7   :  { %289 = vadd.xlane.f32.xlu0 %v288_v2  ;;  %300 = vadd.xlane.f32.xlu1 %v299_v3 }
 0x1bb   :  { %432 = vadd.xlane.f32.xlu0 %v431_v6  ;;  %435 = vadd.xlane.f32.xlu1 %v434_v7 }
 0x238   :  { %v287_v8 = vpop.xlane.xlu0 %286  ;;  %v422_v9 = vpop.xlane.xlu1 %421 }
 0x239   :  { %v292_v10 = vmul.f32 0.03125, %v287_v8  ;;  %v427_v16 = vmul.f32 0.0625, %v422_v9 }
 0x23b   :  { %v304_v13 = vmul.f32 %v292_v10, %v292_v10  ;;  %v439_v24 = vmul.f32 %v427_v16, %v427_v16  ;;  %v308_v36 = vsub.f32 %v722_v48, %v292_v10  ;;  %v443_v45 = vsub.f32 %v724_v49, %v427_v16  ;;  %v500_v49 = vld [vmem:[%s797_s12] ss:$0 sm:$0xff] }
 0x23c   :  { %v298_v11 = vpop.xlane.xlu0 %297  ;;  %v425_v12 = vpop.xlane.xlu1 %424 }
 0x23d   :  { %v302_v14 = vmul.f32 0.03125, %v298_v11  ;;  %v428_v20 = vmul.f32 0.0625, %v425_v12 }
 0x23f   :  { %v306_v15 = vsub.f32 %v302_v14, %v304_v13  ;;  %v440_v27 = vmul.f32 %v428_v20, %v428_v20  ;;  %v444_v48 = vsub.f32 %v736_v62, %v428_v20 }
 0x240   :  { %v290_v17 = vpop.xlane.xlu0 %289  ;;  %v301_v18 = vpop.xlane.xlu1 %300 }
 0x241   :  { %v310_v19 = vadd.f32 1e-05, %v306_v15  ;;  %v293_v21 = vmul.f32 0.03125, %v290_v17  ;;  %v303_v23 = vmul.f32 0.03125, %v301_v18 }
 0x243   :  { %575 = vrsqrt.f32 %v310_v19  ;;  %v305_v22 = vmul.f32 %v293_v21, %v293_v21  ;;  %v309_v43 = vsub.f32 %v734_v61, %v293_v21 }
 0x244   :  { %v433_v25 = vpop.xlane.xlu0 %432  ;;  %v436_v26 = vpop.xlane.xlu1 %435 }
 0x245   :  { %v307_v28 = vsub.f32 %v303_v23, %v305_v22  ;;  %v437_v29 = vmul.f32 0.0625, %v433_v25  ;;  %v438_v30 = vmul.f32 0.0625, %v436_v26 }
 0x247   :  { %v311_v31 = vadd.f32 1e-05, %v307_v28  ;;  %v441_v32 = vsub.f32 %v437_v29, %v439_v24  ;;  %v442_v33 = vsub.f32 %v438_v30, %v440_v27 }
 0x249   :  { %577 = vrsqrt.f32 %v311_v31  ;;  %v445_v34 = vadd.f32 1e-05, %v441_v32  ;;  %v446_v35 = vadd.f32 1e-05, %v442_v33 }
 0x24b   :  { %579 = vrsqrt.f32 %v445_v34 }
 0x24c   :  { %581 = vrsqrt.f32 %v446_v35 }
 0x250   :  { %v576_v37 = vpop.eup %575 }
 0x251   :  { %v314_v39 = vmul.f32 %v576_v37, %v308_v36 }
 0x253   :  { %v322_v41 = vmul.f32 %v491_v38, %v314_v39 }
 0x255   :  { %v330_v42 = vadd.f32 %v492_v40, %v322_v41 }
 0x256   :  { %v578_v44 = vpop.eup %577 }
 0x257   :  { %332 = vst.msk [vmem:[%s795_s13] sm:$0xff] %vm130_vm2, %v330_v42  ;;  %v315_v46 = vmul.f32 %v578_v44, %v309_v43 }
 0x258   :  { %v580_v47 = vpop.eup %579 }
 0x259   :  { %v582_v51 = vpop.eup %581  ;;  %v323_v52 = vmul.f32 %v491_v38, %v315_v46  ;;  %v449_v53 = vmul.f32 %v580_v47, %v443_v45 }
 0x25a   :  { %v450_v54 = vmul.f32 %v582_v51, %v444_v48 }
 0x25b   :  { %v331_v55 = vadd.f32 %v492_v40, %v323_v52  ;;  %v457_v56 = vmul.f32 %v499_v50, %v449_v53 }
 0x25c   :  { %v458_v57 = vmul.f32 %v499_v50, %v450_v54 }
 0x25d   :  { %333 = vst.msk [vmem:[%s795_s13 + $0x8] sm:$0xff] %vm130_vm2, %v331_v55  ;;  %v465_v58 = vadd.f32 %v500_v49, %v457_v56 }
 0x25e   :  { %v466_v59 = vadd.f32 %v500_v49, %v458_v57 }
 0x25f   :  { %467 = vst.msk [vmem:[%s798_s14] sm:$0xff] %vm68_vm1, %v465_v58 }
 0x260   :  { %468 = vst.msk [vmem:[%s798_s14 + $0x8] sm:$0xff] %vm68_vm1, %v466_v59 }

// kernel: run.11
= control target key start
LH: loop header
LB: loop body
LE: loop exit
PB: predicated region body
PF: predicated region fallthrough
CT: control target
= control target key end

     0   :  { %20 = vsyncpa [#allocation3], 0  ;;  %v657_v1 = vmov 0.0   ;;  %vm658_vm0 = vmmov 0   ;;  %vm70_vm1 = vcmask 130048   ;;  %vm132_vm2 = vcmask 261120   ;;  %s850_s0 = inlined_call_operand.vmem [shape: bf16[16,32], index: 0, kind: input, shape index: {}]   ;;  %s851_s1 = inlined_call_operand.vmem [shape: bf16[16,16], index: 1, kind: input, shape index: {}]   ;;  %s852_s2 = inlined_call_operand.vmem [shape: bf16[32,64], index: 2, kind: input, shape index: {}]   ;;  %s853_s3 = inlined_call_operand.vmem [shape: bf16[16,64], index: 3, kind: input, shape index: {}]   ;;  %s854_s4 = inlined_call_operand.vmem [shape: f32[1,64], index: 4, kind: input, shape index: {}]   ;;  %s855_s5 = inlined_call_operand.vmem [shape: bf16[64,32], index: 5, kind: input, shape index: {}]   ;;  %s856_s6 = inlined_call_operand.vmem [shape: f32[1,32], index: 6, kind: input, shape index: {}]   ;;  %s857_s7 = inlined_call_operand.vmem [shape: f32[1,32], index: 7, kind: input, shape index: {}]   ;;  %s858_s8 = inlined_call_operand.vmem [shape: f32[1,32], index: 8, kind: input, shape index: {}]   ;;  %s859_s9 = inlined_call_operand.vmem [shape: bf16[64,16], index: 9, kind: input, shape index: {}]   ;;  %s860_s10 = inlined_call_operand.vmem [shape: f32[1,16], index: 10, kind: input, shape index: {}]   ;;  %s861_s11 = inlined_call_operand.vmem [shape: f32[1,16], index: 11, kind: input, shape index: {}]   ;;  %s862_s12 = inlined_call_operand.vmem [shape: f32[1,16], index: 12, kind: input, shape index: {}]   ;;  %s863_s13 = inlined_call_operand.hbm [shape: f32[16,32], index: 13, kind: output, shape index: {0}]   ;;  %s864_s14 = inlined_call_operand.hbm [shape: f32[16,16], index: 14, kind: output, shape index: {1}]  }
   0x1   :  { %v586_v0 = vld [vmem:[%s853_s3] sm:$0xff]   ;;  %542 = vmatprep.subr.bf16.mxu0 %v657_v1  ;;  %548 = vmatprep.subr.bf16.mxu1 %v657_v1  ;;  %v587_v2 = vld [vmem:[%s852_s2 + $0x8] sm:$0xff]  }
   0x2   :  { %543 = vmatpush3.bf16.msra.mxu0 %v586_v0  ;;  %544 = vmatprep.mubr.msk.bf16.mxu0 %vm658_vm0, %v657_v1  ;;  %v748_v3 = vld [vmem:[%s851_s1] sm:$0xff]  }
   0x3   :  { %549 = vmatpush3.bf16.msra.mxu1 %v587_v2  ;;  %v589_v4 = vld [vmem:[%s852_s2] sm:$0xff]   ;;  %552 = vmatprep.mubr.msk.bf16.mxu1 %vm658_vm0, %v657_v1 }
   0x4   :  { %v757_v5 = vld [vmem:[%s850_s0] sm:$0xff]   ;;  %550 = vmatprep.subr.bf16.mxu1 %v657_v1  ;;  %556 = vmatprep.subr.bf16.mxu0 %v657_v1 }
   0x5   :  { %545 = vmatmul.mubr.msk.bf16.vlgmr.msra.gmra.mxu0 %vm70_vm1, %v748_v3 }
   0x6   :  { %564 = vmatprep.mubr.msk.bf16.mxu0 %vm658_vm0, %v657_v1 }
   0x7   :  { %551 = vmatpush3.bf16.msra.mxu1 %v589_v4 }
   0x8   :  { %568 = vmatprep.subr.bf16.mxu1 %v657_v1 }
   0x9   :  { %21 = vsyncpa [#allocation5], 0  ;;  %v591_v6 = vld [vmem:[%s855_s5 + $0x18] sm:$0xff]   ;;  %v593_v8 = vld [vmem:[%s855_s5 + $0x10] sm:$0xff]   ;;  %vm236_vm3 = vcmask 523264   ;;  %v281_v40 = vunpack.c.l.bf16 %v757_v5  ;;  %v416_v41 = vunpack.c.l.bf16 %v748_v3  ;;  %v282_v50 = vunpack.c.h.bf16 %v757_v5  ;;  %s659_s2 = smov [#allocation2]  }
   0xa   :  { %553 = vmatmul.mubr.msk.bf16.vlgmr.msra.gmra.mxu1 %vm132_vm2, %v757_v5  ;;  %v592_v7 = vld [vmem:[%s859_s9 + $0x18] sm:$0xff]   ;;  %557 = vmatpush3.bf16.msra.mxu0 %v591_v6  ;;  %v594_v9 = vld [vmem:[%s859_s9 + $0x10] sm:$0xff]   ;;  %v595_v10 = vld [vmem:[%s855_s5 + $0x8] sm:$0xff]   ;;  %v417_v51 = vunpack.c.h.bf16 %v748_v3  ;;  %s476_s0 = sshll.u32 %s659_s2, 4  ;;  %s660_s24 = smov [#allocation4]   ;;  %s477_s0 = int_to_ptr.vmem [resolvable:$true] %s476_s0 }
   0xb   :  { %576 = vmatprep.mubr.msk.bf16.mxu1 %vm658_vm0, %v657_v1  ;;  %569 = vmatpush3.bf16.msra.mxu1 %v592_v7  ;;  %v596_v11 = vld [vmem:[%s859_s9 + $0x8] sm:$0xff]   ;;  %v597_v12 = vld [vmem:[%s855_s5] sm:$0xff]   ;;  %s488_s25 = sshll.u32 %s660_s24, 4  ;;  %s613_s26 = scalar_lea.vmem %s477_s0, 256  ;;  %s489_s25 = int_to_ptr.vmem [resolvable:$true] %s488_s25 }
   0xc   :  { %558 = vmatprep.subr.bf16.mxu0 %v657_v1  ;;  %570 = vmatprep.subr.bf16.mxu1 %v657_v1  ;;  %v598_v13 = vld [vmem:[%s859_s9] sm:$0xff]   ;;  %p614_p0 = scmp.ne.s32.totalorder %s477_s0, %s613_s26  ;;  %p618_p1 = scmp.lt.s32.totalorder %s477_s0, %s477_s0 }
   0xd   :  { %v510_v18 = vld [vmem:[%s854_s4] ss:$0 sm:$0xff]  ;;  %p619_p2 = scmp.lt.s32.totalorder %s613_s26, %s613_s26 }
   0xe   :  { %559 = vmatpush3.bf16.msra.mxu0 %v593_v8  ;;  %v511_v38 = vld [vmem:[%s856_s6] ss:$0 sm:$0xff] }
   0xf   :  { %571 = vmatpush3.bf16.msra.mxu1 %v594_v9  ;;  %560 = vmatprep.subr.bf16.mxu0 %v657_v1  ;;  %v519_v39 = vld [vmem:[%s860_s10] ss:$0 sm:$0xff]  ;;  %p620_p3 = por %p619_p2, %p618_p1 }
  0x10   :  { %572 = vmatprep.subr.bf16.mxu1 %v657_v1 }
  0x11   :  { %p621_p4 = pnand %p620_p3, %p614_p0 }
  0x12   :  { %561 = vmatpush3.bf16.msra.mxu0 %v595_v10 }
  0x13   :  { %573 = vmatpush3.bf16.msra.mxu1 %v596_v11  ;;  %562 = vmatprep.subr.bf16.mxu0 %v657_v1 }
  0x14   :  { %574 = vmatprep.subr.bf16.mxu1 %v657_v1 }
  0x16   :  { %563 = vmatpush3.bf16.msra.mxu0 %v597_v12 }
  0x17   :  { %575 = vmatpush3.bf16.msra.mxu1 %v598_v13 }
  0xc5   :  { %v108_v14 = vpop.f32.mrf.mxu0 }
  0xc7   :  { %v546_v15 = vpop.f32.mrf.mxu0 }
  0xc9   :  { %v111_v16 = vpop.f32.mrf.mxu0 }
  0xca   :  { %v170_v17 = vpop.f32.mrf.mxu1 }
  0xcb   :  { %v171_v19 = vadd.f32 %v170_v17, %v108_v14  ;;  %v547_v20 = vpop.f32.mrf.mxu0 }
  0xcc   :  { %v554_v21 = vpop.f32.mrf.mxu1 }
  0xcd   :  { %v184_v22 = vadd.f32 %v510_v18, %v171_v19 }
  0xce   :  { %v173_v23 = vpop.f32.mrf.mxu1 }
  0xcf   :  { %v188_v24 = vmul.f32 0.70710677, %v184_v22  ;;  %v174_v25 = vadd.f32 %v173_v23, %v111_v16  ;;  %v186_v32 = vmul.f32 0.5, %v184_v22 }
  0xd0   :  { %v555_v26 = vpop.f32.mrf.mxu1 }
  0xd1   :  { %601 = verf.f32 %v188_v24  ;;  %v185_v27 = vadd.f32 %v510_v18, %v174_v25 }
  0xd3   :  { %v189_v28 = vmul.f32 0.70710677, %v185_v27  ;;  %v187_v33 = vmul.f32 0.5, %v185_v27 }
  0xd5   :  { %603 = verf.f32 %v189_v28 }
  0xde   :  { %v602_v29 = vpop.eup %601 }
  0xdf   :  { %v192_v30 = vadd.f32 1.0, %v602_v29 }
  0xe1   :  { %v194_v35 = vmul.f32 %v192_v30, %v186_v32 }
  0xe2   :  { %v604_v31 = vpop.eup %603 }
  0xe3   :  { %v193_v34 = vadd.f32 1.0, %v604_v31 }
  0xe5   :  { %v195_v36 = vmul.f32 %v193_v34, %v187_v33 }
  0xe7   :  { %v196_v37 = vpack.c.bf16 %v195_v36, %v194_v35 }
  0xe9   :  { %565 = vmatmul.mubr.msk.bf16.vlgmr.msra.gmra.mxu0 %vm236_vm3, %v196_v37  ;;  %577 = vmatmul.mubr.msk.bf16.vlgmr.msra.gmra.mxu1 %vm236_vm3, %v196_v37 }
 0x1a9   :  { %v274_v42 = vpop.f32.mrf.mxu0  ;;  %v409_v43 = vpop.f32.mrf.mxu1 }
 0x1aa   :  { %v275_v44 = vadd.f32 %v511_v38, %v274_v42  ;;  %v410_v45 = vadd.f32 %v519_v39, %v409_v43 }
 0x1ab   :  { %v566_v46 = vpop.f32.mrf.mxu0  ;;  %v578_v47 = vpop.f32.mrf.mxu1 }
 0x1ac   :  { %v800_v48 = vadd.f32 %v281_v40, %v275_v44  ;;  %v802_v49 = vadd.f32 %v416_v41, %v410_v45  ;;  %v518_v40 = vld [vmem:[%s858_s8] ss:$0 sm:$0xff] }
 0x1ad   :  { %v277_v52 = vpop.f32.mrf.mxu0  ;;  %v412_v53 = vpop.f32.mrf.mxu1 }
 0x1ae   :  { %v278_v54 = vadd.f32 %v511_v38, %v277_v52  ;;  %v413_v55 = vadd.f32 %v519_v39, %v412_v53  ;;  %v287_v56 = vsel %vm132_vm2, %v800_v48, 0.0  ;;  %v422_v57 = vsel %vm70_vm1, %v802_v49, 0.0  ;;  %v517_v38 = vld [vmem:[%s857_s7] ss:$0 sm:$0xff] }
 0x1af   :  { %288 = vadd.xlane.f32.xlu0 %v287_v56  ;;  %v567_v58 = vpop.f32.mrf.mxu0  ;;  %423 = vadd.xlane.f32.xlu1 %v422_v57  ;;  %v579_v59 = vpop.f32.mrf.mxu1  ;;  %v296_v60 = vmul.f32 %v800_v48, %v800_v48  ;;  %v431_v4 = vmul.f32 %v802_v49, %v802_v49 }
 0x1b0   :  { %v284_v61 = vadd.f32 %v282_v50, %v278_v54  ;;  %v812_v62 = vadd.f32 %v417_v51, %v413_v55  ;;  %v525_v50 = vld [vmem:[%s861_s11] ss:$0 sm:$0xff] }
 0x1b1   :  { %v298_v63 = vsel %vm132_vm2, %v296_v60, 0.0  ;;  %v433_v6 = vsel %vm70_vm1, %v431_v4, 0.0  ;;  %v526_v54 = vld [vmem:[%s862_s12] ss:$0 sm:$0xff] }
 0x1b2   :  { %v425_v0 = vsel %vm70_vm1, %v812_v62, 0.0  ;;  %v297_v1 = vmul.f32 %v284_v61, %v284_v61  ;;  %v290_v2 = vsel %vm132_vm2, %v284_v61, 0.0  ;;  %v432_v5 = vmul.f32 %v812_v62, %v812_v62 }
 0x1b3   :  { %299 = vadd.xlane.f32.xlu0 %v298_v63  ;;  %426 = vadd.xlane.f32.xlu1 %v425_v0 }
 0x1b4   :  { %v301_v3 = vsel %vm132_vm2, %v297_v1, 0.0  ;;  %v436_v7 = vsel %vm70_vm1, %v432_v5, 0.0 }
 0x1b7   :  { %291 = vadd.xlane.f32.xlu0 %v290_v2  ;;  %302 = vadd.xlane.f32.xlu1 %v301_v3 }
 0x1bb   :  { %434 = vadd.xlane.f32.xlu0 %v433_v6  ;;  %437 = vadd.xlane.f32.xlu1 %v436_v7 }
 0x238   :  { %v289_v8 = vpop.xlane.xlu0 %288  ;;  %v424_v9 = vpop.xlane.xlu1 %423 }
 0x239   :  { %v294_v10 = vmul.f32 0.03125, %v289_v8  ;;  %v429_v16 = vmul.f32 0.0625, %v424_v9 }
 0x23b   :  { %v306_v13 = vmul.f32 %v294_v10, %v294_v10  ;;  %v441_v24 = vmul.f32 %v429_v16, %v429_v16  ;;  %v310_v36 = vsub.f32 %v800_v48, %v294_v10  ;;  %v445_v45 = vsub.f32 %v802_v49, %v429_v16 }
 0x23c   :  { %v300_v11 = vpop.xlane.xlu0 %299  ;;  %v427_v12 = vpop.xlane.xlu1 %426 }
 0x23d   :  { %v304_v14 = vmul.f32 0.03125, %v300_v11  ;;  %v430_v20 = vmul.f32 0.0625, %v427_v12 }
 0x23f   :  { %v308_v15 = vsub.f32 %v304_v14, %v306_v13  ;;  %v442_v27 = vmul.f32 %v430_v20, %v430_v20  ;;  %v446_v48 = vsub.f32 %v812_v62, %v430_v20 }
 0x240   :  { %v292_v17 = vpop.xlane.xlu0 %291  ;;  %v303_v18 = vpop.xlane.xlu1 %302 }
 0x241   :  { %v312_v19 = vadd.f32 1e-05, %v308_v15  ;;  %v295_v21 = vmul.f32 0.03125, %v292_v17  ;;  %v305_v23 = vmul.f32 0.03125, %v303_v18 }
 0x243   :  { %605 = vrsqrt.f32 %v312_v19  ;;  %v307_v22 = vmul.f32 %v295_v21, %v295_v21  ;;  %v311_v42 = vsub.f32 %v284_v61, %v295_v21 }
 0x244   :  { %v435_v25 = vpop.xlane.xlu0 %434  ;;  %v438_v26 = vpop.xlane.xlu1 %437 }
 0x245   :  { %v309_v28 = vsub.f32 %v305_v23, %v307_v22  ;;  %v439_v29 = vmul.f32 0.0625, %v435_v25  ;;  %v440_v30 = vmul.f32 0.0625, %v438_v26 }
 0x247   :  { %v313_v31 = vadd.f32 1e-05, %v309_v28  ;;  %v443_v32 = vsub.f32 %v439_v29, %v441_v24  ;;  %v444_v33 = vsub.f32 %v440_v30, %v442_v27 }
 0x249   :  { %607 = vrsqrt.f32 %v313_v31  ;;  %v447_v34 = vadd.f32 1e-05, %v443_v32  ;;  %v448_v35 = vadd.f32 1e-05, %v444_v33 }
 0x24b   :  { %609 = vrsqrt.f32 %v447_v34 }
 0x24c   :  { %611 = vrsqrt.f32 %v448_v35 }
 0x250   :  { %v606_v37 = vpop.eup %605 }
 0x251   :  { %v316_v39 = vmul.f32 %v606_v37, %v310_v36 }
 0x253   :  { %v324_v41 = vmul.f32 %v517_v38, %v316_v39 }
 0x255   :  { %v332_v43 = vadd.f32 %v518_v40, %v324_v41 }
 0x256   :  { %v608_v44 = vpop.eup %607 }
 0x257   :  { %v317_v46 = vmul.f32 %v608_v44, %v311_v42  ;;  %334 = vst.msk [vmem:[#allocation2] sm:$0xff] %vm132_vm2, %v332_v43 }
 0x258   :  { %v610_v47 = vpop.eup %609 }
 0x259   :  { %v612_v51 = vpop.eup %611  ;;  %v325_v52 = vmul.f32 %v517_v38, %v317_v46  ;;  %v451_v53 = vmul.f32 %v610_v47, %v445_v45 }
 0x25a   :  { %v452_v49 = vmul.f32 %v612_v51, %v446_v48 }
 0x25b   :  { %v333_v55 = vadd.f32 %v518_v40, %v325_v52  ;;  %v459_v56 = vmul.f32 %v525_v50, %v451_v53 }
 0x25c   :  { %v460_v57 = vmul.f32 %v525_v50, %v452_v49 }
 0x25d   :  { %335 = vst.msk [vmem:[#allocation2 + $0x8] sm:$0xff] %vm132_vm2, %v333_v55  ;;  %v467_v58 = vadd.f32 %v526_v54, %v459_v56 }
 0x25e   :  { %624 = shalt.err (!%p621_p4)
}
 0x25f   :  { %s661_s11 = smov 128   ;;  %s662_s12 = smov 8   ;;  %v468_v59 = vadd.f32 %v526_v54, %v460_v57  ;;  %469 = vst.msk [vmem:[#allocation4] sm:$0xff] %vm70_vm1, %v467_v58 }
 0x260   :  { %482 = dma.vmem_to_hbm [thread:$0]  %s477_s0, 256, %s863_s13, [#allocation3], %s661_s11, %s661_s11, %s662_s12  }
 0x261   :  { %470 = vst.msk [vmem:[#allocation4 + $0x8] sm:$0xff] %vm70_vm1, %v468_v59  ;;  %s633_s29 = scalar_lea.vmem %s489_s25, 256  ;;  %p638_p6 = scmp.lt.s32.totalorder %s489_s25, %s489_s25 }
 0x262   :  { %p634_p5 = scmp.ne.s32.totalorder %s489_s25, %s633_s29  ;;  %p639_p7 = scmp.lt.s32.totalorder %s633_s29, %s633_s29 }
 0x264   :  { %p640_p8 = por %p639_p7, %p638_p6 }
 0x266   :  { %p641_p9 = pnand %p640_p8, %p634_p5 }
 0x268   :  { %644 = shalt.err (!%p641_p9)
}
 0x269   :  { %494 = dma.vmem_to_hbm [thread:$0]  %s489_s25, 256, %s864_s14, [#allocation5], %s661_s11, %s661_s11, %s662_s12  }
 0x26a   :  { %653 = dma.done.wait [#allocation3], 256  }
 0x26b   :  { %654 = vsyncadd [#allocation3], 4294967040 }
 0x26c   :  { %655 = dma.done.wait [#allocation5], 256  }
 0x26d   :  { %656 = vsyncadd [#allocation5], 4294967040 }
 0x26e   :  { %501 = vsyncpa [#allocation3], 1 }
 0x26f   :  { %502 = vsyncpa [#allocation5], 1 }

// kernel: run.6
= control target key start
LH: loop header
LB: loop body
LE: loop exit
PB: predicated region body
PF: predicated region fallthrough
CT: control target
= control target key end

     0   :  { %s2504_s29 = smov 0   ;;  %s2831_s0 = inlined_call_operand.vmem [shape: f32[2,8,32], index: 0, kind: input, shape index: {}]   ;;  %s2832_s1 = inlined_call_operand.vmem [shape: f32[2,1,8], index: 1, kind: input, shape index: {}]   ;;  %s2833_s2 = inlined_call_operand.vmem [shape: bf16[4,32,8], index: 2, kind: input, shape index: {}]   ;;  %s2834_s3 = inlined_call_operand.vmem [shape: f32[4,1,8], index: 3, kind: input, shape index: {}]   ;;  %s2835_s4 = inlined_call_operand.vmem [shape: bf16[4,32,8], index: 4, kind: input, shape index: {}]   ;;  %s2836_s5 = inlined_call_operand.vmem [shape: f32[4,1,8], index: 5, kind: input, shape index: {}]   ;;  %s2837_s6 = inlined_call_operand.vmem [shape: bf16[4,32,8], index: 6, kind: input, shape index: {}]   ;;  %s2838_s7 = inlined_call_operand.vmem [shape: f32[4,1,8], index: 7, kind: input, shape index: {}]   ;;  %s2839_s8 = inlined_call_operand.vmem [shape: bf16[4,8,32], index: 8, kind: input, shape index: {}]   ;;  %s2840_s9 = inlined_call_operand.vmem [shape: f32[1,32], index: 9, kind: input, shape index: {}]   ;;  %s2841_s10 = inlined_call_operand.vmem [shape: bf16[32,32], index: 10, kind: input, shape index: {}]   ;;  %s2842_s11 = inlined_call_operand.vmem [shape: f32[1,32], index: 11, kind: input, shape index: {}]   ;;  %s2843_s12 = inlined_call_operand.vmem [shape: f32[1,32], index: 12, kind: input, shape index: {}]   ;;  %s2844_s13 = inlined_call_operand.vmem [shape: f32[1,32], index: 13, kind: input, shape index: {}]   ;;  %s2845_s14 = inlined_call_operand.vmem [shape: bf16[2,8,32], index: 14, kind: output, shape index: {}]  }
   0x1 LB: > { %s2049_s30 = sadd.s32 4294967295, %s2425_s29   ;;  %p2053_p0 = scmp.ge.s32.totalorder %s2425_s29, 1  ;;  %s2425_s29 = sphi %s2504_s29, %s24_s29  }
   0x2   : > { %p419_p1 = scmp.lt.s32.totalorder %s2425_s29, 3 }
   0x4   : > { %p420_p2 = pnand %p2053_p0, %p419_p1 }
   0x5   : > { %p466_p3 = scmp.lt.s32.totalorder (!%p420_p2), %s2049_s30, 1 }
   0x6   : > { %423 = sbr.rel (%p420_p2) target bundleno = 1524 (0x5f4), region = 76 }
   0xb   : > { %v2375_v0 = vld [vmem:[%s2833_s2 + $0x8] sm:$0xff]   ;;  %v2427_v1 = vmov 0.0   ;;  %v2376_v2 = vld [vmem:[%s2833_s2 + $0x18] sm:$0xff]   ;;  %v2377_v3 = vld [vmem:[%s2833_s2] sm:$0xff]   ;;  %vm2428_vm0 = vmmov 0   ;;  %s2847_s30 = smov (!%p466_p3, %s2049_s30), 1 }
   0xc   : > { %2189 = vmatprep.subr.bf16.mxu0 %v2427_v1  ;;  %2197 = vmatprep.subr.bf16.mxu1 %v2427_v1  ;;  %v2378_v4 = vld [vmem:[%s2833_s2 + $0x10] sm:$0xff]   ;;  %s2054_s23 = sshll.u32 %s2847_s30, 3  ;;  %v2379_v5 = vld [vmem:[%s2833_s2 + $0x28] sm:$0xff]   ;;  %v2380_v6 = vld [vmem:[%s2833_s2 + $0x38] sm:$0xff]   ;;  %vm536_vm1 = vcmask 261120   ;;  %vm1255_vm2 = vcmask 64512   ;;  %s472_s19 = scalar_lea.vmem %s2832_s1, %s2847_s30 }
   0xd   : > { %2190 = vmatpush3.bf16.msra.mxu0 %v2375_v0  ;;  %2193 = vmatprep.mubr.msk.bf16.mxu0 %vm2428_vm0, %v2427_v1  ;;  %s469_s28 = scalar_lea.vmem %s2831_s0, %s2054_s23  ;;  %v2381_v9 = vld [vmem:[%s2833_s2 + $0x20] sm:$0xff]   ;;  %v2382_v10 = vld [vmem:[%s2833_s2 + $0x30] sm:$0xff]   ;;  %v2383_v11 = vld [vmem:[%s2835_s4 + $0x8] sm:$0xff]   ;;  %vm1495_vm3 = vcmask 1043456   ;;  %s2055_s16 = sshll.u32 %s2847_s30, 2  ;;  %vm1985_vm4 = vcmask 257024  }
   0xe   : > { %2198 = vmatpush3.bf16.msra.mxu1 %v2376_v2  ;;  %2191 = vmatprep.subr.bf16.mxu0 %v2427_v1  ;;  %v2545_v7 = vld [vmem:[%s469_s28] sm:$0xff]  ;;  %v2384_v12 = vld [vmem:[%s2835_s4 + $0x18] sm:$0xff]   ;;  %v2386_v14 = vld [vmem:[%s2835_s4 + $0x10] sm:$0xff]  }
   0xf   : > { %2199 = vmatprep.subr.bf16.mxu1 %v2427_v1  ;;  %2201 = vmatprep.mubr.msk.bf16.mxu1 %vm2428_vm0, %v2427_v1  ;;  %v2550_v8 = vpack.c.bf16 %v2545_v7, %v2545_v7  ;;  %v2385_v13 = vld [vmem:[%s2835_s4] sm:$0xff]   ;;  %v2387_v15 = vld [vmem:[%s2835_s4 + $0x28] sm:$0xff]   ;;  %v2388_v16 = vld [vmem:[%s2835_s4 + $0x38] sm:$0xff]  }
  0x10   : > { %v2389_v17 = vld [vmem:[%s2835_s4 + $0x20] sm:$0xff]   ;;  %v2390_v18 = vld [vmem:[%s2835_s4 + $0x30] sm:$0xff]   ;;  %v2391_v19 = vld [vmem:[%s2837_s6 + $0x8] sm:$0xff]  }
  0x11   : > { %2192 = vmatpush3.bf16.msra.mxu0 %v2377_v3  ;;  %v2392_v20 = vld [vmem:[%s2837_s6] sm:$0xff]   ;;  %v2393_v21 = vld [vmem:[%s2837_s6 + $0x18] sm:$0xff]   ;;  %v2394_v22 = vld [vmem:[%s2837_s6 + $0x10] sm:$0xff]  }
  0x12   : > { %2200 = vmatpush3.bf16.msra.mxu1 %v2378_v4  ;;  %2205 = vmatprep.subr.bf16.mxu0 %v2427_v1  ;;  %v2395_v23 = vld [vmem:[%s2837_s6 + $0x28] sm:$0xff]   ;;  %v2396_v24 = vld [vmem:[%s2837_s6 + $0x20] sm:$0xff]   ;;  %v2397_v25 = vld [vmem:[%s2837_s6 + $0x38] sm:$0xff]  }
  0x13   : > { %2213 = vmatprep.subr.bf16.mxu1 %v2427_v1  ;;  %v2398_v26 = vld [vmem:[%s2837_s6 + $0x30] sm:$0xff]   ;;  %v2072_v43 = vld [vmem:[%s2836_s5] ss:$0 sm:$0xff]  ;;  %v2073_v44 = vld [vmem:[%s2836_s5 + $0x1] ss:$0 sm:$0xff] }
  0x14   : > { %2194 = vmatmul.mubr.msk.bf16.vlgmr.msra.gmra.mxu0 %vm536_vm1, %v2550_v8  ;;  %v2056_v53 = vld [vmem:[%s2834_s3] ss:$0 sm:$0xff]  ;;  %v2057_v54 = vld [vmem:[%s2834_s3 + $0x1] ss:$0 sm:$0xff]  ;;  %v2074_v61 = vld [vmem:[%s2836_s5 + $0x2] ss:$0 sm:$0xff] }
  0x15   : > { %2202 = vmatmul.mubr.msk.bf16.vlgmr.msra.gmra.mxu1 %vm536_vm1, %v2550_v8  ;;  %2206 = vmatpush3.bf16.msra.mxu0 %v2379_v5  ;;  %v2075_v62 = vld [vmem:[%s2836_s5 + $0x3] ss:$0 sm:$0xff] }
  0x16   : > { %2214 = vmatpush3.bf16.msra.mxu1 %v2380_v6  ;;  %2207 = vmatprep.subr.bf16.mxu0 %v2427_v1 }
  0x17   : > { %2215 = vmatprep.subr.bf16.mxu1 %v2427_v1  ;;  %2209 = vmatprep.mubr.msk.bf16.mxu0 %vm2428_vm0, %v2427_v1 }
  0x18   : > { %2217 = vmatprep.mubr.msk.bf16.mxu1 %vm2428_vm0, %v2427_v1 }
  0x19   : > { %2208 = vmatpush3.bf16.msra.mxu0 %v2381_v9 }
  0x1a   : > { %2216 = vmatpush3.bf16.msra.mxu1 %v2382_v10  ;;  %2221 = vmatprep.subr.bf16.mxu0 %v2427_v1 }
  0x1b   : > { %2229 = vmatprep.subr.bf16.mxu1 %v2427_v1 }
  0x1c   : > { %2210 = vmatmul.mubr.msk.bf16.vlgmr.msra.gmra.mxu0 %vm536_vm1, %v2550_v8 }
  0x1d   : > { %2218 = vmatmul.mubr.msk.bf16.vlgmr.msra.gmra.mxu1 %vm536_vm1, %v2550_v8  ;;  %2222 = vmatpush3.bf16.msra.mxu0 %v2383_v11 }
  0x1e   : > { %2230 = vmatpush3.bf16.msra.mxu1 %v2384_v12  ;;  %2223 = vmatprep.subr.bf16.mxu0 %v2427_v1 }
  0x1f   : > { %2231 = vmatprep.subr.bf16.mxu1 %v2427_v1  ;;  %2225 = vmatprep.mubr.msk.bf16.mxu0 %vm2428_vm0, %v2427_v1 }
  0x20   : > { %2233 = vmatprep.mubr.msk.bf16.mxu1 %vm2428_vm0, %v2427_v1 }
  0x21   : > { %2224 = vmatpush3.bf16.msra.mxu0 %v2385_v13  ;;  %v2058_v13 = vld [vmem:[%s2834_s3 + $0x2] ss:$0 sm:$0xff] }
  0x22   : > { %2232 = vmatpush3.bf16.msra.mxu1 %v2386_v14  ;;  %2237 = vmatprep.subr.bf16.mxu0 %v2427_v1  ;;  %v2059_v14 = vld [vmem:[%s2834_s3 + $0x3] ss:$0 sm:$0xff] }
  0x23   : > { %2245 = vmatprep.subr.bf16.mxu1 %v2427_v1 }
  0x24   : > { %2226 = vmatmul.mubr.msk.bf16.vlgmr.msra.gmra.mxu0 %vm536_vm1, %v2550_v8 }
  0x25   : > { %2234 = vmatmul.mubr.msk.bf16.vlgmr.msra.gmra.mxu1 %vm536_vm1, %v2550_v8  ;;  %2238 = vmatpush3.bf16.msra.mxu0 %v2387_v15 }
  0x26   : > { %2246 = vmatpush3.bf16.msra.mxu1 %v2388_v16  ;;  %2239 = vmatprep.subr.bf16.mxu0 %v2427_v1 }
  0x27   : > { %2247 = vmatprep.subr.bf16.mxu1 %v2427_v1  ;;  %2241 = vmatprep.mubr.msk.bf16.mxu0 %vm2428_vm0, %v2427_v1 }
  0x28   : > { %2249 = vmatprep.mubr.msk.bf16.mxu1 %vm2428_vm0, %v2427_v1 }
  0x29   : > { %2240 = vmatpush3.bf16.msra.mxu0 %v2389_v17 }
  0x2a   : > { %2248 = vmatpush3.bf16.msra.mxu1 %v2390_v18  ;;  %2253 = vmatprep.subr.bf16.mxu0 %v2427_v1 }
  0x2b   : > { %2261 = vmatprep.subr.bf16.mxu1 %v2427_v1 }
  0x2c   : > { %2242 = vmatmul.mubr.msk.bf16.vlgmr.msra.gmra.mxu0 %vm536_vm1, %v2550_v8 }
  0x2d   : > { %2250 = vmatmul.mubr.msk.bf16.vlgmr.msra.gmra.mxu1 %vm536_vm1, %v2550_v8  ;;  %2257 = vmatprep.mubr.msk.bf16.mxu0 %vm2428_vm0, %v2427_v1 }
  0x2e   : > { %2265 = vmatprep.mubr.msk.bf16.mxu1 %vm2428_vm0, %v2427_v1  ;;  %2254 = vmatpush3.bf16.msra.mxu0 %v2391_v19 }
  0x2f   : > { %2255 = vmatprep.subr.bf16.mxu0 %v2427_v1  ;;  %2262 = vmatpush3.bf16.msra.mxu1 %v2393_v21 }
  0x30   : > { %2263 = vmatprep.subr.bf16.mxu1 %v2427_v1 }
  0x32   : > { %2256 = vmatpush3.bf16.msra.mxu0 %v2392_v20 }
  0x33   : > { %2269 = vmatprep.subr.bf16.mxu0 %v2427_v1  ;;  %2264 = vmatpush3.bf16.msra.mxu1 %v2394_v22 }
  0x34   : > { %2277 = vmatprep.subr.bf16.mxu1 %v2427_v1 }
  0x35   : > { %2258 = vmatmul.mubr.msk.bf16.vlgmr.msra.gmra.mxu0 %vm536_vm1, %v2550_v8 }
  0x36   : > { %2270 = vmatpush3.bf16.msra.mxu0 %v2395_v23  ;;  %2273 = vmatprep.mubr.msk.bf16.mxu0 %vm2428_vm0, %v2427_v1 }
  0x37   : > { %2271 = vmatprep.subr.bf16.mxu0 %v2427_v1  ;;  %2266 = vmatmul.mubr.msk.bf16.vlgmr.msra.gmra.mxu1 %vm536_vm1, %v2550_v8 }
  0x38   : > { %2278 = vmatpush3.bf16.msra.mxu1 %v2397_v25  ;;  %2281 = vmatprep.mubr.msk.bf16.mxu1 %vm2428_vm0, %v2427_v1  ;;  %v2088_v25 = vld [vmem:[%s2838_s7] ss:$0 sm:$0xff] }
  0x39   : > { %2279 = vmatprep.subr.bf16.mxu1 %v2427_v1 }
  0x3a   : > { %2272 = vmatpush3.bf16.msra.mxu0 %v2396_v24 }
  0x3b   : > { %2285 = vmatprep.subr.bf16.mxu0 %v2427_v1 }
  0x3c   : > { %2280 = vmatpush3.bf16.msra.mxu1 %v2398_v26 }
  0x3d   : > { %2274 = vmatmul.mubr.msk.bf16.vlgmr.msra.gmra.mxu0 %vm536_vm1, %v2550_v8  ;;  %2291 = vmatprep.subr.bf16.mxu1 %v2427_v1 }
  0x3e   : > { %2287 = vmatprep.mubr.msk.bf16.mxu0 %vm2428_vm0, %v2427_v1 }
  0x3f   : > { %2282 = vmatmul.mubr.msk.bf16.vlgmr.msra.gmra.mxu1 %vm536_vm1, %v2550_v8 }
  0x40   : > { %2293 = vmatprep.mubr.msk.bf16.mxu1 %vm2428_vm0, %v2427_v1 }
  0xd4   : > { %v574_v27 = vpop.f32.mrf.mxu0 }
  0xd5   : > { %v626_v28 = vpop.f32.mrf.mxu1  ;;  %v575_v63 = vadd.f32 %v2056_v53, %v574_v27 }
  0xd6   : > { %v2195_v29 = vpop.f32.mrf.mxu0  ;;  %v627_v0 = vadd.f32 %v2057_v54, %v626_v28 }
  0xd7   : > { %v2203_v30 = vpop.f32.mrf.mxu1  ;;  %v1240_v9 = vpack.c.bf16 %v575_v63, %v575_v63  ;;  %v2089_v29 = vld [vmem:[%s2838_s7 + $0x1] ss:$0 sm:$0xff] }
  0xd8   : > { %v577_v31 = vpop.f32.mrf.mxu0  ;;  %v1241_v10 = vpack.c.bf16 %v627_v0, %v627_v0 }
  0xd9   : > { %v629_v32 = vpop.f32.mrf.mxu1 }
  0xda   : > { %v2196_v33 = vpop.f32.mrf.mxu0 }
  0xdb   : > { %v2204_v34 = vpop.f32.mrf.mxu1 }
  0xdc   : > { %v678_v35 = vpop.f32.mrf.mxu0 }
  0xdd   : > { %v730_v36 = vpop.f32.mrf.mxu1  ;;  %v679_v21 = vadd.f32 %v2058_v13, %v678_v35 }
  0xde   : > { %v2211_v37 = vpop.f32.mrf.mxu0  ;;  %v731_v22 = vadd.f32 %v2059_v14, %v730_v36 }
  0xdf   : > { %v2219_v38 = vpop.f32.mrf.mxu1  ;;  %v1242_v23 = vpack.c.bf16 %v679_v21, %v679_v21 }
  0xe0   : > { %v681_v39 = vpop.f32.mrf.mxu0  ;;  %v1243_v24 = vpack.c.bf16 %v731_v22, %v731_v22 }
  0xe1   : > { %v733_v40 = vpop.f32.mrf.mxu1 }
  0xe2   : > { %v2212_v41 = vpop.f32.mrf.mxu0 }
  0xe3   : > { %v2220_v42 = vpop.f32.mrf.mxu1 }
  0xe4   : > { %v826_v45 = vpop.f32.mrf.mxu0 }
  0xe5   : > { %v878_v46 = vpop.f32.mrf.mxu1  ;;  %v827_v47 = vadd.f32 %v2072_v43, %v826_v45 }
  0xe6   : > { %v879_v48 = vadd.f32 %v2073_v44, %v878_v46  ;;  %v2227_v49 = vpop.f32.mrf.mxu0 }
  0xe7   : > { %v2235_v50 = vpop.f32.mrf.mxu1  ;;  %v1244_v51 = vpack.c.bf16 %v827_v47, %v827_v47  ;;  %v2104_v49 = vld [vmem:[%s472_s19] ss:$0 sm:$0xff]  ;;  %s476_s19 = scalar_lea.vmem %s2845_s14, %s2055_s16 }
  0xe8   : > { %v1245_v52 = vpack.c.bf16 %v879_v48, %v879_v48  ;;  %v829_v55 = vpop.f32.mrf.mxu0 }
  0xe9   : > { %v881_v56 = vpop.f32.mrf.mxu1  ;;  %v1260_v57 = vsel %vm1255_vm2, %v1244_v51, 0 }
  0xea   : > { %v1306_v58 = vsel %vm1255_vm2, %v1245_v52, 0  ;;  %v2228_v59 = vpop.f32.mrf.mxu0  ;;  %2286 = vmatpush3.bf16.xpose.msra.mxu0 %v1260_v57 }
  0xeb   : > { %v2236_v60 = vpop.f32.mrf.mxu1  ;;  %2292 = vmatpush3.bf16.xpose.msra.mxu1 %v1306_v58  ;;  %2297 = vmatprep.subr.bf16.mxu0 %v2427_v1 }
  0xec   : > { %2303 = vmatprep.subr.bf16.mxu1 %v2427_v1  ;;  %v930_v2 = vpop.f32.mrf.mxu0 }
  0xed   : > { %v982_v3 = vpop.f32.mrf.mxu1  ;;  %v931_v4 = vadd.f32 %v2074_v61, %v930_v2 }
  0xee   : > { %v983_v5 = vadd.f32 %v2075_v62, %v982_v3  ;;  %v2243_v6 = vpop.f32.mrf.mxu0 }
  0xef   : > { %v2251_v8 = vpop.f32.mrf.mxu1  ;;  %v1246_v11 = vpack.c.bf16 %v931_v4, %v931_v4 }
  0xf0   : > { %v1247_v12 = vpack.c.bf16 %v983_v5, %v983_v5  ;;  %v933_v15 = vpop.f32.mrf.mxu0 }
  0xf1   : > { %v985_v16 = vpop.f32.mrf.mxu1  ;;  %v1352_v17 = vsel %vm1255_vm2, %v1246_v11, 0  ;;  %2288 = vmatmul.mubr.msk.bf16.vlgmr.msra.gmra.mxu0 %vm1255_vm2, %v1240_v9 }
  0xf2   : > { %v1398_v18 = vsel %vm1255_vm2, %v1247_v12, 0  ;;  %2294 = vmatmul.mubr.msk.bf16.vlgmr.msra.gmra.mxu1 %vm1255_vm2, %v1241_v10  ;;  %v2244_v19 = vpop.f32.mrf.mxu0  ;;  %2298 = vmatpush3.bf16.xpose.msra.mxu0 %v1352_v17 }
  0xf3   : > { %v2252_v20 = vpop.f32.mrf.mxu1  ;;  %2304 = vmatpush3.bf16.xpose.msra.mxu1 %v1398_v18  ;;  %2299 = vmatprep.mubr.msk.bf16.mxu0 %vm2428_vm0, %v2427_v1 }
  0xf4   : > { %2305 = vmatprep.mubr.msk.bf16.mxu1 %vm2428_vm0, %v2427_v1  ;;  %2309 = vmatprep.subr.bf16.mxu0 %v2427_v1 }
  0xf5   : > { %2315 = vmatprep.subr.bf16.mxu1 %v2427_v1  ;;  %v1078_v26 = vpop.f32.mrf.mxu0 }
  0xf6   : > { %v1079_v27 = vadd.f32 %v2088_v25, %v1078_v26 }
  0xf7   : > { %v2259_v28 = vpop.f32.mrf.mxu0  ;;  %v1130_v32 = vpop.f32.mrf.mxu1 }
  0xf8   : > { %v1488_v30 = vpack.c.bf16 %v1079_v27, %v1079_v27  ;;  %v1131_v34 = vadd.f32 %v2089_v29, %v1130_v32 }
  0xf9   : > { %2300 = vmatmul.mubr.msk.bf16.vlgmr.msra.gmra.mxu0 %vm1255_vm2, %v1242_v23  ;;  %v1081_v31 = vpop.f32.mrf.mxu0  ;;  %v2267_v36 = vpop.f32.mrf.mxu1 }
  0xfa   : > { %2306 = vmatmul.mubr.msk.bf16.vlgmr.msra.gmra.mxu1 %vm1255_vm2, %v1243_v24  ;;  %2311 = vmatprep.mubr.msk.bf16.mxu0 %vm2428_vm0, %v2427_v1  ;;  %v1497_v33 = vsel %vm1495_vm3, %v1488_v30, 0  ;;  %v1489_v37 = vpack.c.bf16 %v1131_v34, %v1131_v34  ;;  %v2090_v34 = vld [vmem:[%s2838_s7 + $0x2] ss:$0 sm:$0xff] }
  0xfb   : > { %2317 = vmatprep.mubr.msk.bf16.mxu1 %vm2428_vm0, %v2427_v1  ;;  %v2260_v35 = vpop.f32.mrf.mxu0  ;;  %2310 = vmatpush3.bf16.msra.mxu0 %v1497_v33  ;;  %v1133_v38 = vpop.f32.mrf.mxu1 }
  0xfc   : > { %2321 = vmatprep.subr.bf16.mxu0 %v2427_v1  ;;  %v1543_v40 = vsel %vm1495_vm3, %v1489_v37, 0  ;;  %v2091_v37 = vld [vmem:[%s2838_s7 + $0x3] ss:$0 sm:$0xff] }
  0xfd   : > { %v2726_v39 = vpop.f32.mrf.mxu0  ;;  %v2268_v41 = vpop.f32.mrf.mxu1  ;;  %2316 = vmatpush3.bf16.msra.mxu1 %v1543_v40 }
  0xfe   : > { %2327 = vmatprep.subr.bf16.mxu1 %v2427_v1  ;;  %v1183_v36 = vadd.f32 %v2090_v34, %v2726_v39 }
  0xff   : > { %v2275_v42 = vpop.f32.mrf.mxu0  ;;  %v2730_v44 = vpop.f32.mrf.mxu1 }
 0x100   : > { %v1490_v41 = vpack.c.bf16 %v1183_v36, %v1183_v36  ;;  %v1235_v42 = vadd.f32 %v2091_v37, %v2730_v44  ;;  %v1681_v44 = vld [vmem:[%s2839_s8] sm:$0xf] }
 0x101   : > { %v1185_v43 = vpop.f32.mrf.mxu0  ;;  %v2283_v46 = vpop.f32.mrf.mxu1 }
 0x103   : > { %v2276_v45 = vpop.f32.mrf.mxu0  ;;  %v1237_v47 = vpop.f32.mrf.mxu1 }
 0x104   : > { %v1589_v47 = vsel %vm1495_vm3, %v1490_v41, 0 }
 0x105   : > { %v2284_v48 = vpop.f32.mrf.mxu1 }
 0x106   : > { %v1491_v48 = vpack.c.bf16 %v1235_v42, %v1235_v42  ;;  %v2117_v42 = vld [vmem:[%s2840_s9] ss:$0 sm:$0xff] }
 0x1b1   : > { %v1296_v50 = vpop.f32.mrf.mxu0 }
 0x1b2   : > { %v1342_v51 = vpop.f32.mrf.mxu1  ;;  %v1297_v52 = vadd.f32 %v2104_v49, %v1296_v50 }
 0x1b3   : > { %v2289_v53 = vpop.f32.mrf.mxu0  ;;  %v1343_v55 = vadd.f32 %v2104_v49, %v1342_v51  ;;  %v1635_v51 = vsel %vm1495_vm3, %v1491_v48, 0 }
 0x1b4   : > { %v2295_v54 = vpop.f32.mrf.mxu1  ;;  %v1440_v56 = vsel %vm1255_vm2, %v1297_v52, -inf }
 0x1b5   : > { %1441 = vmax.xlane.f32.xlu0 %v1440_v56  ;;  %v1299_v58 = vpop.f32.mrf.mxu0  ;;  %v1443_v61 = vsel %vm1255_vm2, %v1343_v55, -inf  ;;  %v1689_v54 = vsel %vm1495_vm3, %v1681_v44, 0 }
 0x1b6   : > { %v1345_v57 = vpop.f32.mrf.mxu1  ;;  %v1682_v58 = vld [vmem:[%s2839_s8 + $0x4] sm:$0xf] }
 0x1b7   : > { %v2290_v59 = vpop.f32.mrf.mxu0 }
 0x1b8   : > { %v2296_v60 = vpop.f32.mrf.mxu1  ;;  %v1735_v59 = vsel %vm1495_vm3, %v1682_v58, 0 }
 0x1b9   : > { %1444 = vmax.xlane.f32.xlu0 %v1443_v61  ;;  %v1388_v63 = vpop.f32.mrf.mxu0  ;;  %v1683_v60 = vld [vmem:[%s2839_s8 + $0x8] sm:$0xf] }
 0x1ba   : > { %v1434_v62 = vpop.f32.mrf.mxu1  ;;  %v1389_v0 = vadd.f32 %v2104_v49, %v1388_v63  ;;  %v1781_v63 = vsel %vm1495_vm3, %v1683_v60, 0 }
 0x1bb   : > { %v2301_v2 = vpop.f32.mrf.mxu0  ;;  %v1435_v4 = vadd.f32 %v2104_v49, %v1434_v62 }
 0x1bc   : > { %v2307_v3 = vpop.f32.mrf.mxu1  ;;  %v1446_v5 = vsel %vm1255_vm2, %v1389_v0, -inf  ;;  %v1684_v2 = vld [vmem:[%s2839_s8 + $0xc] sm:$0xf] }
 0x1bd   : > { %1447 = vmax.xlane.f32.xlu1 %v1446_v5  ;;  %v1391_v8 = vpop.f32.mrf.mxu0  ;;  %v1449_v11 = vsel %vm1255_vm2, %v1435_v4, -inf }
 0x1be   : > { %v1437_v6 = vpop.f32.mrf.mxu1 }
 0x1bf   : > { %v2302_v9 = vpop.f32.mrf.mxu0  ;;  %v1827_v6 = vsel %vm1495_vm3, %v1684_v2, 0 }
 0x1c0   : > { %v2308_v10 = vpop.f32.mrf.mxu1 }
 0x1c1   : > { %1450 = vmax.xlane.f32.xlu1 %v1449_v11 }
 0x23e   : > { %v1442_v12 = vpop.xlane.xlu0 %1441 }
 0x23f   : > { %v1452_v13 = vsub.f32 %v1297_v52, %v1442_v12 }
 0x241   : > { %v1456_v14 = vmul.f32 1.442695, %v1452_v13 }
 0x242   : > { %v1445_v15 = vpop.xlane.xlu0 %1444 }
 0x243   : > { %2401 = vpow2.f32 %v1456_v14  ;;  %v1453_v16 = vsub.f32 %v1343_v55, %v1445_v15 }
 0x245   : > { %v1458_v17 = vmul.f32 1.442695, %v1453_v16 }
 0x246   : > { %v1448_v18 = vpop.xlane.xlu1 %1447 }
 0x247   : > { %2403 = vpow2.f32 %v1458_v17  ;;  %v1454_v19 = vsub.f32 %v1389_v0, %v1448_v18 }
 0x249   : > { %v1460_v20 = vmul.f32 1.442695, %v1454_v19 }
 0x24a   : > { %v1451_v21 = vpop.xlane.xlu1 %1450 }
 0x24b   : > { %2405 = vpow2.f32 %v1460_v20  ;;  %v1455_v22 = vsub.f32 %v1435_v4, %v1451_v21 }
 0x24d   : > { %v1462_v23 = vmul.f32 1.442695, %v1455_v22  ;;  %v2399_v22 = vld [vmem:[%s2841_s10 + $0x8] sm:$0xff]  }
 0x24f   : > { %2407 = vpow2.f32 %v1462_v23  ;;  %v2400_v23 = vld [vmem:[%s2841_s10] sm:$0xff]  }
 0x250   : > { %v2402_v24 = vpop.eup %2401 }
 0x251   : > { %v1464_v25 = vsel %vm1255_vm2, %v2402_v24, 0.0 }
 0x252   : > { %1465 = vadd.xlane.f32.xlu0 %v1464_v25 }
 0x254   : > { %v2404_v26 = vpop.eup %2403 }
 0x255   : > { %v1467_v27 = vsel %vm1255_vm2, %v2404_v26, 0.0 }
 0x256   : > { %1468 = vadd.xlane.f32.xlu1 %v1467_v27 }
 0x258   : > { %v2406_v28 = vpop.eup %2405 }
 0x259   : > { %v1470_v29 = vsel %vm1255_vm2, %v2406_v28, 0.0 }
 0x25a   : > { %1471 = vadd.xlane.f32.xlu0 %v1470_v29 }
 0x25c   : > { %v2408_v30 = vpop.eup %2407 }
 0x25d   : > { %v1473_v31 = vsel %vm1255_vm2, %v2408_v30, 0.0 }
 0x25e   : > { %1474 = vadd.xlane.f32.xlu1 %v1473_v31 }
 0x2db   : > { %v1466_v32 = vpop.xlane.xlu0 %1465 }
 0x2dc   : > { %2409 = vrcp.f32 %v1466_v32 }
 0x2df   : > { %v1469_v33 = vpop.xlane.xlu1 %1468 }
 0x2e0   : > { %2411 = vrcp.f32 %v1469_v33 }
 0x2e3   : > { %v1472_v35 = vpop.xlane.xlu0 %1471 }
 0x2e4   : > { %2413 = vrcp.f32 %v1472_v35 }
 0x2e7   : > { %v1475_v38 = vpop.xlane.xlu1 %1474 }
 0x2e8   : > { %2415 = vrcp.f32 %v1475_v38 }
 0x2e9   : > { %v2410_v40 = vpop.eup %2409 }
 0x2ea   : > { %v1480_v43 = vmul.f32 %v2410_v40, %v2402_v24 }
 0x2ec   : > { %v1484_v45 = vpack.c.bf16 %v1480_v43, %v1480_v43 }
 0x2ed   : > { %v2412_v46 = vpop.eup %2411 }
 0x2ee   : > { %2312 = vmatmul.mubr.msk.bf16.vlgmr.msra.gmra.mxu0 %vm1255_vm2, %v1484_v45  ;;  %v1481_v49 = vmul.f32 %v2412_v46, %v2404_v26 }
 0x2ef   : > { %2322 = vmatpush3.bf16.msra.mxu0 %v1589_v47  ;;  %2323 = vmatprep.mubr.msk.bf16.mxu0 %vm2428_vm0, %v2427_v1 }
 0x2f0   : > { %v1485_v39 = vpack.c.bf16 %v1481_v49, %v1481_v49  ;;  %2333 = vmatprep.subr.bf16.mxu0 %v2427_v1 }
 0x2f1   : > { %v2414_v50 = vpop.eup %2413 }
 0x2f2   : > { %2318 = vmatmul.mubr.msk.bf16.vlgmr.msra.gmra.mxu1 %vm1255_vm2, %v1485_v39  ;;  %v1482_v52 = vmul.f32 %v2414_v50, %v2406_v28  ;;  %v2118_v50 = vld [vmem:[%s2842_s11] ss:$0 sm:$0xff] }
 0x2f3   : > { %2328 = vmatpush3.bf16.msra.mxu1 %v1635_v51  ;;  %2329 = vmatprep.mubr.msk.bf16.mxu1 %vm2428_vm0, %v2427_v1 }
 0x2f4   : > { %v1486_v53 = vpack.c.bf16 %v1482_v52, %v1482_v52  ;;  %2339 = vmatprep.subr.bf16.mxu1 %v2427_v1 }
 0x2f5   : > { %v2416_v55 = vpop.eup %2415 }
 0x2f6   : > { %2324 = vmatmul.mubr.msk.bf16.vlgmr.msra.gmra.mxu0 %vm1255_vm2, %v1486_v53  ;;  %v1483_v56 = vmul.f32 %v2416_v55, %v2408_v30 }
 0x2f7   : > { %2334 = vmatpush3.bf16.msra.mxu0 %v1689_v54  ;;  %2335 = vmatprep.mubr.msk.bf16.mxu0 %vm2428_vm0, %v2427_v1 }
 0x2f8   : > { %v1487_v57 = vpack.c.bf16 %v1483_v56, %v1483_v56  ;;  %2345 = vmatprep.subr.bf16.mxu0 %v2427_v1 }
 0x2fa   : > { %2330 = vmatmul.mubr.msk.bf16.vlgmr.msra.gmra.mxu1 %vm1255_vm2, %v1487_v57 }
 0x2fb   : > { %2341 = vmatprep.mubr.msk.bf16.mxu1 %vm2428_vm0, %v2427_v1  ;;  %2340 = vmatpush3.bf16.msra.mxu1 %v1735_v59 }
 0x2fc   : > { %2351 = vmatprep.subr.bf16.mxu1 %v2427_v1 }
 0x3ae   : > { %v1533_v61 = vpop.f32.mrf.mxu0 }
 0x3af   : > { %v1677_v62 = vpack.c.bf16 %v1533_v61, %v1533_v61 }
 0x3b0   : > { %v2313_v0 = vpop.f32.mrf.mxu0 }
 0x3b1   : > { %2336 = vmatmul.mubr.msk.bf16.vlgmr.msra.gmra.mxu0 %vm1255_vm2, %v1677_v62 }
 0x3b2   : > { %v1536_v3 = vpop.f32.mrf.mxu0  ;;  %v1579_v4 = vpop.f32.mrf.mxu1  ;;  %2346 = vmatpush3.bf16.msra.mxu0 %v1781_v63  ;;  %2347 = vmatprep.mubr.msk.bf16.mxu0 %vm2428_vm0, %v2427_v1 }
 0x3b3   : > { %v1678_v5 = vpack.c.bf16 %v1579_v4, %v1579_v4  ;;  %2357 = vmatprep.subr.bf16.mxu0 %v2427_v1  ;;  %v2122_v4 = vld [vmem:[%s2843_s12] ss:$0 sm:$0xff] }
 0x3b4   : > { %v2314_v8 = vpop.f32.mrf.mxu0  ;;  %v2319_v9 = vpop.f32.mrf.mxu1 }
 0x3b5   : > { %2342 = vmatmul.mubr.msk.bf16.vlgmr.msra.gmra.mxu1 %vm1255_vm2, %v1678_v5 }
 0x3b6   : > { %v1582_v10 = vpop.f32.mrf.mxu1  ;;  %v1625_v11 = vpop.f32.mrf.mxu0  ;;  %2352 = vmatpush3.bf16.msra.mxu1 %v1827_v6  ;;  %2353 = vmatprep.mubr.msk.bf16.mxu1 %vm2428_vm0, %v2427_v1  ;;  %v2123_v6 = vld [vmem:[%s2844_s13] ss:$0 sm:$0xff] }
 0x3b7   : > { %v1679_v12 = vpack.c.bf16 %v1625_v11, %v1625_v11 }
 0x3b8   : > { %v2320_v13 = vpop.f32.mrf.mxu1  ;;  %v2325_v14 = vpop.f32.mrf.mxu0 }
 0x3b9   : > { %2348 = vmatmul.mubr.msk.bf16.vlgmr.msra.gmra.mxu0 %vm1255_vm2, %v1679_v12 }
 0x3ba   : > { %v1628_v15 = vpop.f32.mrf.mxu0  ;;  %v1671_v16 = vpop.f32.mrf.mxu1  ;;  %2361 = vmatprep.mubr.msk.bf16.mxu0 %vm2428_vm0, %v2427_v1  ;;  %2358 = vmatpush3.bf16.msra.mxu0 %v2399_v22 }
 0x3bb   : > { %v1680_v17 = vpack.c.bf16 %v1671_v16, %v1671_v16  ;;  %2359 = vmatprep.subr.bf16.mxu0 %v2427_v1 }
 0x3bc   : > { %v2326_v18 = vpop.f32.mrf.mxu0  ;;  %v2331_v19 = vpop.f32.mrf.mxu1 }
 0x3bd   : > { %2354 = vmatmul.mubr.msk.bf16.vlgmr.msra.gmra.mxu1 %vm1255_vm2, %v1680_v17 }
 0x3be   : > { %v1674_v20 = vpop.f32.mrf.mxu1  ;;  %2360 = vmatpush3.bf16.msra.mxu0 %v2400_v23 }
 0x3c0   : > { %v2332_v21 = vpop.f32.mrf.mxu1 }
 0x471   : > { %v1725_v24 = vpop.f32.mrf.mxu0 }
 0x472   : > { %v1869_v33 = vsel %vm536_vm1, %v1725_v24, 0.0 }
 0x473   : > { %v2337_v25 = vpop.f32.mrf.mxu0 }
 0x475   : > { %v1728_v26 = vpop.f32.mrf.mxu0  ;;  %v1771_v27 = vpop.f32.mrf.mxu1 }
 0x476   : > { %v1870_v30 = vsel %vm536_vm1, %v1771_v27, 0.0 }
 0x477   : > { %v2338_v28 = vpop.f32.mrf.mxu0  ;;  %v2343_v29 = vpop.f32.mrf.mxu1  ;;  %v1871_v1 = vadd.f32 %v1870_v30, %v1869_v33 }
 0x479   : > { %v1774_v31 = vpop.f32.mrf.mxu1  ;;  %v1817_v32 = vpop.f32.mrf.mxu0 }
 0x47a   : > { %v1872_v34 = vsel %vm536_vm1, %v1817_v32, 0.0 }
 0x47b   : > { %v2344_v35 = vpop.f32.mrf.mxu1  ;;  %v2349_v36 = vpop.f32.mrf.mxu0  ;;  %v1873_v37 = vadd.f32 %v1872_v34, %v1871_v1 }
 0x47d   : > { %v1820_v38 = vpop.f32.mrf.mxu0  ;;  %v1863_v40 = vpop.f32.mrf.mxu1 }
 0x47e   : > { %v1874_v41 = vsel %vm536_vm1, %v1863_v40, 0.0 }
 0x47f   : > { %v1875_v43 = vadd.f32 %v1874_v41, %v1873_v37  ;;  %v2350_v45 = vpop.f32.mrf.mxu0  ;;  %v2355_v46 = vpop.f32.mrf.mxu1 }
 0x481   : > { %v1883_v47 = vadd.f32 %v2117_v42, %v1875_v43  ;;  %v1866_v48 = vpop.f32.mrf.mxu1 }
 0x483   : > { %v1884_v49 = vpack.c.bf16 %v1883_v47, %v1883_v47  ;;  %v2356_v39 = vpop.f32.mrf.mxu1 }
 0x485   : > { %2362 = vmatmul.mubr.msk.bf16.vlgmr.msra.gmra.mxu0 %vm536_vm1, %v1884_v49 }
 0x545   : > { %v1945_v44 = vpop.f32.mrf.mxu0 }
 0x546   : > { %v1946_v51 = vadd.f32 %v2118_v50, %v1945_v44 }
 0x547   : > { %v2363_v52 = vpop.f32.mrf.mxu0 }
 0x548   : > { %v1951_v53 = vadd.f32 %v1946_v51, %v2545_v7 }
 0x549   : > { %v1948_v54 = vpop.f32.mrf.mxu0 }
 0x54a   : > { %v1954_v55 = vsel %vm536_vm1, %v1951_v53, 0.0  ;;  %v1959_v56 = vmul.f32 %v1951_v53, %v1951_v53 }
 0x54b   : > { %1955 = vadd.xlane.f32.xlu0 %v1954_v55  ;;  %v2364_v57 = vpop.f32.mrf.mxu0 }
 0x54c   : > { %v1960_v58 = vsel %vm536_vm1, %v1959_v56, 0.0 }
 0x54d   : > { %1961 = vadd.xlane.f32.xlu1 %v1960_v58 }
 0x5d4   : > { %v1956_v59 = vpop.xlane.xlu0 %1955 }
 0x5d5   : > { %v1958_v60 = vmul.f32 0.03125, %v1956_v59 }
 0x5d6   : > { %v1962_v61 = vpop.xlane.xlu1 %1961 }
 0x5d7   : > { %v1964_v62 = vmul.f32 %v1958_v60, %v1958_v60  ;;  %v1963_v63 = vmul.f32 0.03125, %v1962_v61  ;;  %v1966_v3 = vsub.f32 %v1951_v53, %v1958_v60 }
 0x5d9   : > { %v1965_v0 = vsub.f32 %v1963_v63, %v1964_v62 }
 0x5db   : > { %v1967_v2 = vadd.f32 1e-05, %v1965_v0 }
 0x5dd   : > { %2417 = vrsqrt.f32 %v1967_v2 }
 0x5ea   : > { %v2418_v7 = vpop.eup %2417 }
 0x5eb   : > { %v1969_v5 = vmul.f32 %v2418_v7, %v1966_v3 }
 0x5ed   : > { %v1976_v8 = vmul.f32 %v2122_v4, %v1969_v5 }
 0x5ef   : > { %v1983_v9 = vadd.f32 %v2123_v6, %v1976_v8 }
 0x5f1   : > { %v1984_v10 = vpack.c.bf16 %v1983_v9, %v1983_v9 }
 0x5f3   : > { %1986 = vst.msk [vmem:[%s476_s19] sm:$0xf] %vm1985_vm4, %v1984_v10 }
 0x5f4 PF: > { %s24_s29 = sadd.s32 1, %s2425_s29  }
 0x5f5   : > { %p21_p4 = scmp.ge.s32.totalorder %s24_s29, 4  }
 0x5f7   :  { %23 = sbr.rel (!%p21_p4) target bundleno = 1 (0x1), region = 109 }

// kernel: run.7
= control target key start
LH: loop header
LB: loop body
LE: loop exit
PB: predicated region body
PF: predicated region fallthrough
CT: control target
= control target key end

     0   :  { %s2409_s18 = smov 0   ;;  %s2677_s0 = inlined_call_operand.vmem [shape: f32[2,8,16], index: 0, kind: input, shape index: {}]   ;;  %s2678_s1 = inlined_call_operand.vmem [shape: f32[2,1,8], index: 1, kind: input, shape index: {}]   ;;  %s2679_s2 = inlined_call_operand.vmem [shape: f32[2,8,1], index: 2, kind: input, shape index: {}]   ;;  %s2680_s3 = inlined_call_operand.vmem [shape: bf16[4,16,4], index: 3, kind: input, shape index: {}]   ;;  %s2681_s4 = inlined_call_operand.vmem [shape: f32[4,1,4], index: 4, kind: input, shape index: {}]   ;;  %s2682_s5 = inlined_call_operand.vmem [shape: bf16[4,16,4], index: 5, kind: input, shape index: {}]   ;;  %s2683_s6 = inlined_call_operand.vmem [shape: f32[4,1,4], index: 6, kind: input, shape index: {}]   ;;  %s2684_s7 = inlined_call_operand.vmem [shape: bf16[4,16,4], index: 7, kind: input, shape index: {}]   ;;  %s2685_s8 = inlined_call_operand.vmem [shape: f32[4,1,4], index: 8, kind: input, shape index: {}]   ;;  %s2686_s9 = inlined_call_operand.vmem [shape: bf16[4,4,16], index: 9, kind: input, shape index: {}]   ;;  %s2687_s10 = inlined_call_operand.vmem [shape: f32[1,16], index: 10, kind: input, shape index: {}]   ;;  %s2688_s11 = inlined_call_operand.vmem [shape: bf16[16,16], index: 11, kind: input, shape index: {}]   ;;  %s2689_s12 = inlined_call_operand.vmem [shape: f32[1,16], index: 12, kind: input, shape index: {}]   ;;  %s2690_s13 = inlined_call_operand.vmem [shape: f32[1,16], index: 13, kind: input, shape index: {}]   ;;  %s2691_s14 = inlined_call_operand.vmem [shape: f32[1,16], index: 14, kind: input, shape index: {}]   ;;  %s2692_s15 = inlined_call_operand.vmem [shape: bf16[2,8,16], index: 15, kind: output, shape index: {}]  }
   0x1 LB: > { %s2010_s19 = sadd.s32 4294967295, %s2324_s18   ;;  %p2014_p0 = scmp.ge.s32.totalorder %s2324_s18, 1  ;;  %s2324_s18 = sphi %s2409_s18, %s25_s18  }
   0x2   : > { %p453_p1 = scmp.lt.s32.totalorder %s2324_s18, 3 }
   0x4   : > { %p454_p2 = pnand %p2014_p0, %p453_p1 }
   0x5   : > { %p506_p3 = scmp.lt.s32.totalorder (!%p454_p2), %s2010_s19, 1 }
   0x6   : > { %457 = sbr.rel (%p454_p2) target bundleno = 1523 (0x5f3), region = 80 }
   0xb   : > { %v2287_v0 = vld [vmem:[%s2680_s3] sm:$0xff]   ;;  %v2326_v1 = vmov 0.0   ;;  %v2288_v2 = vld [vmem:[%s2680_s3 + $0x8] sm:$0xff]   ;;  %vm2327_vm0 = vmmov 0   ;;  %s2694_s19 = smov (!%p506_p3, %s2010_s19), 1  ;;  %vm566_vm1 = vcmask 130048  }
   0xc   : > { %2125 = vmatprep.subr.bf16.mxu0 %v2326_v1  ;;  %2131 = vmatprep.subr.bf16.mxu1 %v2326_v1  ;;  %s2015_s24 = sshll.u32 %s2694_s19, 3  ;;  %v2289_v4 = vld [vmem:[%s2680_s3 + $0x10] sm:$0xff]   ;;  %v2290_v5 = vld [vmem:[%s2680_s3 + $0x18] sm:$0xff]   ;;  %v2291_v7 = vld [vmem:[%s2682_s5] sm:$0xff]   ;;  %vm1203_vm2 = vcmask 31744   ;;  %vm1444_vm3 = vcmask 1043456   ;;  %s512_s26 = scalar_lea.vmem %s2678_s1, %s2694_s19 }
   0xd   : > { %2126 = vmatpush3.bf16.msra.mxu0 %v2287_v0  ;;  %2127 = vmatprep.mubr.msk.bf16.mxu0 %vm2327_vm0, %v2326_v1  ;;  %s509_s27 = scalar_lea.vmem %s2677_s0, %s2015_s24  ;;  %v2292_v8 = vld [vmem:[%s2682_s5 + $0x8] sm:$0xff]   ;;  %v2293_v9 = vld [vmem:[%s2682_s5 + $0x10] sm:$0xff]   ;;  %v2294_v10 = vld [vmem:[%s2682_s5 + $0x18] sm:$0xff]   ;;  %vm1388_vm4 = vcmask 64512   ;;  %vm1637_vm5 = vcmask 1041408   ;;  %s516_s16 = scalar_lea.vmem %s2679_s2, %s2015_s24  ;;  %vm1934_vm6 = vcmask 125952  }
   0xe   : > { %2132 = vmatpush3.bf16.msra.mxu1 %v2288_v2  ;;  %2133 = vmatprep.mubr.msk.bf16.mxu1 %vm2327_vm0, %v2326_v1  ;;  %v2439_v3 = vld [vmem:[%s509_s27] sm:$0xff]  ;;  %v2296_v12 = vld [vmem:[%s2684_s7 + $0x8] sm:$0xff]   ;;  %v2297_v13 = vld [vmem:[%s2684_s7 + $0x10] sm:$0xff]   ;;  %s2017_s22 = sshll.u32 %s2694_s19, 2 }
   0xf   : > { %2137 = vmatprep.subr.bf16.mxu0 %v2326_v1  ;;  %2143 = vmatprep.subr.bf16.mxu1 %v2326_v1  ;;  %v523_v6 = vpack.c.bf16 %v2439_v3, %v2439_v3  ;;  %v2295_v11 = vld [vmem:[%s2684_s7] sm:$0xff]   ;;  %v2298_v14 = vld [vmem:[%s2684_s7 + $0x18] sm:$0xff]  }
  0x10   : > { %v2030_v31 = vld [vmem:[%s2683_s6] ss:$0 sm:$0xff]  ;;  %v2031_v32 = vld [vmem:[%s2683_s6 + $0x1] ss:$0 sm:$0xff]  ;;  %v2032_v49 = vld [vmem:[%s2683_s6 + $0x2] ss:$0 sm:$0xff] }
  0x11   : > { %2128 = vmatmul.mubr.msk.bf16.vlgmr.msra.gmra.mxu0 %vm566_vm1, %v523_v6  ;;  %2134 = vmatmul.mubr.msk.bf16.vlgmr.msra.gmra.mxu1 %vm566_vm1, %v523_v6  ;;  %v2018_v41 = vld [vmem:[%s2681_s4] ss:$0 sm:$0xff]  ;;  %v2019_v42 = vld [vmem:[%s2681_s4 + $0x1] ss:$0 sm:$0xff]  ;;  %v2033_v50 = vld [vmem:[%s2683_s6 + $0x3] ss:$0 sm:$0xff] }
  0x12   : > { %2138 = vmatpush3.bf16.msra.mxu0 %v2289_v4  ;;  %2144 = vmatpush3.bf16.msra.mxu1 %v2290_v5  ;;  %v2020_v63 = vld [vmem:[%s2681_s4 + $0x2] ss:$0 sm:$0xff]  ;;  %v2021_v0 = vld [vmem:[%s2681_s4 + $0x3] ss:$0 sm:$0xff] }
  0x13   : > { %2139 = vmatprep.mubr.msk.bf16.mxu0 %vm2327_vm0, %v2326_v1  ;;  %2145 = vmatprep.mubr.msk.bf16.mxu1 %vm2327_vm0, %v2326_v1 }
  0x14   : > { %2149 = vmatprep.subr.bf16.mxu0 %v2326_v1  ;;  %2155 = vmatprep.subr.bf16.mxu1 %v2326_v1 }
  0x19   : > { %2140 = vmatmul.mubr.msk.bf16.vlgmr.msra.gmra.mxu0 %vm566_vm1, %v523_v6  ;;  %2146 = vmatmul.mubr.msk.bf16.vlgmr.msra.gmra.mxu1 %vm566_vm1, %v523_v6 }
  0x1a   : > { %2150 = vmatpush3.bf16.msra.mxu0 %v2291_v7  ;;  %2156 = vmatpush3.bf16.msra.mxu1 %v2292_v8 }
  0x1b   : > { %2151 = vmatprep.mubr.msk.bf16.mxu0 %vm2327_vm0, %v2326_v1  ;;  %2157 = vmatprep.mubr.msk.bf16.mxu1 %vm2327_vm0, %v2326_v1 }
  0x1c   : > { %2161 = vmatprep.subr.bf16.mxu0 %v2326_v1  ;;  %2167 = vmatprep.subr.bf16.mxu1 %v2326_v1 }
  0x21   : > { %2152 = vmatmul.mubr.msk.bf16.vlgmr.msra.gmra.mxu0 %vm566_vm1, %v523_v6  ;;  %2158 = vmatmul.mubr.msk.bf16.vlgmr.msra.gmra.mxu1 %vm566_vm1, %v523_v6 }
  0x22   : > { %2162 = vmatpush3.bf16.msra.mxu0 %v2293_v9  ;;  %2168 = vmatpush3.bf16.msra.mxu1 %v2294_v10 }
  0x23   : > { %2163 = vmatprep.mubr.msk.bf16.mxu0 %vm2327_vm0, %v2326_v1  ;;  %2169 = vmatprep.mubr.msk.bf16.mxu1 %vm2327_vm0, %v2326_v1 }
  0x24   : > { %2173 = vmatprep.subr.bf16.mxu0 %v2326_v1  ;;  %2179 = vmatprep.subr.bf16.mxu1 %v2326_v1 }
  0x29   : > { %2164 = vmatmul.mubr.msk.bf16.vlgmr.msra.gmra.mxu0 %vm566_vm1, %v523_v6  ;;  %2170 = vmatmul.mubr.msk.bf16.vlgmr.msra.gmra.mxu1 %vm566_vm1, %v523_v6 }
  0x2a   : > { %2175 = vmatprep.mubr.msk.bf16.mxu0 %vm2327_vm0, %v2326_v1  ;;  %2181 = vmatprep.mubr.msk.bf16.mxu1 %vm2327_vm0, %v2326_v1 }
  0x2b   : > { %2174 = vmatpush3.bf16.msra.mxu0 %v2295_v11  ;;  %2180 = vmatpush3.bf16.msra.mxu1 %v2296_v12 }
  0x2c   : > { %2185 = vmatprep.subr.bf16.mxu0 %v2326_v1  ;;  %2191 = vmatprep.subr.bf16.mxu1 %v2326_v1 }
  0x31   : > { %2176 = vmatmul.mubr.msk.bf16.vlgmr.msra.gmra.mxu0 %vm566_vm1, %v523_v6  ;;  %2182 = vmatmul.mubr.msk.bf16.vlgmr.msra.gmra.mxu1 %vm566_vm1, %v523_v6 }
  0x32   : > { %2187 = vmatprep.mubr.msk.bf16.mxu0 %vm2327_vm0, %v2326_v1  ;;  %2186 = vmatpush3.bf16.msra.mxu0 %v2297_v13  ;;  %v2042_v13 = vld [vmem:[%s2685_s8] ss:$0 sm:$0xff] }
  0x33   : > { %2193 = vmatprep.mubr.msk.bf16.mxu1 %vm2327_vm0, %v2326_v1  ;;  %2197 = vmatprep.subr.bf16.mxu0 %v2326_v1 }
  0x34   : > { %2192 = vmatpush3.bf16.msra.mxu1 %v2298_v14 }
  0x35   : > { %2203 = vmatprep.subr.bf16.mxu1 %v2326_v1 }
  0x39   : > { %2188 = vmatmul.mubr.msk.bf16.vlgmr.msra.gmra.mxu0 %vm566_vm1, %v523_v6  ;;  %2194 = vmatmul.mubr.msk.bf16.vlgmr.msra.gmra.mxu1 %vm566_vm1, %v523_v6 }
  0x3a   : > { %2199 = vmatprep.mubr.msk.bf16.mxu0 %vm2327_vm0, %v2326_v1  ;;  %2205 = vmatprep.mubr.msk.bf16.mxu1 %vm2327_vm0, %v2326_v1 }
  0xd1   : > { %v604_v15 = vpop.f32.mrf.mxu0  ;;  %v650_v16 = vpop.f32.mrf.mxu1 }
  0xd2   : > { %v605_v51 = vadd.f32 %v2018_v41, %v604_v15  ;;  %v651_v52 = vadd.f32 %v2019_v42, %v650_v16 }
  0xd3   : > { %v2129_v17 = vpop.f32.mrf.mxu0  ;;  %v2135_v18 = vpop.f32.mrf.mxu1 }
  0xd4   : > { %v1188_v59 = vpack.c.bf16 %v605_v51, %v605_v51  ;;  %v1189_v60 = vpack.c.bf16 %v651_v52, %v651_v52  ;;  %v2043_v17 = vld [vmem:[%s2685_s8 + $0x1] ss:$0 sm:$0xff] }
  0xd5   : > { %v607_v19 = vpop.f32.mrf.mxu0  ;;  %v653_v20 = vpop.f32.mrf.mxu1 }
  0xd7   : > { %v2130_v21 = vpop.f32.mrf.mxu0  ;;  %v2136_v22 = vpop.f32.mrf.mxu1 }
  0xd9   : > { %v696_v23 = vpop.f32.mrf.mxu0  ;;  %v742_v24 = vpop.f32.mrf.mxu1 }
  0xda   : > { %v697_v9 = vadd.f32 %v2020_v63, %v696_v23  ;;  %v743_v10 = vadd.f32 %v2021_v0, %v742_v24 }
  0xdb   : > { %v2141_v25 = vpop.f32.mrf.mxu0  ;;  %v2147_v26 = vpop.f32.mrf.mxu1 }
  0xdc   : > { %v1190_v11 = vpack.c.bf16 %v697_v9, %v697_v9  ;;  %v1191_v12 = vpack.c.bf16 %v743_v10, %v743_v10  ;;  %v2044_v25 = vld [vmem:[%s2685_s8 + $0x2] ss:$0 sm:$0xff] }
  0xdd   : > { %v699_v27 = vpop.f32.mrf.mxu0  ;;  %v745_v28 = vpop.f32.mrf.mxu1 }
  0xdf   : > { %v2142_v29 = vpop.f32.mrf.mxu0  ;;  %v2148_v30 = vpop.f32.mrf.mxu1 }
  0xe1   : > { %v824_v33 = vpop.f32.mrf.mxu0  ;;  %v870_v34 = vpop.f32.mrf.mxu1 }
  0xe2   : > { %v825_v35 = vadd.f32 %v2030_v31, %v824_v33  ;;  %v871_v36 = vadd.f32 %v2031_v32, %v870_v34  ;;  %v2045_v33 = vld [vmem:[%s2685_s8 + $0x3] ss:$0 sm:$0xff] }
  0xe3   : > { %v2153_v37 = vpop.f32.mrf.mxu0  ;;  %v2159_v38 = vpop.f32.mrf.mxu1 }
  0xe4   : > { %v1192_v39 = vpack.c.bf16 %v825_v35, %v825_v35  ;;  %v1193_v40 = vpack.c.bf16 %v871_v36, %v871_v36 }
  0xe5   : > { %v827_v43 = vpop.f32.mrf.mxu0  ;;  %v873_v44 = vpop.f32.mrf.mxu1 }
  0xe6   : > { %v1208_v45 = vsel %vm1203_vm2, %v1192_v39, 0  ;;  %v1254_v46 = vsel %vm1203_vm2, %v1193_v40, 0 }
  0xe7   : > { %v2154_v47 = vpop.f32.mrf.mxu0  ;;  %v2160_v48 = vpop.f32.mrf.mxu1  ;;  %2198 = vmatpush3.bf16.xpose.msra.mxu0 %v1208_v45  ;;  %2204 = vmatpush3.bf16.xpose.msra.mxu1 %v1254_v46  ;;  %v2054_v45 = vld [vmem:[%s512_s26] ss:$0 sm:$0xff]  ;;  %s520_s26 = scalar_lea.vmem %s2692_s15, %s2017_s22 }
  0xe8   : > { %2209 = vmatprep.subr.bf16.mxu0 %v2326_v1  ;;  %2215 = vmatprep.subr.bf16.mxu1 %v2326_v1 }
  0xe9   : > { %v916_v53 = vpop.f32.mrf.mxu0  ;;  %v962_v54 = vpop.f32.mrf.mxu1 }
  0xea   : > { %v917_v55 = vadd.f32 %v2032_v49, %v916_v53  ;;  %v963_v56 = vadd.f32 %v2033_v50, %v962_v54 }
  0xeb   : > { %v2165_v57 = vpop.f32.mrf.mxu0  ;;  %v2171_v58 = vpop.f32.mrf.mxu1 }
  0xec   : > { %v1194_v61 = vpack.c.bf16 %v917_v55, %v917_v55  ;;  %v1195_v62 = vpack.c.bf16 %v963_v56, %v963_v56 }
  0xed   : > { %v919_v2 = vpop.f32.mrf.mxu0  ;;  %v965_v4 = vpop.f32.mrf.mxu1 }
  0xee   : > { %v1300_v5 = vsel %vm1203_vm2, %v1194_v61, 0  ;;  %v1346_v6 = vsel %vm1203_vm2, %v1195_v62, 0  ;;  %2200 = vmatmul.mubr.msk.bf16.vlgmr.msra.gmra.mxu0 %vm1203_vm2, %v1188_v59  ;;  %2206 = vmatmul.mubr.msk.bf16.vlgmr.msra.gmra.mxu1 %vm1203_vm2, %v1189_v60 }
  0xef   : > { %v2166_v7 = vpop.f32.mrf.mxu0  ;;  %v2172_v8 = vpop.f32.mrf.mxu1  ;;  %2210 = vmatpush3.bf16.xpose.msra.mxu0 %v1300_v5  ;;  %2216 = vmatpush3.bf16.xpose.msra.mxu1 %v1346_v6 }
  0xf0   : > { %2211 = vmatprep.mubr.msk.bf16.mxu0 %vm2327_vm0, %v2326_v1  ;;  %2217 = vmatprep.mubr.msk.bf16.mxu1 %vm2327_vm0, %v2326_v1 }
  0xf1   : > { %2221 = vmatprep.subr.bf16.mxu0 %v2326_v1  ;;  %2227 = vmatprep.subr.bf16.mxu1 %v2326_v1  ;;  %v1044_v14 = vpop.f32.mrf.mxu0  ;;  %v1090_v20 = vpop.f32.mrf.mxu1 }
  0xf2   : > { %v1045_v15 = vadd.f32 %v2042_v13, %v1044_v14  ;;  %v1091_v22 = vadd.f32 %v2043_v17, %v1090_v20 }
  0xf3   : > { %v2177_v16 = vpop.f32.mrf.mxu0  ;;  %v2183_v24 = vpop.f32.mrf.mxu1 }
  0xf4   : > { %v1437_v18 = vpack.c.bf16 %v1045_v15, %v1045_v15  ;;  %v1438_v26 = vpack.c.bf16 %v1091_v22, %v1091_v22 }
  0xf5   : > { %v1047_v19 = vpop.f32.mrf.mxu0  ;;  %v1093_v27 = vpop.f32.mrf.mxu1 }
  0xf6   : > { %2212 = vmatmul.mubr.msk.bf16.vlgmr.msra.gmra.mxu0 %vm1203_vm2, %v1190_v11  ;;  %2218 = vmatmul.mubr.msk.bf16.vlgmr.msra.gmra.mxu1 %vm1203_vm2, %v1191_v12  ;;  %v1446_v21 = vsel %vm1444_vm3, %v1437_v18, 0  ;;  %v1492_v29 = vsel %vm1444_vm3, %v1438_v26, 0 }
  0xf7   : > { %2223 = vmatprep.mubr.msk.bf16.mxu0 %vm2327_vm0, %v2326_v1  ;;  %2229 = vmatprep.mubr.msk.bf16.mxu1 %vm2327_vm0, %v2326_v1  ;;  %v2178_v23 = vpop.f32.mrf.mxu0  ;;  %v2184_v31 = vpop.f32.mrf.mxu1 }
  0xf8   : > { %2222 = vmatpush3.bf16.msra.mxu0 %v1446_v21  ;;  %2228 = vmatpush3.bf16.msra.mxu1 %v1492_v29 }
  0xf9   : > { %2233 = vmatprep.subr.bf16.mxu0 %v2326_v1  ;;  %v1136_v28 = vpop.f32.mrf.mxu0  ;;  %2239 = vmatprep.subr.bf16.mxu1 %v2326_v1  ;;  %v1182_v36 = vpop.f32.mrf.mxu1 }
  0xfa   : > { %v1137_v30 = vadd.f32 %v2044_v25, %v1136_v28  ;;  %v1183_v38 = vadd.f32 %v2045_v33, %v1182_v36 }
  0xfb   : > { %v2189_v32 = vpop.f32.mrf.mxu0  ;;  %v2195_v40 = vpop.f32.mrf.mxu1 }
  0xfc   : > { %v1439_v34 = vpack.c.bf16 %v1137_v30, %v1137_v30  ;;  %v1440_v41 = vpack.c.bf16 %v1183_v38, %v1183_v38  ;;  %v1630_v40 = vld [vmem:[%s2686_s9] sm:$0x3] }
  0xfd   : > { %v1139_v35 = vpop.f32.mrf.mxu0  ;;  %v1185_v42 = vpop.f32.mrf.mxu1 }
  0xfe   : > { %v2580_v37 = vsel %vm1444_vm3, %v1439_v34, 0  ;;  %v2583_v43 = vsel %vm1444_vm3, %v1440_v41, 0  ;;  %v1639_v42 = vsel %vm1637_vm5, %v1630_v40, 0 }
  0xff   : > { %v2190_v39 = vpop.f32.mrf.mxu0  ;;  %v2196_v44 = vpop.f32.mrf.mxu1 }
 0x1ae   : > { %v1244_v46 = vpop.f32.mrf.mxu0  ;;  %v1290_v47 = vpop.f32.mrf.mxu1 }
 0x1af   : > { %v1245_v48 = vadd.f32 %v2054_v45, %v1244_v46  ;;  %v1291_v51 = vadd.f32 %v2054_v45, %v1290_v47 }
 0x1b0   : > { %v2201_v49 = vpop.f32.mrf.mxu0  ;;  %v2207_v50 = vpop.f32.mrf.mxu1 }
 0x1b1   : > { %v1389_v52 = vsel %vm1388_vm4, %v1245_v48, -inf  ;;  %v1392_v57 = vsel %vm1388_vm4, %v1291_v51, -inf }
 0x1b2   : > { %v1293_v53 = vpop.f32.mrf.mxu1  ;;  %1390 = vmax.xlane.f32.xlu0 %v1389_v52  ;;  %v1247_v54 = vpop.f32.mrf.mxu0 }
 0x1b3   : > { %v1633_v53 = vld [vmem:[%s2686_s9 + $0x6] sm:$0x3] }
 0x1b4   : > { %v2202_v55 = vpop.f32.mrf.mxu0  ;;  %v2208_v56 = vpop.f32.mrf.mxu1 }
 0x1b6   : > { %v1382_v58 = vpop.f32.mrf.mxu1  ;;  %1393 = vmax.xlane.f32.xlu0 %v1392_v57  ;;  %v1336_v59 = vpop.f32.mrf.mxu0  ;;  %v1777_v57 = vsel %vm1637_vm5, %v1633_v53, 0 }
 0x1b7   : > { %v1337_v60 = vadd.f32 %v2054_v45, %v1336_v59  ;;  %v1383_v63 = vadd.f32 %v2054_v45, %v1382_v58 }
 0x1b8   : > { %v2213_v61 = vpop.f32.mrf.mxu0  ;;  %v2219_v62 = vpop.f32.mrf.mxu1 }
 0x1b9   : > { %v1395_v0 = vsel %vm1388_vm4, %v1337_v60, -inf  ;;  %v1398_v7 = vsel %vm1388_vm4, %v1383_v63, -inf }
 0x1ba   : > { %v1385_v2 = vpop.f32.mrf.mxu1  ;;  %1396 = vmax.xlane.f32.xlu1 %v1395_v0  ;;  %v1339_v4 = vpop.f32.mrf.mxu0 }
 0x1bc   : > { %v2214_v5 = vpop.f32.mrf.mxu0  ;;  %v2220_v6 = vpop.f32.mrf.mxu1 }
 0x1be   : > { %1399 = vmax.xlane.f32.xlu1 %v1398_v7 }
 0x23b   : > { %v1391_v8 = vpop.xlane.xlu0 %1390 }
 0x23c   : > { %v1401_v9 = vsub.f32 %v1245_v48, %v1391_v8  ;;  %v1632_v48 = vld [vmem:[%s2686_s9 + $0x4] sm:$0x3] }
 0x23e   : > { %v1405_v10 = vmul.f32 1.442695, %v1401_v9 }
 0x23f   : > { %v1394_v11 = vpop.xlane.xlu0 %1393 }
 0x240   : > { %2300 = vpow2.f32 %v1405_v10  ;;  %v1402_v12 = vsub.f32 %v1291_v51, %v1394_v11  ;;  %v1731_v51 = vsel %vm1637_vm5, %v1632_v48, 0  ;;  %v2299_v10 = vld [vmem:[%s2688_s11] sm:$0xff]  }
 0x242   : > { %v1407_v13 = vmul.f32 1.442695, %v1402_v12 }
 0x243   : > { %v1397_v14 = vpop.xlane.xlu1 %1396 }
 0x244   : > { %2302 = vpow2.f32 %v1407_v13  ;;  %v1403_v15 = vsub.f32 %v1337_v60, %v1397_v14 }
 0x246   : > { %v1409_v16 = vmul.f32 1.442695, %v1403_v15 }
 0x247   : > { %v1400_v17 = vpop.xlane.xlu1 %1399 }
 0x248   : > { %2304 = vpow2.f32 %v1409_v16  ;;  %v1404_v18 = vsub.f32 %v1383_v63, %v1400_v17 }
 0x24a   : > { %v1411_v19 = vmul.f32 1.442695, %v1404_v18 }
 0x24c   : > { %2306 = vpow2.f32 %v1411_v19 }
 0x24d   : > { %v2301_v20 = vpop.eup %2300 }
 0x24e   : > { %v1413_v21 = vsel %vm1388_vm4, %v2301_v20, 0.0 }
 0x24f   : > { %1414 = vadd.xlane.f32.xlu0 %v1413_v21 }
 0x251   : > { %v2303_v22 = vpop.eup %2302 }
 0x252   : > { %v1416_v23 = vsel %vm1388_vm4, %v2303_v22, 0.0 }
 0x253   : > { %1417 = vadd.xlane.f32.xlu1 %v1416_v23 }
 0x255   : > { %v2305_v24 = vpop.eup %2304 }
 0x256   : > { %v1419_v25 = vsel %vm1388_vm4, %v2305_v24, 0.0 }
 0x257   : > { %1420 = vadd.xlane.f32.xlu0 %v1419_v25 }
 0x259   : > { %v2307_v26 = vpop.eup %2306 }
 0x25a   : > { %v1422_v27 = vsel %vm1388_vm4, %v2307_v26, 0.0 }
 0x25b   : > { %1423 = vadd.xlane.f32.xlu1 %v1422_v27 }
 0x2d8   : > { %v1415_v28 = vpop.xlane.xlu0 %1414 }
 0x2d9   : > { %2308 = vrcp.f32 %v1415_v28  ;;  %v2067_v28 = vld [vmem:[%s2687_s10] ss:$0 sm:$0xff] }
 0x2dc   : > { %v1418_v29 = vpop.xlane.xlu1 %1417 }
 0x2dd   : > { %2310 = vrcp.f32 %v1418_v29 }
 0x2e0   : > { %v1421_v30 = vpop.xlane.xlu0 %1420 }
 0x2e1   : > { %2312 = vrcp.f32 %v1421_v30 }
 0x2e4   : > { %v1424_v31 = vpop.xlane.xlu1 %1423 }
 0x2e5   : > { %2314 = vrcp.f32 %v1424_v31 }
 0x2e6   : > { %v2309_v32 = vpop.eup %2308 }
 0x2e7   : > { %v1429_v33 = vmul.f32 %v2309_v32, %v2301_v20 }
 0x2e9   : > { %v1433_v34 = vpack.c.bf16 %v1429_v33, %v1429_v33 }
 0x2ea   : > { %v2311_v35 = vpop.eup %2310 }
 0x2eb   : > { %2224 = vmatmul.mubr.msk.bf16.vlgmr.msra.gmra.mxu0 %vm1388_vm4, %v1433_v34  ;;  %v1430_v36 = vmul.f32 %v2311_v35, %v2303_v22 }
 0x2ec   : > { %2234 = vmatpush3.bf16.msra.mxu0 %v2580_v37  ;;  %2235 = vmatprep.mubr.msk.bf16.mxu0 %vm2327_vm0, %v2326_v1 }
 0x2ed   : > { %v1434_v38 = vpack.c.bf16 %v1430_v36, %v1430_v36  ;;  %2245 = vmatprep.subr.bf16.mxu0 %v2326_v1  ;;  %v2328_v36 = vmov 0  }
 0x2ee   : > { %v2313_v39 = vpop.eup %2312  ;;  %2286 = vset.pattern.permute.xlu0 %v2328_v36 }
 0x2ef   : > { %2230 = vmatmul.mubr.msk.bf16.vlgmr.msra.gmra.mxu1 %vm1388_vm4, %v1434_v38  ;;  %v1431_v41 = vmul.f32 %v2313_v39, %v2305_v24  ;;  %v2068_v38 = vld [vmem:[%s2689_s12] ss:$0 sm:$0xff] }
 0x2f0   : > { %2240 = vmatpush3.bf16.msra.mxu1 %v2583_v43  ;;  %2241 = vmatprep.mubr.msk.bf16.mxu1 %vm2327_vm0, %v2326_v1  ;;  %v1631_v43 = vld [vmem:[%s2686_s9 + $0x2] sm:$0x3] }
 0x2f1   : > { %v1435_v37 = vpack.c.bf16 %v1431_v41, %v1431_v41  ;;  %2251 = vmatprep.subr.bf16.mxu1 %v2326_v1  ;;  %v1685_v47 = vsel %vm1637_vm5, %v1631_v43, 0 }
 0x2f2   : > { %v2315_v44 = vpop.eup %2314 }
 0x2f3   : > { %2236 = vmatmul.mubr.msk.bf16.vlgmr.msra.gmra.mxu0 %vm1388_vm4, %v1435_v37  ;;  %v1432_v45 = vmul.f32 %v2315_v44, %v2307_v26 }
 0x2f4   : > { %2246 = vmatpush3.bf16.msra.mxu0 %v1639_v42  ;;  %2247 = vmatprep.mubr.msk.bf16.mxu0 %vm2327_vm0, %v2326_v1 }
 0x2f5   : > { %v1436_v46 = vpack.c.bf16 %v1432_v45, %v1432_v45  ;;  %2257 = vmatprep.subr.bf16.mxu0 %v2326_v1 }
 0x2f7   : > { %2242 = vmatmul.mubr.msk.bf16.vlgmr.msra.gmra.mxu1 %vm1388_vm4, %v1436_v46 }
 0x2f8   : > { %2253 = vmatprep.mubr.msk.bf16.mxu1 %vm2327_vm0, %v2326_v1  ;;  %2252 = vmatpush3.bf16.msra.mxu1 %v1685_v47  ;;  %v1926_v47 = vld [vmem:[%s516_s16] sm:$0xff] }
 0x2f9   : > { %2263 = vmatprep.subr.bf16.mxu1 %v2326_v1 }
 0x3ab   : > { %v1482_v49 = vpop.f32.mrf.mxu0 }
 0x3ac   : > { %v1626_v50 = vpack.c.bf16 %v1482_v49, %v1482_v49 }
 0x3ad   : > { %v2225_v52 = vpop.f32.mrf.mxu0 }
 0x3ae   : > { %2248 = vmatmul.mubr.msk.bf16.vlgmr.msra.gmra.mxu0 %vm1203_vm2, %v1626_v50 }
 0x3af   : > { %v1485_v54 = vpop.f32.mrf.mxu0  ;;  %v1528_v55 = vpop.f32.mrf.mxu1  ;;  %2258 = vmatpush3.bf16.msra.mxu0 %v1731_v51  ;;  %2259 = vmatprep.mubr.msk.bf16.mxu0 %vm2327_vm0, %v2326_v1 }
 0x3b0   : > { %v1627_v56 = vpack.c.bf16 %v1528_v55, %v1528_v55  ;;  %2269 = vmatprep.subr.bf16.mxu0 %v2326_v1 }
 0x3b1   : > { %v2226_v58 = vpop.f32.mrf.mxu0  ;;  %v2231_v59 = vpop.f32.mrf.mxu1 }
 0x3b2   : > { %2254 = vmatmul.mubr.msk.bf16.vlgmr.msra.gmra.mxu1 %vm1203_vm2, %v1627_v56  ;;  %v2071_v56 = vld [vmem:[%s2690_s13] ss:$0 sm:$0xff] }
 0x3b3   : > { %v1531_v60 = vpop.f32.mrf.mxu1  ;;  %v1574_v61 = vpop.f32.mrf.mxu0  ;;  %2264 = vmatpush3.bf16.msra.mxu1 %v1777_v57  ;;  %2265 = vmatprep.mubr.msk.bf16.mxu1 %vm2327_vm0, %v2326_v1  ;;  %v2072_v58 = vld [vmem:[%s2691_s14] ss:$0 sm:$0xff] }
 0x3b4   : > { %v1628_v62 = vpack.c.bf16 %v1574_v61, %v1574_v61 }
 0x3b5   : > { %v2232_v63 = vpop.f32.mrf.mxu1  ;;  %v2237_v0 = vpop.f32.mrf.mxu0 }
 0x3b6   : > { %2260 = vmatmul.mubr.msk.bf16.vlgmr.msra.gmra.mxu0 %vm1203_vm2, %v1628_v62 }
 0x3b7   : > { %v1577_v2 = vpop.f32.mrf.mxu0  ;;  %v1620_v4 = vpop.f32.mrf.mxu1  ;;  %2271 = vmatprep.mubr.msk.bf16.mxu0 %vm2327_vm0, %v2326_v1  ;;  %2270 = vmatpush3.bf16.msra.mxu0 %v2299_v10 }
 0x3b8   : > { %v1629_v5 = vpack.c.bf16 %v1620_v4, %v1620_v4 }
 0x3b9   : > { %v2238_v6 = vpop.f32.mrf.mxu0  ;;  %v2243_v7 = vpop.f32.mrf.mxu1 }
 0x3ba   : > { %2266 = vmatmul.mubr.msk.bf16.vlgmr.msra.gmra.mxu1 %vm1203_vm2, %v1629_v5 }
 0x3bb   : > { %v1623_v8 = vpop.f32.mrf.mxu1 }
 0x3bd   : > { %v2244_v9 = vpop.f32.mrf.mxu1 }
 0x46e   : > { %v1675_v11 = vpop.f32.mrf.mxu0 }
 0x46f   : > { %v1819_v19 = vsel %vm566_vm1, %v1675_v11, 0.0 }
 0x470   : > { %v2249_v12 = vpop.f32.mrf.mxu0 }
 0x472   : > { %v1678_v13 = vpop.f32.mrf.mxu0  ;;  %v1721_v14 = vpop.f32.mrf.mxu1 }
 0x473   : > { %v1820_v1 = vsel %vm566_vm1, %v1721_v14, 0.0 }
 0x474   : > { %v2250_v15 = vpop.f32.mrf.mxu0  ;;  %v2255_v16 = vpop.f32.mrf.mxu1  ;;  %v1821_v21 = vadd.f32 %v1820_v1, %v1819_v19 }
 0x476   : > { %v1724_v17 = vpop.f32.mrf.mxu1  ;;  %v1767_v18 = vpop.f32.mrf.mxu0 }
 0x477   : > { %v1822_v20 = vsel %vm566_vm1, %v1767_v18, 0.0 }
 0x478   : > { %v2256_v22 = vpop.f32.mrf.mxu1  ;;  %v2261_v23 = vpop.f32.mrf.mxu0  ;;  %v1823_v24 = vadd.f32 %v1822_v20, %v1821_v21 }
 0x47a   : > { %v1770_v25 = vpop.f32.mrf.mxu0  ;;  %v1813_v26 = vpop.f32.mrf.mxu1 }
 0x47b   : > { %v1824_v27 = vsel %vm566_vm1, %v1813_v26, 0.0 }
 0x47c   : > { %v1825_v29 = vadd.f32 %v1824_v27, %v1823_v24  ;;  %v2262_v30 = vpop.f32.mrf.mxu0  ;;  %v2267_v31 = vpop.f32.mrf.mxu1 }
 0x47e   : > { %v1833_v32 = vadd.f32 %v2067_v28, %v1825_v29  ;;  %v1816_v33 = vpop.f32.mrf.mxu1 }
 0x480   : > { %v1834_v34 = vpack.c.bf16 %v1833_v32, %v1833_v32  ;;  %v2268_v35 = vpop.f32.mrf.mxu1 }
 0x482   : > { %2272 = vmatmul.mubr.msk.bf16.vlgmr.msra.gmra.mxu0 %vm566_vm1, %v1834_v34 }
 0x542   : > { %v1887_v39 = vpop.f32.mrf.mxu0 }
 0x543   : > { %v1888_v40 = vadd.f32 %v2068_v38, %v1887_v39 }
 0x544   : > { %v2273_v41 = vpop.f32.mrf.mxu0 }
 0x545   : > { %v1893_v37 = vadd.f32 %v1888_v40, %v2439_v3 }
 0x546   : > { %v1890_v42 = vpop.f32.mrf.mxu0 }
 0x547   : > { %v1896_v44 = vsel %vm566_vm1, %v1893_v37, 0.0  ;;  %v1901_v45 = vmul.f32 %v1893_v37, %v1893_v37 }
 0x548   : > { %1897 = vadd.xlane.f32.xlu0 %v1896_v44  ;;  %v2274_v46 = vpop.f32.mrf.mxu0 }
 0x549   : > { %v1902_v43 = vsel %vm566_vm1, %v1901_v45, 0.0 }
 0x54a   : > { %1903 = vadd.xlane.f32.xlu1 %v1902_v43 }
 0x55e   : > { %1929 = vperm.xlu0 %2286, %v1926_v47  }
 0x5d1   : > { %v1898_v48 = vpop.xlane.xlu0 %1897 }
 0x5d2   : > { %v1900_v49 = vmul.f32 0.0625, %v1898_v48 }
 0x5d3   : > { %v1904_v3 = vpop.xlane.xlu1 %1903 }
 0x5d4   : > { %v1906_v50 = vmul.f32 %v1900_v49, %v1900_v49  ;;  %v1905_v51 = vmul.f32 0.0625, %v1904_v3  ;;  %v1908_v54 = vsub.f32 %v1893_v37, %v1900_v49 }
 0x5d6   : > { %v1907_v52 = vsub.f32 %v1905_v51, %v1906_v50 }
 0x5d8   : > { %v1909_v53 = vadd.f32 1e-05, %v1907_v52 }
 0x5d9   : > { %v1930_v60 = vpop.permute.xlu0 %1929 }
 0x5da   : > { %2316 = vrsqrt.f32 %v1909_v53 }
 0x5e7   : > { %v2317_v55 = vpop.eup %2316 }
 0x5e8   : > { %v1911_v57 = vmul.f32 %v2317_v55, %v1908_v54 }
 0x5ea   : > { %v1918_v59 = vmul.f32 %v2071_v56, %v1911_v57 }
 0x5ec   : > { %v1925_v61 = vadd.f32 %v2072_v58, %v1918_v59 }
 0x5ee   : > { %v1932_v62 = vmul.f32 %v1930_v60, %v1925_v61 }
 0x5f0   : > { %v1933_v63 = vpack.c.bf16 %v1932_v62, %v1932_v62 }
 0x5f2   : > { %1935 = vst.msk [vmem:[%s520_s26] sm:$0xf] %vm1934_vm6, %v1933_v63 }
 0x5f3 PF: > { %s25_s18 = sadd.s32 1, %s2324_s18  }
 0x5f4   : > { %p22_p4 = scmp.ge.s32.totalorder %s25_s18, 4  }
 0x5f6   :  { %24 = sbr.rel (!%p22_p4) target bundleno = 1 (0x1), region = 116 }

</bundles_post_ra>
